<compile_context>
chip_gen: v5e
topology: v5e:2x2
jax: 0.10.0
libtpu: 0.0.40
codegen_flags: <defaults>
</compile_context>

<pallas_src>
import functools

import jax
import jax.numpy as jnp
from jax.experimental import pallas as pl

# ---------------- small, deterministic configuration ----------------
BS = 4            # batch
S = 16            # source / encoder sequence length
T = 6             # max_q_len (decoder steps; step 0 stays zero like the reference)
V = 128           # vocab_size
E = 32            # embed_dim
HE = 128          # enc_hid_dim
HD = 128          # dec_hid_dim
MAX_N_OOV = 16
VEXT = V + MAX_N_OOV          # 144
VP = 256                      # extended vocab padded to a lane multiple (144 -> 256)

PAD_ID = 0
UNK_ID = 1
START_ID = 2


# ---------------- Pallas kernel: full decode ----------------
def seq2seq_decoder_kernel(gi_emb_ref, enc_t_ref, enc_flat_ref, ctx_copy_ref,
                           bias1_ref, bias2_ref, w_h1_ref, b_h_ref, wih_w_ref,
                           wa2t_ref, woutp_h_ref, woutp_w_ref, b_outp_ref,
                           out_ref, *, tm1, hd, he, v):
    f32 = jnp.float32
    bf16 = jnp.bfloat16

    enc_t = enc_t_ref[...]          # (HE, BP*S)        bf16
    enc_flat = enc_flat_ref[...]    # (BP*S, HE)        bf16
    ctx_copy = ctx_copy_ref[...]    # (BP*S, HE+VP)     bf16
    bias1 = bias1_ref[...]          # (BP, BP*S)        f32 additive mask
    bias2 = bias2_ref[...]          # (TM1*BP, BP*S)    f32 additive mask (tiled)
    w_h1 = w_h1_ref[...]            # (HD, HE+3HD)      bf16  [wa1t | whh]
    b_h = b_h_ref[...]              # (1, 3HD)          f32
    wih_w = wih_w_ref[...]          # (HE, 3HD)         bf16
    wa2t = wa2t_ref[...]            # (HD, HE)          bf16
    woutp_h = woutp_h_ref[...]      # (HD, VP)          bf16  cols [0,V) vocab, col V = p_gen
    woutp_w = woutp_w_ref[...]      # (HE, VP)          bf16
    b_outp = b_outp_ref[...]        # (1, VP)           f32

    bp = bias1.shape[0]

    # -------- phase 1: serial attention-1 + GRU recurrence (fully unrolled) --------
    h1 = jnp.zeros((bp, hd), f32)
    h_list = []
    for t in range(tm1):
        # fused: attention-1 hidden projection + GRU hidden-side gates in one matmul
        hg = jnp.dot(h1.astype(bf16), w_h1, preferred_element_type=f32)     # (BP, HE+3HD)
        hw1 = hg[:, :he]                                                    # (BP, HE)
        gh = hg[:, he:] + b_h                                               # (BP, 3HD)

        # attention 1: lane-dense scores over BP*S columns, masked softmax, context
        s1 = jnp.dot(hw1.astype(bf16), enc_t, preferred_element_type=f32) + bias1
        m1 = jnp.max(s1, axis=1, keepdims=True)
        e1 = jnp.exp(s1 - m1)
        a1 = e1 * pl.reciprocal(jnp.sum(e1, axis=1, keepdims=True), approx=True)
        weighted = jnp.dot(a1.astype(bf16), enc_flat, preferred_element_type=f32)  # (BP, HE)

        # GRUCell (embedding gate contribution precomputed in the wrapper)
        gi = gi_emb_ref[t] + jnp.dot(weighted.astype(bf16), wih_w,
                                     preferred_element_type=f32)            # (BP, 3HD)
        r = jax.nn.sigmoid(gi[:, :hd] + gh[:, :hd])
        z = jax.nn.sigmoid(gi[:, hd:2 * hd] + gh[:, hd:2 * hd])
        n = jnp.tanh(gi[:, 2 * hd:] + r * gh[:, 2 * hd:])
        h1 = (1.0 - z) * n + z * h1
        h_list.append(h1)

    h_all = jnp.concatenate(h_list, axis=0)                                 # (TM1*BP, HD)

    # -------- phase 2: batched attention-2 + output head + pointer-gen mix --------
    hw2 = jnp.dot(h_all.astype(bf16), wa2t, preferred_element_type=f32)     # (TM1*BP, HE)
    s2 = jnp.dot(hw2.astype(bf16), enc_t, preferred_element_type=f32) + bias2
    m2 = jnp.max(s2, axis=1, keepdims=True)
    e2 = jnp.exp(s2 - m2)
    a2 = e2 / jnp.sum(e2, axis=1, keepdims=True)                            # exact softmax

    # context + copy-scatter fused into one matmul against [enc_flat | onehot_flat]
    wc = jnp.dot(a2.astype(bf16), ctx_copy, preferred_element_type=f32)     # (TM1*BP, HE+VP)
    weighted2 = wc[:, :he]                                                  # (TM1*BP, HE)
    copy_raw = wc[:, he:]                                                   # (TM1*BP, VP)

    # fused vocab head + p_gen (p_gen logit sits in column V)
    fused = (jnp.dot(h_all.astype(bf16), woutp_h, preferred_element_type=f32) +
             jnp.dot(weighted2.astype(bf16), woutp_w, preferred_element_type=f32) +
             b_outp)                                                        # (TM1*BP, VP)
    logits = fused[:, :v]
    mv = jnp.max(logits, axis=1, keepdims=True)
    ev = jnp.exp(logits - mv)
    p_vocab = ev / jnp.sum(ev, axis=1, keepdims=True)                       # exact softmax
    p_gen = jax.nn.sigmoid(fused[:, v:v + 1])                               # (TM1*BP, 1)

    # pointer-generator mix, done in two lane halves (no zero-padded p_vocab copy)
    p_low = p_gen * p_vocab + (1.0 - p_gen) * copy_raw[:, :v]
    p_high = (1.0 - p_gen) * copy_raw[:, v:]
    out_ref[...] = jnp.concatenate([p_low, p_high], axis=1)                 # (TM1*BP, VP)


def run_decoder(gi_emb, enc_t_flat, enc_flat, ctx_copy, bias1, bias2,
                w_h1, b_h, wih_w, wa2t, woutp_h, woutp_w, b_outp):
    tm1, bp, _ = gi_emb.shape
    vp = b_outp.shape[1]
    hd, he = wa2t.shape
    kernel = functools.partial(seq2seq_decoder_kernel, tm1=tm1, hd=hd, he=he, v=V)
    # single invocation, no grid: everything (<1 MB) lives in VMEM for the whole decode
    return pl.pallas_call(
        kernel,
        out_shape=jax.ShapeDtypeStruct((tm1 * bp, vp), jnp.float32),
    )(gi_emb, enc_t_flat, enc_flat, ctx_copy, bias1, bias2, w_h1, b_h,
      wih_w, wa2t, woutp_h, woutp_w, b_outp)


# ---------------- plain-JAX glue: Seq2Seq.forward ----------------
@functools.partial(jax.jit, static_argnames=('max_n_oov',))
def seq2seq_forward(params, input_ids, segment_ids, input_mask,
                    target_word_encoding, source_word_encoding_extended,
                    max_n_oov):
    del segment_ids  # TODO(synk): stand-in encoder ignores token types
    bs, t_len = target_word_encoding.shape
    s_len = source_word_encoding_extended.shape[1]
    bp = ((bs + 7) // 8) * 8          # pad batch to sublane width
    tm1 = t_len - 1

    # clamp OOV targets to <unk> (masked_fill_ semantics)
    tgt = jnp.where(target_word_encoding >= V, UNK_ID, target_word_encoding)
    question_embed = params['word_embedding'][tgt]             # (B,T,E); dropout=identity

    # TODO(synk): stand-in for BertModel encoder (embedding + tanh projection).
    enc_outputs = jnp.tanh(
        params['enc_embed'][input_ids] @ params['enc_proj']
    ) * input_mask.astype(jnp.float32)[..., None]              # (B,S,HE)

    # decoder inputs under (deterministic) teacher forcing:
    #   step 1 uses <start>, step t>1 uses question_embed[:, t-1]
    start_emb = jnp.broadcast_to(params['word_embedding'][START_ID], (bs, E))
    emb_seq = jnp.concatenate(
        [start_emb[None], jnp.transpose(question_embed[:, 1:t_len - 1], (1, 0, 2))],
        axis=0)                                                # (T-1, B, E)

    # embedding contribution to the GRU input gates, hoisted out of the kernel
    gi_emb = jnp.einsum('tbe,eg->tbg', emb_seq, params['wih_e']) + params['b_i']
    gi_emb_pad = jnp.zeros((tm1, bp, 3 * HD), jnp.float32).at[:, :bs].set(gi_emb)

    # ---- batch padding + flattened encoder / mask / copy operands ----
    enc_pad = jnp.zeros((bp, s_len, HE), jnp.float32).at[:bs].set(enc_outputs)
    src_pad = jnp.full((bp, s_len), 3, jnp.int32).at[:bs].set(
        source_word_encoding_extended.astype(jnp.int32))

    pad_bias = jnp.where(src_pad == PAD_ID, -1e30, 0.0).astype(jnp.float32)   # (BP,S)
    same_batch = jnp.eye(bp, dtype=bool)
    bias1 = jnp.where(same_batch[:, :, None], pad_bias[None, :, :], -1e30)
    bias1 = bias1.reshape(bp, bp * s_len).astype(jnp.float32)                 # (BP, BP*S)
    bias2 = jnp.tile(bias1, (tm1, 1))                                         # (TM1*BP, BP*S)

    onehot = (src_pad[:, :, None] ==
              jnp.arange(VP, dtype=jnp.int32)[None, None, :]).astype(jnp.float32)  # (BP,S,VP)

    bf = jnp.bfloat16
    enc_t_flat = jnp.transpose(enc_pad, (2, 0, 1)).reshape(HE, bp * s_len).astype(bf)
    enc_flat_f32 = enc_pad.reshape(bp * s_len, HE)
    enc_flat = enc_flat_f32.astype(bf)
    ctx_copy = jnp.concatenate(
        [enc_flat_f32, onehot.reshape(bp * s_len, VP)], axis=1).astype(bf)    # (BP*S, HE+VP)

    # ---- fused / transposed bf16 weights for the kernel ----
    wa1t = params['wa1'].T                                                    # (HD, HE)
    w_h1 = jnp.concatenate([wa1t, params['whh']], axis=1).astype(bf)          # (HD, HE+3HD)
    wih_w = params['wih_w'].astype(bf)                                        # (HE, 3HD)
    wa2t = params['wa2'].T.astype(bf)                                         # (HD, HE)

    woutp_h = (jnp.zeros((HD, VP), jnp.float32)
               .at[:, :V].set(params['wout_h'])
               .at[:, V:V + 1].set(params['wp_h'])).astype(bf)
    woutp_w = (jnp.zeros((HE, VP), jnp.float32)
               .at[:, :V].set(params['wout_w'])
               .at[:, V:V + 1].set(params['wp_w'])).astype(bf)
    b_outp = (jnp.zeros((1, VP), jnp.float32)
              .at[:, :V].set(params['b_out'])
              .at[:, V:V + 1].set(params['b_p']))

    p_out_flat = run_decoder(gi_emb_pad, enc_t_flat, enc_flat, ctx_copy,
                             bias1, bias2, w_h1, params['b_h'], wih_w, wa2t,
                             woutp_h, woutp_w, b_outp)          # (TM1*BP, VP)

    p_out_seq = p_out_flat.reshape(tm1, bp, VP)[:, :bs, :V + max_n_oov]
    outputs = jnp.zeros((bs, t_len, V + max_n_oov), jnp.float32)
    outputs = outputs.at[:, 1:, :].set(jnp.transpose(p_out_seq, (1, 0, 2)))
    return jnp.log(outputs + 1e-12), outputs


# ---------------- pure-JAX f32 reference (for correctness check) ----------------
def reference_forward(params, input_ids, input_mask, target_ids, src_ext, max_n_oov):
    bs, t_len = target_ids.shape
    tgt = jnp.where(target_ids >= V, UNK_ID, target_ids)
    q_emb = params['word_embedding'][tgt]
    enc = jnp.tanh(params['enc_embed'][input_ids] @ params['enc_proj'])
    enc = enc * input_mask.astype(jnp.float32)[..., None]
    pad_mask = (src_ext == PAD_ID)
    onehot = jax.nn.one_hot(src_ext, V + max_n_oov, dtype=jnp.float32)

    def attn(h, wa):
        proj = jnp.einsum('bse,ed->bsd', enc, wa)
        sc = jnp.einsum('bd,bsd->bs', h, proj)
        sc = jnp.where(pad_mask, -1e30, sc)
        return jax.nn.softmax(sc, axis=1)

    h = jnp.zeros((bs, HD), jnp.float32)
    emb = jnp.broadcast_to(params['word_embedding'][START_ID], (bs, E))
    outs = []
    for t in range(1, t_len):
        a1 = attn(h, params['wa1'])
        weighted = jnp.einsum('bs,bse->be', a1, enc)
        gi = emb @ params['wih_e'] + weighted @ params['wih_w'] + params['b_i']
        gh = h @ params['whh'] + params['b_h']
        r = jax.nn.sigmoid(gi[:, :HD] + gh[:, :HD])
        z = jax.nn.sigmoid(gi[:, HD:2 * HD] + gh[:, HD:2 * HD])
        n = jnp.tanh(gi[:, 2 * HD:] + r * gh[:, 2 * HD:])
        h = (1.0 - z) * n + z * h
        a2 = attn(h, params['wa2'])
        weighted2 = jnp.einsum('bs,bse->be', a2, enc)
        logits = h @ params['wout_h'] + weighted2 @ params['wout_w'] + params['b_out']
        p_vocab = jax.nn.softmax(logits, axis=1)
        p_gen = jax.nn.sigmoid(h @ params['wp_h'] + weighted2 @ params['wp_w'] + params['b_p'])
        p_out = p_gen * jnp.concatenate(
            [p_vocab, jnp.zeros((bs, max_n_oov), jnp.float32)], axis=1)
        p_out = p_out + (1.0 - p_gen) * jnp.einsum('bs,bsv->bv', a2, onehot)
        outs.append(p_out)
        emb = q_emb[:, t]                       # deterministic teacher forcing
    outputs = jnp.zeros((bs, t_len, V + max_n_oov), jnp.float32)
    outputs = outputs.at[:, 1:, :].set(jnp.stack(outs, axis=1))
    return outputs


# ---------------- deterministic parameter init ----------------
def init_params(key):
    ks = jax.random.split(key, 16)
    sc = 0.05
    return {
        'word_embedding': sc * jax.random.normal(ks[0], (V, E), jnp.float32),
        'enc_embed':      sc * jax.random.normal(ks[1], (V, HE), jnp.float32),
        'enc_proj':       sc * jax.random.normal(ks[2], (HE, HE), jnp.float32),
        'wa1':            sc * jax.random.normal(ks[3], (HE, HD), jnp.float32),
        'wa2':            sc * jax.random.normal(ks[4], (HE, HD), jnp.float32),
        'wih_e':          sc * jax.random.normal(ks[5], (E, 3 * HD), jnp.float32),
        'wih_w':          sc * jax.random.normal(ks[6], (HE, 3 * HD), jnp.float32),
        'b_i':            sc * jax.random.normal(ks[7], (1, 3 * HD), jnp.float32),
        'whh':            sc * jax.random.normal(ks[8], (HD, 3 * HD), jnp.float32),
        'b_h':            sc * jax.random.normal(ks[9], (1, 3 * HD), jnp.float32),
        'wout_h':         sc * jax.random.normal(ks[10], (HD, V), jnp.float32),
        'wout_w':         sc * jax.random.normal(ks[11], (HE, V), jnp.float32),
        'b_out':          sc * jax.random.normal(ks[12], (1, V), jnp.float32),
        'wp_h':           sc * jax.random.normal(ks[13], (HD, 1), jnp.float32),
        'wp_w':           sc * jax.random.normal(ks[14], (HE, 1), jnp.float32),
        'b_p':            sc * jax.random.normal(ks[15], (1, 1), jnp.float32),
    }


if __name__ == "__main__":
    key = jax.random.PRNGKey(0)
    kp, k1, k2, k3 = jax.random.split(key, 4)
    params = init_params(kp)

    input_ids = jax.random.randint(k1, (BS, S), 3, V, dtype=jnp.int32)
    segment_ids = jnp.zeros((BS, S), jnp.int32)
    input_mask = jnp.ones((BS, S), jnp.int32)

    # target ids include some values >= vocab_size to exercise the <unk> clamp
    target_ids = jax.random.randint(k2, (BS, T), 3, V + 5, dtype=jnp.int32)

    # extended source encoding: values in [0, V+MAX_N_OOV), some pads, pos 0 non-pad
    src_ext = jax.random.randint(k3, (BS, S), 3, VEXT, dtype=jnp.int32)
    src_ext = src_ext.at[:, -3:].set(PAD_ID)       # trailing pads
    src_ext = src_ext.at[:, 0].set(3)              # guarantee a non-pad position

    log_out, outputs = seq2seq_forward(params, input_ids, segment_ids, input_mask,
                                       target_ids, src_ext, MAX_N_OOV)
    jax.block_until_ready(outputs)

    # sanity 1: each decoded step distribution sums to ~1 (p_gen*p_vocab + copy mass)
    sums = jnp.sum(outputs[:, 1:, :], axis=-1)
    assert bool(jnp.all(jnp.abs(sums - 1.0) < 5e-3)), "distribution does not sum to 1"
    assert bool(jnp.all(jnp.isfinite(log_out)))

    # sanity 2: match a pure-JAX f32 reference (bf16 MXU operands -> loose tolerance)
    ref_outputs = reference_forward(params, input_ids, input_mask,
                                    target_ids, src_ext, MAX_N_OOV)
    max_diff = float(jnp.max(jnp.abs(outputs - ref_outputs)))
    assert max_diff < 2e-2, f"kernel deviates from reference: {max_diff}"

    print("KERNEL_OK")
</pallas_src>

<mosaic_0001>
module attributes {stable_mosaic.version = 11 : i64} {
  func.func @seq2seq_decoder_kernel(%arg0: memref<5x8x384xf32, #tpu.memory_space<vmem>>, %arg1: memref<128x128xbf16, #tpu.memory_space<vmem>>, %arg2: memref<128x128xbf16, #tpu.memory_space<vmem>>, %arg3: memref<128x384xbf16, #tpu.memory_space<vmem>>, %arg4: memref<8x128xf32, #tpu.memory_space<vmem>>, %arg5: memref<40x128xf32, #tpu.memory_space<vmem>>, %arg6: memref<128x512xbf16, #tpu.memory_space<vmem>>, %arg7: memref<1x384xf32, #tpu.memory_space<vmem>>, %arg8: memref<128x384xbf16, #tpu.memory_space<vmem>>, %arg9: memref<128x128xbf16, #tpu.memory_space<vmem>>, %arg10: memref<128x256xbf16, #tpu.memory_space<vmem>>, %arg11: memref<128x256xbf16, #tpu.memory_space<vmem>>, %arg12: memref<1x256xf32, #tpu.memory_space<vmem>>, %arg13: memref<40x256xf32, #tpu.memory_space<vmem>>) attributes {dimension_semantics = [], scalar_prefetch = 0 : i64, scratch_operands = 0 : i64, tpu.core_type = #tpu.core_type<tc>} {
    %c0 = arith.constant 0 : index
    %c0_0 = arith.constant 0 : index
    %0 = vector.load %arg1[%c0, %c0_0] : memref<128x128xbf16, #tpu.memory_space<vmem>>, vector<128x128xbf16>
    %c0_1 = arith.constant 0 : index
    %c0_2 = arith.constant 0 : index
    %1 = vector.load %arg2[%c0_1, %c0_2] : memref<128x128xbf16, #tpu.memory_space<vmem>>, vector<128x128xbf16>
    %c0_3 = arith.constant 0 : index
    %c0_4 = arith.constant 0 : index
    %2 = vector.load %arg3[%c0_3, %c0_4] : memref<128x384xbf16, #tpu.memory_space<vmem>>, vector<128x384xbf16>
    %c0_5 = arith.constant 0 : index
    %c0_6 = arith.constant 0 : index
    %3 = vector.load %arg4[%c0_5, %c0_6] : memref<8x128xf32, #tpu.memory_space<vmem>>, vector<8x128xf32>
    %c0_7 = arith.constant 0 : index
    %c0_8 = arith.constant 0 : index
    %4 = vector.load %arg5[%c0_7, %c0_8] : memref<40x128xf32, #tpu.memory_space<vmem>>, vector<40x128xf32>
    %c0_9 = arith.constant 0 : index
    %c0_10 = arith.constant 0 : index
    %5 = vector.load %arg6[%c0_9, %c0_10] : memref<128x512xbf16, #tpu.memory_space<vmem>>, vector<128x512xbf16>
    %c0_11 = arith.constant 0 : index
    %c0_12 = arith.constant 0 : index
    %6 = vector.load %arg7[%c0_11, %c0_12] : memref<1x384xf32, #tpu.memory_space<vmem>>, vector<1x384xf32>
    %c0_13 = arith.constant 0 : index
    %c0_14 = arith.constant 0 : index
    %7 = vector.load %arg8[%c0_13, %c0_14] : memref<128x384xbf16, #tpu.memory_space<vmem>>, vector<128x384xbf16>
    %c0_15 = arith.constant 0 : index
    %c0_16 = arith.constant 0 : index
    %8 = vector.load %arg9[%c0_15, %c0_16] : memref<128x128xbf16, #tpu.memory_space<vmem>>, vector<128x128xbf16>
    %c0_17 = arith.constant 0 : index
    %c0_18 = arith.constant 0 : index
    %9 = vector.load %arg10[%c0_17, %c0_18] : memref<128x256xbf16, #tpu.memory_space<vmem>>, vector<128x256xbf16>
    %c0_19 = arith.constant 0 : index
    %c0_20 = arith.constant 0 : index
    %10 = vector.load %arg11[%c0_19, %c0_20] : memref<128x256xbf16, #tpu.memory_space<vmem>>, vector<128x256xbf16>
    %c0_21 = arith.constant 0 : index
    %c0_22 = arith.constant 0 : index
    %11 = vector.load %arg12[%c0_21, %c0_22] : memref<1x256xf32, #tpu.memory_space<vmem>>, vector<1x256xf32>
    %cst = arith.constant 0.000000e+00 : f32
    %12 = vector.broadcast %cst : f32 to vector<8x128xf32>
    %13 = arith.truncf %12 : vector<8x128xf32> to vector<8x128xbf16>
    %cst_23 = arith.constant dense<0.000000e+00> : vector<8x512xf32>
    %14 = tpu.matmul %13, %5, %cst_23 {dimension_numbers = #tpu.dot_dimension_numbers<[1], [0], [0], [1], [0, 0, 1, 1], [], []>} : vector<8x128xbf16>, vector<128x512xbf16>, vector<8x512xf32> -> vector<8x512xf32>
    %15 = vector.extract_strided_slice %14 {offsets = [0, 0], sizes = [8, 128], strides = [1, 1]} : vector<8x512xf32> to vector<8x128xf32>
    %16 = vector.extract_strided_slice %14 {offsets = [0, 128], sizes = [8, 384], strides = [1, 1]} : vector<8x512xf32> to vector<8x384xf32>
    %17 = vector.broadcast %6 : vector<1x384xf32> to vector<8x384xf32>
    %18 = arith.addf %16, %17 : vector<8x384xf32>
    %19 = arith.truncf %15 : vector<8x128xf32> to vector<8x128xbf16>
    %cst_24 = arith.constant dense<0.000000e+00> : vector<8x128xf32>
    %20 = tpu.matmul %19, %0, %cst_24 {dimension_numbers = #tpu.dot_dimension_numbers<[1], [0], [0], [1], [0, 0, 1, 1], [], []>} : vector<8x128xbf16>, vector<128x128xbf16>, vector<8x128xf32> -> vector<8x128xf32>
    %21 = arith.addf %20, %3 : vector<8x128xf32>
    %cst_25 = arith.constant dense<0xFF800000> : vector<8xf32>
    %22 = vector.multi_reduction <maximumf>, %21, %cst_25 [1] : vector<8x128xf32> to vector<8xf32>
    %23 = vector.shape_cast %22 : vector<8xf32> to vector<8x1xf32>
    %24 = vector.broadcast %23 : vector<8x1xf32> to vector<8x128xf32>
    %25 = arith.subf %21, %24 : vector<8x128xf32>
    %26 = math.exp %25 : vector<8x128xf32>
    %cst_26 = arith.constant dense<0.000000e+00> : vector<8xf32>
    %27 = vector.multi_reduction <add>, %26, %cst_26 [1] : vector<8x128xf32> to vector<8xf32>
    %28 = vector.shape_cast %27 : vector<8xf32> to vector<8x1xf32>
    %29 = tpu.reciprocal %28 {approx = true} : vector<8x1xf32> -> vector<8x1xf32>
    %30 = vector.broadcast %29 : vector<8x1xf32> to vector<8x128xf32>
    %31 = arith.mulf %26, %30 : vector<8x128xf32>
    %32 = arith.truncf %31 : vector<8x128xf32> to vector<8x128xbf16>
    %cst_27 = arith.constant dense<0.000000e+00> : vector<8x128xf32>
    %33 = tpu.matmul %32, %1, %cst_27 {dimension_numbers = #tpu.dot_dimension_numbers<[1], [0], [0], [1], [0, 0, 1, 1], [], []>} : vector<8x128xbf16>, vector<128x128xbf16>, vector<8x128xf32> -> vector<8x128xf32>
    %c0_28 = arith.constant 0 : index
    %c0_29 = arith.constant 0 : index
    %c0_30 = arith.constant 0 : index
    %34 = vector.load %arg0[%c0_28, %c0_29, %c0_30] : memref<5x8x384xf32, #tpu.memory_space<vmem>>, vector<1x8x384xf32>
    %35 = vector.shape_cast %34 : vector<1x8x384xf32> to vector<8x384xf32>
    %36 = arith.truncf %33 : vector<8x128xf32> to vector<8x128xbf16>
    %cst_31 = arith.constant dense<0.000000e+00> : vector<8x384xf32>
    %37 = tpu.matmul %36, %7, %cst_31 {dimension_numbers = #tpu.dot_dimension_numbers<[1], [0], [0], [1], [0, 0, 1, 1], [], []>} : vector<8x128xbf16>, vector<128x384xbf16>, vector<8x384xf32> -> vector<8x384xf32>
    %38 = arith.addf %35, %37 : vector<8x384xf32>
    %39 = vector.extract_strided_slice %38 {offsets = [0, 0], sizes = [8, 128], strides = [1, 1]} : vector<8x384xf32> to vector<8x128xf32>
    %40 = vector.extract_strided_slice %18 {offsets = [0, 0], sizes = [8, 128], strides = [1, 1]} : vector<8x384xf32> to vector<8x128xf32>
    %41 = arith.addf %39, %40 : vector<8x128xf32>
    %42 = arith.negf %41 : vector<8x128xf32>
    %43 = math.exp %42 : vector<8x128xf32>
    %cst_32 = arith.constant 1.000000e+00 : f32
    %44 = vector.broadcast %cst_32 : f32 to vector<8x128xf32>
    %45 = arith.addf %44, %43 : vector<8x128xf32>
    %46 = arith.divf %44, %45 : vector<8x128xf32>
    %47 = vector.extract_strided_slice %38 {offsets = [0, 128], sizes = [8, 128], strides = [1, 1]} : vector<8x384xf32> to vector<8x128xf32>
    %48 = vector.extract_strided_slice %18 {offsets = [0, 128], sizes = [8, 128], strides = [1, 1]} : vector<8x384xf32> to vector<8x128xf32>
    %49 = arith.addf %47, %48 : vector<8x128xf32>
    %50 = arith.negf %49 : vector<8x128xf32>
    %51 = math.exp %50 : vector<8x128xf32>
    %cst_33 = arith.constant 1.000000e+00 : f32
    %52 = vector.broadcast %cst_33 : f32 to vector<8x128xf32>
    %53 = arith.addf %52, %51 : vector<8x128xf32>
    %54 = arith.divf %52, %53 : vector<8x128xf32>
    %55 = vector.extract_strided_slice %38 {offsets = [0, 256], sizes = [8, 128], strides = [1, 1]} : vector<8x384xf32> to vector<8x128xf32>
    %56 = vector.extract_strided_slice %18 {offsets = [0, 256], sizes = [8, 128], strides = [1, 1]} : vector<8x384xf32> to vector<8x128xf32>
    %57 = arith.mulf %46, %56 : vector<8x128xf32>
    %58 = arith.addf %55, %57 : vector<8x128xf32>
    %59 = math.tanh %58 : vector<8x128xf32>
    %cst_34 = arith.constant 1.000000e+00 : f32
    %60 = vector.broadcast %cst_34 : f32 to vector<8x128xf32>
    %61 = arith.subf %60, %54 : vector<8x128xf32>
    %62 = arith.mulf %61, %59 : vector<8x128xf32>
    %63 = arith.mulf %54, %12 : vector<8x128xf32>
    %64 = arith.addf %62, %63 : vector<8x128xf32>
    %65 = arith.truncf %64 : vector<8x128xf32> to vector<8x128xbf16>
    %cst_35 = arith.constant dense<0.000000e+00> : vector<8x512xf32>
    %66 = tpu.matmul %65, %5, %cst_35 {dimension_numbers = #tpu.dot_dimension_numbers<[1], [0], [0], [1], [0, 0, 1, 1], [], []>} : vector<8x128xbf16>, vector<128x512xbf16>, vector<8x512xf32> -> vector<8x512xf32>
    %67 = vector.extract_strided_slice %66 {offsets = [0, 0], sizes = [8, 128], strides = [1, 1]} : vector<8x512xf32> to vector<8x128xf32>
    %68 = vector.extract_strided_slice %66 {offsets = [0, 128], sizes = [8, 384], strides = [1, 1]} : vector<8x512xf32> to vector<8x384xf32>
    %69 = vector.broadcast %6 : vector<1x384xf32> to vector<8x384xf32>
    %70 = arith.addf %68, %69 : vector<8x384xf32>
    %71 = arith.truncf %67 : vector<8x128xf32> to vector<8x128xbf16>
    %cst_36 = arith.constant dense<0.000000e+00> : vector<8x128xf32>
    %72 = tpu.matmul %71, %0, %cst_36 {dimension_numbers = #tpu.dot_dimension_numbers<[1], [0], [0], [1], [0, 0, 1, 1], [], []>} : vector<8x128xbf16>, vector<128x128xbf16>, vector<8x128xf32> -> vector<8x128xf32>
    %73 = arith.addf %72, %3 : vector<8x128xf32>
    %cst_37 = arith.constant dense<0xFF800000> : vector<8xf32>
    %74 = vector.multi_reduction <maximumf>, %73, %cst_37 [1] : vector<8x128xf32> to vector<8xf32>
    %75 = vector.shape_cast %74 : vector<8xf32> to vector<8x1xf32>
    %76 = vector.broadcast %75 : vector<8x1xf32> to vector<8x128xf32>
    %77 = arith.subf %73, %76 : vector<8x128xf32>
    %78 = math.exp %77 : vector<8x128xf32>
    %cst_38 = arith.constant dense<0.000000e+00> : vector<8xf32>
    %79 = vector.multi_reduction <add>, %78, %cst_38 [1] : vector<8x128xf32> to vector<8xf32>
    %80 = vector.shape_cast %79 : vector<8xf32> to vector<8x1xf32>
    %81 = tpu.reciprocal %80 {approx = true} : vector<8x1xf32> -> vector<8x1xf32>
    %82 = vector.broadcast %81 : vector<8x1xf32> to vector<8x128xf32>
    %83 = arith.mulf %78, %82 : vector<8x128xf32>
    %84 = arith.truncf %83 : vector<8x128xf32> to vector<8x128xbf16>
    %cst_39 = arith.constant dense<0.000000e+00> : vector<8x128xf32>
    %85 = tpu.matmul %84, %1, %cst_39 {dimension_numbers = #tpu.dot_dimension_numbers<[1], [0], [0], [1], [0, 0, 1, 1], [], []>} : vector<8x128xbf16>, vector<128x128xbf16>, vector<8x128xf32> -> vector<8x128xf32>
    %c1 = arith.constant 1 : index
    %c0_40 = arith.constant 0 : index
    %c0_41 = arith.constant 0 : index
    %86 = vector.load %arg0[%c1, %c0_40, %c0_41] : memref<5x8x384xf32, #tpu.memory_space<vmem>>, vector<1x8x384xf32>
    %87 = vector.shape_cast %86 : vector<1x8x384xf32> to vector<8x384xf32>
    %88 = arith.truncf %85 : vector<8x128xf32> to vector<8x128xbf16>
    %cst_42 = arith.constant dense<0.000000e+00> : vector<8x384xf32>
    %89 = tpu.matmul %88, %7, %cst_42 {dimension_numbers = #tpu.dot_dimension_numbers<[1], [0], [0], [1], [0, 0, 1, 1], [], []>} : vector<8x128xbf16>, vector<128x384xbf16>, vector<8x384xf32> -> vector<8x384xf32>
    %90 = arith.addf %87, %89 : vector<8x384xf32>
    %91 = vector.extract_strided_slice %90 {offsets = [0, 0], sizes = [8, 128], strides = [1, 1]} : vector<8x384xf32> to vector<8x128xf32>
    %92 = vector.extract_strided_slice %70 {offsets = [0, 0], sizes = [8, 128], strides = [1, 1]} : vector<8x384xf32> to vector<8x128xf32>
    %93 = arith.addf %91, %92 : vector<8x128xf32>
    %94 = arith.negf %93 : vector<8x128xf32>
    %95 = math.exp %94 : vector<8x128xf32>
    %cst_43 = arith.constant 1.000000e+00 : f32
    %96 = vector.broadcast %cst_43 : f32 to vector<8x128xf32>
    %97 = arith.addf %96, %95 : vector<8x128xf32>
    %98 = arith.divf %96, %97 : vector<8x128xf32>
    %99 = vector.extract_strided_slice %90 {offsets = [0, 128], sizes = [8, 128], strides = [1, 1]} : vector<8x384xf32> to vector<8x128xf32>
    %100 = vector.extract_strided_slice %70 {offsets = [0, 128], sizes = [8, 128], strides = [1, 1]} : vector<8x384xf32> to vector<8x128xf32>
    %101 = arith.addf %99, %100 : vector<8x128xf32>
    %102 = arith.negf %101 : vector<8x128xf32>
    %103 = math.exp %102 : vector<8x128xf32>
    %cst_44 = arith.constant 1.000000e+00 : f32
    %104 = vector.broadcast %cst_44 : f32 to vector<8x128xf32>
    %105 = arith.addf %104, %103 : vector<8x128xf32>
    %106 = arith.divf %104, %105 : vector<8x128xf32>
    %107 = vector.extract_strided_slice %90 {offsets = [0, 256], sizes = [8, 128], strides = [1, 1]} : vector<8x384xf32> to vector<8x128xf32>
    %108 = vector.extract_strided_slice %70 {offsets = [0, 256], sizes = [8, 128], strides = [1, 1]} : vector<8x384xf32> to vector<8x128xf32>
    %109 = arith.mulf %98, %108 : vector<8x128xf32>
    %110 = arith.addf %107, %109 : vector<8x128xf32>
    %111 = math.tanh %110 : vector<8x128xf32>
    %cst_45 = arith.constant 1.000000e+00 : f32
    %112 = vector.broadcast %cst_45 : f32 to vector<8x128xf32>
    %113 = arith.subf %112, %106 : vector<8x128xf32>
    %114 = arith.mulf %113, %111 : vector<8x128xf32>
    %115 = arith.mulf %106, %64 : vector<8x128xf32>
    %116 = arith.addf %114, %115 : vector<8x128xf32>
    %117 = arith.truncf %116 : vector<8x128xf32> to vector<8x128xbf16>
    %cst_46 = arith.constant dense<0.000000e+00> : vector<8x512xf32>
    %118 = tpu.matmul %117, %5, %cst_46 {dimension_numbers = #tpu.dot_dimension_numbers<[1], [0], [0], [1], [0, 0, 1, 1], [], []>} : vector<8x128xbf16>, vector<128x512xbf16>, vector<8x512xf32> -> vector<8x512xf32>
    %119 = vector.extract_strided_slice %118 {offsets = [0, 0], sizes = [8, 128], strides = [1, 1]} : vector<8x512xf32> to vector<8x128xf32>
    %120 = vector.extract_strided_slice %118 {offsets = [0, 128], sizes = [8, 384], strides = [1, 1]} : vector<8x512xf32> to vector<8x384xf32>
    %121 = vector.broadcast %6 : vector<1x384xf32> to vector<8x384xf32>
    %122 = arith.addf %120, %121 : vector<8x384xf32>
    %123 = arith.truncf %119 : vector<8x128xf32> to vector<8x128xbf16>
    %cst_47 = arith.constant dense<0.000000e+00> : vector<8x128xf32>
    %124 = tpu.matmul %123, %0, %cst_47 {dimension_numbers = #tpu.dot_dimension_numbers<[1], [0], [0], [1], [0, 0, 1, 1], [], []>} : vector<8x128xbf16>, vector<128x128xbf16>, vector<8x128xf32> -> vector<8x128xf32>
    %125 = arith.addf %124, %3 : vector<8x128xf32>
    %cst_48 = arith.constant dense<0xFF800000> : vector<8xf32>
    %126 = vector.multi_reduction <maximumf>, %125, %cst_48 [1] : vector<8x128xf32> to vector<8xf32>
    %127 = vector.shape_cast %126 : vector<8xf32> to vector<8x1xf32>
    %128 = vector.broadcast %127 : vector<8x1xf32> to vector<8x128xf32>
    %129 = arith.subf %125, %128 : vector<8x128xf32>
    %130 = math.exp %129 : vector<8x128xf32>
    %cst_49 = arith.constant dense<0.000000e+00> : vector<8xf32>
    %131 = vector.multi_reduction <add>, %130, %cst_49 [1] : vector<8x128xf32> to vector<8xf32>
    %132 = vector.shape_cast %131 : vector<8xf32> to vector<8x1xf32>
    %133 = tpu.reciprocal %132 {approx = true} : vector<8x1xf32> -> vector<8x1xf32>
    %134 = vector.broadcast %133 : vector<8x1xf32> to vector<8x128xf32>
    %135 = arith.mulf %130, %134 : vector<8x128xf32>
    %136 = arith.truncf %135 : vector<8x128xf32> to vector<8x128xbf16>
    %cst_50 = arith.constant dense<0.000000e+00> : vector<8x128xf32>
    %137 = tpu.matmul %136, %1, %cst_50 {dimension_numbers = #tpu.dot_dimension_numbers<[1], [0], [0], [1], [0, 0, 1, 1], [], []>} : vector<8x128xbf16>, vector<128x128xbf16>, vector<8x128xf32> -> vector<8x128xf32>
    %c2 = arith.constant 2 : index
    %c0_51 = arith.constant 0 : index
    %c0_52 = arith.constant 0 : index
    %138 = vector.load %arg0[%c2, %c0_51, %c0_52] : memref<5x8x384xf32, #tpu.memory_space<vmem>>, vector<1x8x384xf32>
    %139 = vector.shape_cast %138 : vector<1x8x384xf32> to vector<8x384xf32>
    %140 = arith.truncf %137 : vector<8x128xf32> to vector<8x128xbf16>
    %cst_53 = arith.constant dense<0.000000e+00> : vector<8x384xf32>
    %141 = tpu.matmul %140, %7, %cst_53 {dimension_numbers = #tpu.dot_dimension_numbers<[1], [0], [0], [1], [0, 0, 1, 1], [], []>} : vector<8x128xbf16>, vector<128x384xbf16>, vector<8x384xf32> -> vector<8x384xf32>
    %142 = arith.addf %139, %141 : vector<8x384xf32>
    %143 = vector.extract_strided_slice %142 {offsets = [0, 0], sizes = [8, 128], strides = [1, 1]} : vector<8x384xf32> to vector<8x128xf32>
    %144 = vector.extract_strided_slice %122 {offsets = [0, 0], sizes = [8, 128], strides = [1, 1]} : vector<8x384xf32> to vector<8x128xf32>
    %145 = arith.addf %143, %144 : vector<8x128xf32>
    %146 = arith.negf %145 : vector<8x128xf32>
    %147 = math.exp %146 : vector<8x128xf32>
    %cst_54 = arith.constant 1.000000e+00 : f32
    %148 = vector.broadcast %cst_54 : f32 to vector<8x128xf32>
    %149 = arith.addf %148, %147 : vector<8x128xf32>
    %150 = arith.divf %148, %149 : vector<8x128xf32>
    %151 = vector.extract_strided_slice %142 {offsets = [0, 128], sizes = [8, 128], strides = [1, 1]} : vector<8x384xf32> to vector<8x128xf32>
    %152 = vector.extract_strided_slice %122 {offsets = [0, 128], sizes = [8, 128], strides = [1, 1]} : vector<8x384xf32> to vector<8x128xf32>
    %153 = arith.addf %151, %152 : vector<8x128xf32>
    %154 = arith.negf %153 : vector<8x128xf32>
    %155 = math.exp %154 : vector<8x128xf32>
    %cst_55 = arith.constant 1.000000e+00 : f32
    %156 = vector.broadcast %cst_55 : f32 to vector<8x128xf32>
    %157 = arith.addf %156, %155 : vector<8x128xf32>
    %158 = arith.divf %156, %157 : vector<8x128xf32>
    %159 = vector.extract_strided_slice %142 {offsets = [0, 256], sizes = [8, 128], strides = [1, 1]} : vector<8x384xf32> to vector<8x128xf32>
    %160 = vector.extract_strided_slice %122 {offsets = [0, 256], sizes = [8, 128], strides = [1, 1]} : vector<8x384xf32> to vector<8x128xf32>
    %161 = arith.mulf %150, %160 : vector<8x128xf32>
    %162 = arith.addf %159, %161 : vector<8x128xf32>
    %163 = math.tanh %162 : vector<8x128xf32>
    %cst_56 = arith.constant 1.000000e+00 : f32
    %164 = vector.broadcast %cst_56 : f32 to vector<8x128xf32>
    %165 = arith.subf %164, %158 : vector<8x128xf32>
    %166 = arith.mulf %165, %163 : vector<8x128xf32>
    %167 = arith.mulf %158, %116 : vector<8x128xf32>
    %168 = arith.addf %166, %167 : vector<8x128xf32>
    %169 = arith.truncf %168 : vector<8x128xf32> to vector<8x128xbf16>
    %cst_57 = arith.constant dense<0.000000e+00> : vector<8x512xf32>
    %170 = tpu.matmul %169, %5, %cst_57 {dimension_numbers = #tpu.dot_dimension_numbers<[1], [0], [0], [1], [0, 0, 1, 1], [], []>} : vector<8x128xbf16>, vector<128x512xbf16>, vector<8x512xf32> -> vector<8x512xf32>
    %171 = vector.extract_strided_slice %170 {offsets = [0, 0], sizes = [8, 128], strides = [1, 1]} : vector<8x512xf32> to vector<8x128xf32>
    %172 = vector.extract_strided_slice %170 {offsets = [0, 128], sizes = [8, 384], strides = [1, 1]} : vector<8x512xf32> to vector<8x384xf32>
    %173 = vector.broadcast %6 : vector<1x384xf32> to vector<8x384xf32>
    %174 = arith.addf %172, %173 : vector<8x384xf32>
    %175 = arith.truncf %171 : vector<8x128xf32> to vector<8x128xbf16>
    %cst_58 = arith.constant dense<0.000000e+00> : vector<8x128xf32>
    %176 = tpu.matmul %175, %0, %cst_58 {dimension_numbers = #tpu.dot_dimension_numbers<[1], [0], [0], [1], [0, 0, 1, 1], [], []>} : vector<8x128xbf16>, vector<128x128xbf16>, vector<8x128xf32> -> vector<8x128xf32>
    %177 = arith.addf %176, %3 : vector<8x128xf32>
    %cst_59 = arith.constant dense<0xFF800000> : vector<8xf32>
    %178 = vector.multi_reduction <maximumf>, %177, %cst_59 [1] : vector<8x128xf32> to vector<8xf32>
    %179 = vector.shape_cast %178 : vector<8xf32> to vector<8x1xf32>
    %180 = vector.broadcast %179 : vector<8x1xf32> to vector<8x128xf32>
    %181 = arith.subf %177, %180 : vector<8x128xf32>
    %182 = math.exp %181 : vector<8x128xf32>
    %cst_60 = arith.constant dense<0.000000e+00> : vector<8xf32>
    %183 = vector.multi_reduction <add>, %182, %cst_60 [1] : vector<8x128xf32> to vector<8xf32>
    %184 = vector.shape_cast %183 : vector<8xf32> to vector<8x1xf32>
    %185 = tpu.reciprocal %184 {approx = true} : vector<8x1xf32> -> vector<8x1xf32>
    %186 = vector.broadcast %185 : vector<8x1xf32> to vector<8x128xf32>
    %187 = arith.mulf %182, %186 : vector<8x128xf32>
    %188 = arith.truncf %187 : vector<8x128xf32> to vector<8x128xbf16>
    %cst_61 = arith.constant dense<0.000000e+00> : vector<8x128xf32>
    %189 = tpu.matmul %188, %1, %cst_61 {dimension_numbers = #tpu.dot_dimension_numbers<[1], [0], [0], [1], [0, 0, 1, 1], [], []>} : vector<8x128xbf16>, vector<128x128xbf16>, vector<8x128xf32> -> vector<8x128xf32>
    %c3 = arith.constant 3 : index
    %c0_62 = arith.constant 0 : index
    %c0_63 = arith.constant 0 : index
    %190 = vector.load %arg0[%c3, %c0_62, %c0_63] : memref<5x8x384xf32, #tpu.memory_space<vmem>>, vector<1x8x384xf32>
    %191 = vector.shape_cast %190 : vector<1x8x384xf32> to vector<8x384xf32>
    %192 = arith.truncf %189 : vector<8x128xf32> to vector<8x128xbf16>
    %cst_64 = arith.constant dense<0.000000e+00> : vector<8x384xf32>
    %193 = tpu.matmul %192, %7, %cst_64 {dimension_numbers = #tpu.dot_dimension_numbers<[1], [0], [0], [1], [0, 0, 1, 1], [], []>} : vector<8x128xbf16>, vector<128x384xbf16>, vector<8x384xf32> -> vector<8x384xf32>
    %194 = arith.addf %191, %193 : vector<8x384xf32>
    %195 = vector.extract_strided_slice %194 {offsets = [0, 0], sizes = [8, 128], strides = [1, 1]} : vector<8x384xf32> to vector<8x128xf32>
    %196 = vector.extract_strided_slice %174 {offsets = [0, 0], sizes = [8, 128], strides = [1, 1]} : vector<8x384xf32> to vector<8x128xf32>
    %197 = arith.addf %195, %196 : vector<8x128xf32>
    %198 = arith.negf %197 : vector<8x128xf32>
    %199 = math.exp %198 : vector<8x128xf32>
    %cst_65 = arith.constant 1.000000e+00 : f32
    %200 = vector.broadcast %cst_65 : f32 to vector<8x128xf32>
    %201 = arith.addf %200, %199 : vector<8x128xf32>
    %202 = arith.divf %200, %201 : vector<8x128xf32>
    %203 = vector.extract_strided_slice %194 {offsets = [0, 128], sizes = [8, 128], strides = [1, 1]} : vector<8x384xf32> to vector<8x128xf32>
    %204 = vector.extract_strided_slice %174 {offsets = [0, 128], sizes = [8, 128], strides = [1, 1]} : vector<8x384xf32> to vector<8x128xf32>
    %205 = arith.addf %203, %204 : vector<8x128xf32>
    %206 = arith.negf %205 : vector<8x128xf32>
    %207 = math.exp %206 : vector<8x128xf32>
    %cst_66 = arith.constant 1.000000e+00 : f32
    %208 = vector.broadcast %cst_66 : f32 to vector<8x128xf32>
    %209 = arith.addf %208, %207 : vector<8x128xf32>
    %210 = arith.divf %208, %209 : vector<8x128xf32>
    %211 = vector.extract_strided_slice %194 {offsets = [0, 256], sizes = [8, 128], strides = [1, 1]} : vector<8x384xf32> to vector<8x128xf32>
    %212 = vector.extract_strided_slice %174 {offsets = [0, 256], sizes = [8, 128], strides = [1, 1]} : vector<8x384xf32> to vector<8x128xf32>
    %213 = arith.mulf %202, %212 : vector<8x128xf32>
    %214 = arith.addf %211, %213 : vector<8x128xf32>
    %215 = math.tanh %214 : vector<8x128xf32>
    %cst_67 = arith.constant 1.000000e+00 : f32
    %216 = vector.broadcast %cst_67 : f32 to vector<8x128xf32>
    %217 = arith.subf %216, %210 : vector<8x128xf32>
    %218 = arith.mulf %217, %215 : vector<8x128xf32>
    %219 = arith.mulf %210, %168 : vector<8x128xf32>
    %220 = arith.addf %218, %219 : vector<8x128xf32>
    %221 = arith.truncf %220 : vector<8x128xf32> to vector<8x128xbf16>
    %cst_68 = arith.constant dense<0.000000e+00> : vector<8x512xf32>
    %222 = tpu.matmul %221, %5, %cst_68 {dimension_numbers = #tpu.dot_dimension_numbers<[1], [0], [0], [1], [0, 0, 1, 1], [], []>} : vector<8x128xbf16>, vector<128x512xbf16>, vector<8x512xf32> -> vector<8x512xf32>
    %223 = vector.extract_strided_slice %222 {offsets = [0, 0], sizes = [8, 128], strides = [1, 1]} : vector<8x512xf32> to vector<8x128xf32>
    %224 = vector.extract_strided_slice %222 {offsets = [0, 128], sizes = [8, 384], strides = [1, 1]} : vector<8x512xf32> to vector<8x384xf32>
    %225 = vector.broadcast %6 : vector<1x384xf32> to vector<8x384xf32>
    %226 = arith.addf %224, %225 : vector<8x384xf32>
    %227 = arith.truncf %223 : vector<8x128xf32> to vector<8x128xbf16>
    %cst_69 = arith.constant dense<0.000000e+00> : vector<8x128xf32>
    %228 = tpu.matmul %227, %0, %cst_69 {dimension_numbers = #tpu.dot_dimension_numbers<[1], [0], [0], [1], [0, 0, 1, 1], [], []>} : vector<8x128xbf16>, vector<128x128xbf16>, vector<8x128xf32> -> vector<8x128xf32>
    %229 = arith.addf %228, %3 : vector<8x128xf32>
    %cst_70 = arith.constant dense<0xFF800000> : vector<8xf32>
    %230 = vector.multi_reduction <maximumf>, %229, %cst_70 [1] : vector<8x128xf32> to vector<8xf32>
    %231 = vector.shape_cast %230 : vector<8xf32> to vector<8x1xf32>
    %232 = vector.broadcast %231 : vector<8x1xf32> to vector<8x128xf32>
    %233 = arith.subf %229, %232 : vector<8x128xf32>
    %234 = math.exp %233 : vector<8x128xf32>
    %cst_71 = arith.constant dense<0.000000e+00> : vector<8xf32>
    %235 = vector.multi_reduction <add>, %234, %cst_71 [1] : vector<8x128xf32> to vector<8xf32>
    %236 = vector.shape_cast %235 : vector<8xf32> to vector<8x1xf32>
    %237 = tpu.reciprocal %236 {approx = true} : vector<8x1xf32> -> vector<8x1xf32>
    %238 = vector.broadcast %237 : vector<8x1xf32> to vector<8x128xf32>
    %239 = arith.mulf %234, %238 : vector<8x128xf32>
    %240 = arith.truncf %239 : vector<8x128xf32> to vector<8x128xbf16>
    %cst_72 = arith.constant dense<0.000000e+00> : vector<8x128xf32>
    %241 = tpu.matmul %240, %1, %cst_72 {dimension_numbers = #tpu.dot_dimension_numbers<[1], [0], [0], [1], [0, 0, 1, 1], [], []>} : vector<8x128xbf16>, vector<128x128xbf16>, vector<8x128xf32> -> vector<8x128xf32>
    %c4 = arith.constant 4 : index
    %c0_73 = arith.constant 0 : index
    %c0_74 = arith.constant 0 : index
    %242 = vector.load %arg0[%c4, %c0_73, %c0_74] : memref<5x8x384xf32, #tpu.memory_space<vmem>>, vector<1x8x384xf32>
    %243 = vector.shape_cast %242 : vector<1x8x384xf32> to vector<8x384xf32>
    %244 = arith.truncf %241 : vector<8x128xf32> to vector<8x128xbf16>
    %cst_75 = arith.constant dense<0.000000e+00> : vector<8x384xf32>
    %245 = tpu.matmul %244, %7, %cst_75 {dimension_numbers = #tpu.dot_dimension_numbers<[1], [0], [0], [1], [0, 0, 1, 1], [], []>} : vector<8x128xbf16>, vector<128x384xbf16>, vector<8x384xf32> -> vector<8x384xf32>
    %246 = arith.addf %243, %245 : vector<8x384xf32>
    %247 = vector.extract_strided_slice %246 {offsets = [0, 0], sizes = [8, 128], strides = [1, 1]} : vector<8x384xf32> to vector<8x128xf32>
    %248 = vector.extract_strided_slice %226 {offsets = [0, 0], sizes = [8, 128], strides = [1, 1]} : vector<8x384xf32> to vector<8x128xf32>
    %249 = arith.addf %247, %248 : vector<8x128xf32>
    %250 = arith.negf %249 : vector<8x128xf32>
    %251 = math.exp %250 : vector<8x128xf32>
    %cst_76 = arith.constant 1.000000e+00 : f32
    %252 = vector.broadcast %cst_76 : f32 to vector<8x128xf32>
    %253 = arith.addf %252, %251 : vector<8x128xf32>
    %254 = arith.divf %252, %253 : vector<8x128xf32>
    %255 = vector.extract_strided_slice %246 {offsets = [0, 128], sizes = [8, 128], strides = [1, 1]} : vector<8x384xf32> to vector<8x128xf32>
    %256 = vector.extract_strided_slice %226 {offsets = [0, 128], sizes = [8, 128], strides = [1, 1]} : vector<8x384xf32> to vector<8x128xf32>
    %257 = arith.addf %255, %256 : vector<8x128xf32>
    %258 = arith.negf %257 : vector<8x128xf32>
    %259 = math.exp %258 : vector<8x128xf32>
    %cst_77 = arith.constant 1.000000e+00 : f32
    %260 = vector.broadcast %cst_77 : f32 to vector<8x128xf32>
    %261 = arith.addf %260, %259 : vector<8x128xf32>
    %262 = arith.divf %260, %261 : vector<8x128xf32>
    %263 = vector.extract_strided_slice %246 {offsets = [0, 256], sizes = [8, 128], strides = [1, 1]} : vector<8x384xf32> to vector<8x128xf32>
    %264 = vector.extract_strided_slice %226 {offsets = [0, 256], sizes = [8, 128], strides = [1, 1]} : vector<8x384xf32> to vector<8x128xf32>
    %265 = arith.mulf %254, %264 : vector<8x128xf32>
    %266 = arith.addf %263, %265 : vector<8x128xf32>
    %267 = math.tanh %266 : vector<8x128xf32>
    %cst_78 = arith.constant 1.000000e+00 : f32
    %268 = vector.broadcast %cst_78 : f32 to vector<8x128xf32>
    %269 = arith.subf %268, %262 : vector<8x128xf32>
    %270 = arith.mulf %269, %267 : vector<8x128xf32>
    %271 = arith.mulf %262, %220 : vector<8x128xf32>
    %272 = arith.addf %270, %271 : vector<8x128xf32>
    %273 = tpu.concatenate %64, %116, %168, %220, %272 in 0 : vector<8x128xf32>, vector<8x128xf32>, vector<8x128xf32>, vector<8x128xf32>, vector<8x128xf32> -> vector<40x128xf32>
    %274 = arith.truncf %273 : vector<40x128xf32> to vector<40x128xbf16>
    %cst_79 = arith.constant dense<0.000000e+00> : vector<40x128xf32>
    %275 = tpu.matmul %274, %8, %cst_79 {dimension_numbers = #tpu.dot_dimension_numbers<[1], [0], [0], [1], [0, 0, 1, 1], [], []>} : vector<40x128xbf16>, vector<128x128xbf16>, vector<40x128xf32> -> vector<40x128xf32>
    %276 = arith.truncf %275 : vector<40x128xf32> to vector<40x128xbf16>
    %cst_80 = arith.constant dense<0.000000e+00> : vector<40x128xf32>
    %277 = tpu.matmul %276, %0, %cst_80 {dimension_numbers = #tpu.dot_dimension_numbers<[1], [0], [0], [1], [0, 0, 1, 1], [], []>} : vector<40x128xbf16>, vector<128x128xbf16>, vector<40x128xf32> -> vector<40x128xf32>
    %278 = arith.addf %277, %4 : vector<40x128xf32>
    %cst_81 = arith.constant dense<0xFF800000> : vector<40xf32>
    %279 = vector.multi_reduction <maximumf>, %278, %cst_81 [1] : vector<40x128xf32> to vector<40xf32>
    %280 = vector.shape_cast %279 : vector<40xf32> to vector<40x1xf32>
    %281 = vector.broadcast %280 : vector<40x1xf32> to vector<40x128xf32>
    %282 = arith.subf %278, %281 : vector<40x128xf32>
    %283 = math.exp %282 : vector<40x128xf32>
    %cst_82 = arith.constant dense<0.000000e+00> : vector<40xf32>
    %284 = vector.multi_reduction <add>, %283, %cst_82 [1] : vector<40x128xf32> to vector<40xf32>
    %285 = vector.shape_cast %284 : vector<40xf32> to vector<40x1xf32>
    %286 = vector.broadcast %285 : vector<40x1xf32> to vector<40x128xf32>
    %287 = arith.divf %283, %286 : vector<40x128xf32>
    %288 = arith.truncf %287 : vector<40x128xf32> to vector<40x128xbf16>
    %cst_83 = arith.constant dense<0.000000e+00> : vector<40x384xf32>
    %289 = tpu.matmul %288, %2, %cst_83 {dimension_numbers = #tpu.dot_dimension_numbers<[1], [0], [0], [1], [0, 0, 1, 1], [], []>} : vector<40x128xbf16>, vector<128x384xbf16>, vector<40x384xf32> -> vector<40x384xf32>
    %290 = vector.extract_strided_slice %289 {offsets = [0, 0], sizes = [40, 128], strides = [1, 1]} : vector<40x384xf32> to vector<40x128xf32>
    %291 = vector.extract_strided_slice %289 {offsets = [0, 128], sizes = [40, 256], strides = [1, 1]} : vector<40x384xf32> to vector<40x256xf32>
    %292 = arith.truncf %273 : vector<40x128xf32> to vector<40x128xbf16>
    %cst_84 = arith.constant dense<0.000000e+00> : vector<40x256xf32>
    %293 = tpu.matmul %292, %9, %cst_84 {dimension_numbers = #tpu.dot_dimension_numbers<[1], [0], [0], [1], [0, 0, 1, 1], [], []>} : vector<40x128xbf16>, vector<128x256xbf16>, vector<40x256xf32> -> vector<40x256xf32>
    %294 = arith.truncf %290 : vector<40x128xf32> to vector<40x128xbf16>
    %cst_85 = arith.constant dense<0.000000e+00> : vector<40x256xf32>
    %295 = tpu.matmul %294, %10, %cst_85 {dimension_numbers = #tpu.dot_dimension_numbers<[1], [0], [0], [1], [0, 0, 1, 1], [], []>} : vector<40x128xbf16>, vector<128x256xbf16>, vector<40x256xf32> -> vector<40x256xf32>
    %296 = arith.addf %293, %295 : vector<40x256xf32>
    %297 = vector.broadcast %11 : vector<1x256xf32> to vector<40x256xf32>
    %298 = arith.addf %296, %297 : vector<40x256xf32>
    %299 = vector.extract_strided_slice %298 {offsets = [0, 0], sizes = [40, 128], strides = [1, 1]} : vector<40x256xf32> to vector<40x128xf32>
    %cst_86 = arith.constant dense<0xFF800000> : vector<40xf32>
    %300 = vector.multi_reduction <maximumf>, %299, %cst_86 [1] : vector<40x128xf32> to vector<40xf32>
    %301 = vector.shape_cast %300 : vector<40xf32> to vector<40x1xf32>
    %302 = vector.broadcast %301 : vector<40x1xf32> to vector<40x128xf32>
    %303 = arith.subf %299, %302 : vector<40x128xf32>
    %304 = math.exp %303 : vector<40x128xf32>
    %cst_87 = arith.constant dense<0.000000e+00> : vector<40xf32>
    %305 = vector.multi_reduction <add>, %304, %cst_87 [1] : vector<40x128xf32> to vector<40xf32>
    %306 = vector.shape_cast %305 : vector<40xf32> to vector<40x1xf32>
    %307 = vector.broadcast %306 : vector<40x1xf32> to vector<40x128xf32>
    %308 = arith.divf %304, %307 : vector<40x128xf32>
    %309 = vector.extract_strided_slice %298 {offsets = [0, 128], sizes = [40, 1], strides = [1, 1]} : vector<40x256xf32> to vector<40x1xf32>
    %310 = arith.negf %309 : vector<40x1xf32>
    %311 = math.exp %310 : vector<40x1xf32>
    %cst_88 = arith.constant 1.000000e+00 : f32
    %312 = vector.broadcast %cst_88 : f32 to vector<40x1xf32>
    %313 = arith.addf %312, %311 : vector<40x1xf32>
    %314 = arith.divf %312, %313 : vector<40x1xf32>
    %315 = vector.broadcast %314 : vector<40x1xf32> to vector<40x128xf32>
    %316 = arith.mulf %315, %308 : vector<40x128xf32>
    %cst_89 = arith.constant 1.000000e+00 : f32
    %317 = vector.broadcast %cst_89 : f32 to vector<40x1xf32>
    %318 = arith.subf %317, %314 : vector<40x1xf32>
    %319 = vector.extract_strided_slice %291 {offsets = [0, 0], sizes = [40, 128], strides = [1, 1]} : vector<40x256xf32> to vector<40x128xf32>
    %320 = vector.broadcast %318 : vector<40x1xf32> to vector<40x128xf32>
    %321 = arith.mulf %320, %319 : vector<40x128xf32>
    %322 = arith.addf %316, %321 : vector<40x128xf32>
    %cst_90 = arith.constant 1.000000e+00 : f32
    %323 = vector.broadcast %cst_90 : f32 to vector<40x1xf32>
    %324 = arith.subf %323, %314 : vector<40x1xf32>
    %325 = vector.extract_strided_slice %291 {offsets = [0, 128], sizes = [40, 128], strides = [1, 1]} : vector<40x256xf32> to vector<40x128xf32>
    %326 = vector.broadcast %324 : vector<40x1xf32> to vector<40x128xf32>
    %327 = arith.mulf %326, %325 : vector<40x128xf32>
    %328 = tpu.concatenate %322, %327 in 1 : vector<40x128xf32>, vector<40x128xf32> -> vector<40x256xf32>
    %c0_91 = arith.constant 0 : index
    %c0_92 = arith.constant 0 : index
    %329 = vector.load %arg13[%c0_91, %c0_92] : memref<40x256xf32, #tpu.memory_space<vmem>>, vector<40x256xf32>
    tpu.vector_store %arg13[%c0_91, %c0_92], %328 {strides = array<i32>} : memref<40x256xf32, #tpu.memory_space<vmem>>, vector<40x256xf32>,
    return
  }
}

</mosaic_0001>

<bundles_post_ra>
// kernel: seq2seq_forward.1
= control target key start
LH: loop header
LB: loop body
LE: loop exit
PB: predicated region body
PF: predicated region fallthrough
CT: control target
= control target key end

     0   :  { %v5181_v3 = vmov 0   ;;  %s5167_s6 = inlined_call_operand.vmem [shape: bf16[128,512], index: 6, kind: input, shape index: {}]   ;;  %s5168_s1 = inlined_call_operand.vmem [shape: bf16[128,128], index: 1, kind: input, shape index: {}]   ;;  %s5169_s4 = inlined_call_operand.vmem [shape: f32[8,128], index: 4, kind: input, shape index: {}]   ;;  %s5170_s2 = inlined_call_operand.vmem [shape: bf16[128,128], index: 2, kind: input, shape index: {}]   ;;  %s5171_s8 = inlined_call_operand.vmem [shape: bf16[128,384], index: 8, kind: input, shape index: {}]   ;;  %s5172_s7 = inlined_call_operand.vmem [shape: f32[1,384], index: 7, kind: input, shape index: {}]   ;;  %s5173_s0 = inlined_call_operand.vmem [shape: f32[5,8,384], index: 0, kind: input, shape index: {}]   ;;  %s5174_s9 = inlined_call_operand.vmem [shape: bf16[128,128], index: 9, kind: input, shape index: {}]   ;;  %s5175_s5 = inlined_call_operand.vmem [shape: f32[40,128], index: 5, kind: input, shape index: {}]   ;;  %s5176_s3 = inlined_call_operand.vmem [shape: bf16[128,384], index: 3, kind: input, shape index: {}]   ;;  %s5177_s11 = inlined_call_operand.vmem [shape: bf16[128,256], index: 11, kind: input, shape index: {}]   ;;  %s5178_s10 = inlined_call_operand.vmem [shape: bf16[128,256], index: 10, kind: input, shape index: {}]   ;;  %s5179_s12 = inlined_call_operand.vmem [shape: f32[1,256], index: 12, kind: input, shape index: {}]   ;;  %s5180_s13 = inlined_call_operand.vmem [shape: f32[40,256], index: 13, kind: output, shape index: {}]  }
   0x1   :  { %v2641_v0 = vld [vmem:[%s5167_s6 + $0xe0] sm:$0xf]  ;;  %v3168_v1 = vld [vmem:[%s5167_s6 + $0xec] sm:$0xf0]  ;;  %3236 = vset.pattern.permute.xlu1 %v5181_v3  ;;  %3237 = vset.pattern.permute.xlu2 %v5181_v3  ;;  %v3533_v25 = vld [vmem:[%s5168_s1 + $0x38] sm:$0xff] }
   0x2   :  { %v2625_v2 = vld [vmem:[%s5167_s6 + $0xc0] sm:$0xf]  ;;  %v3467_v4 = vor.u32 %v3168_v1, %v2641_v0  ;;  %v3164_v5 = vld [vmem:[%s5167_s6 + $0xcc] sm:$0xf0]  ;;  %3235 = vset.pattern.permute.xlu0 %v5181_v3  ;;  %5281 = vst [vmem:[#allocation6_spill] sm:$0xff] %v3533_v25  ;;  %v3547_v27 = vld [vmem:[%s5168_s1 + $0x28] sm:$0xff] }
   0x3   :  { %v3474_v6 = vor.u32 %v3164_v5, %v2625_v2  ;;  %v2609_v7 = vld [vmem:[%s5167_s6 + $0xa0] sm:$0xf]  ;;  %v3160_v8 = vld [vmem:[%s5167_s6 + $0xac] sm:$0xf0]  ;;  %5283 = vst [vmem:[#allocation8_spill] sm:$0xff] %v3547_v27  ;;  %v3559_v29 = vld [vmem:[%s5168_s1 + $0x18] sm:$0xff] }
   0x4   :  { %389 = vmatpush.bf16.msra.mxu0 %v3467_v4  ;;  %v3483_v9 = vor.u32 %v3160_v8, %v2609_v7  ;;  %v2593_v10 = vld [vmem:[%s5167_s6 + $0x80] sm:$0xf]  ;;  %v3156_v11 = vld [vmem:[%s5167_s6 + $0x8c] sm:$0xf0]  ;;  %5285 = vst [vmem:[#allocation10_spill] sm:$0xff] %v3559_v29  ;;  %v3571_v31 = vld [vmem:[%s5168_s1 + $0x8] sm:$0xff] }
   0x5   :  { %v3492_v12 = vor.u32 %v3156_v11, %v2593_v10  ;;  %v2577_v13 = vld [vmem:[%s5167_s6 + $0x60] sm:$0xf]  ;;  %v3152_v14 = vld [vmem:[%s5167_s6 + $0x6c] sm:$0xf0]  ;;  %5287 = vst [vmem:[#allocation12_spill] sm:$0xff] %v3571_v31  ;;  %v3589_v40 = vld [vmem:[%s5170_s2 + $0x38] sm:$0xff] }
   0x6   :  { %v3501_v15 = vor.u32 %v3152_v14, %v2577_v13  ;;  %v2561_v16 = vld [vmem:[%s5167_s6 + $0x40] sm:$0xf]  ;;  %v3148_v17 = vld [vmem:[%s5167_s6 + $0x4c] sm:$0xf0]  ;;  %571 = vmatpush.bf16.msra.mxu1 %v3589_v40  ;;  %v3601_v42 = vld [vmem:[%s5170_s2 + $0x28] sm:$0xff] }
   0x7   :  { %v3510_v18 = vor.u32 %v3148_v17, %v2561_v16  ;;  %v2545_v19 = vld [vmem:[%s5167_s6 + $0x20] sm:$0xf]  ;;  %v3144_v20 = vld [vmem:[%s5167_s6 + $0x2c] sm:$0xf0]  ;;  %5290 = vst [vmem:[#allocation15_spill] sm:$0xff] %v3601_v42  ;;  %v3613_v44 = vld [vmem:[%s5170_s2 + $0x18] sm:$0xff] }
   0x8   :  { %390 = vmatpush.bf16.msra.mxu0 %v3474_v6  ;;  %5277 = vst [vmem:[#allocation2_spill] sm:$0xff] %v3501_v15  ;;  %v3519_v21 = vor.u32 %v3144_v20, %v2545_v19  ;;  %v2529_v22 = vld [vmem:[%s5167_s6] sm:$0xf]  ;;  %v3140_v23 = vld [vmem:[%s5167_s6 + $0xc] sm:$0xf0]  ;;  %v3628_v50 = vld [vmem:[%s5170_s2 + $0x8] sm:$0xff] }
   0x9   :  { %5278 = vst [vmem:[#allocation3_spill] sm:$0xff] %v3510_v18  ;;  %v3528_v24 = vor.u32 %v3140_v23, %v2529_v22  ;;  %v3540_v26 = vld [vmem:[%s5168_s1 + $0x30] sm:$0xff]  ;;  %v3553_v28 = vld [vmem:[%s5168_s1 + $0x20] sm:$0xff]  ;;  %v3167_v60 = vld [vmem:[%s5167_s6 + $0xec] sm:$0xf] }
   0xa   :  { %5279 = vst [vmem:[#allocation4_spill] sm:$0xff] %v3519_v21  ;;  %v3565_v30 = vld [vmem:[%s5168_s1 + $0x10] sm:$0xff]  ;;  %v3577_v32 = vld [vmem:[%s5168_s1] sm:$0xff]  ;;  %v2651_v61 = vld [vmem:[%s5167_s6 + $0xf8] sm:$0xf0] }
   0xb   :  { %5280 = vst [vmem:[#allocation5_spill] sm:$0xff] %v3528_v24  ;;  %v3583_v36 = vld [vmem:[%s5169_s4] sm:$0xff]  ;;  %v3595_v41 = vld [vmem:[%s5170_s2 + $0x30] sm:$0xff]  ;;  %v3672_v63 = vor.u32 %v3167_v60, %v2651_v61  ;;  %v3163_v0 = vld [vmem:[%s5167_s6 + $0xcc] sm:$0xf] }
   0xc   :  { %391 = vmatpush.bf16.msra.mxu0 %v3483_v9  ;;  %5282 = vst [vmem:[#allocation7_spill] sm:$0xff] %v3540_v26  ;;  %572 = vmatpush.bf16.msra.mxu1 %v3595_v41  ;;  %v3607_v43 = vld [vmem:[%s5170_s2 + $0x20] sm:$0xff]  ;;  %v3622_v49 = vld [vmem:[%s5170_s2 + $0x10] sm:$0xff]  ;;  %v2635_v1 = vld [vmem:[%s5167_s6 + $0xd8] sm:$0xf0] }
   0xd   :  { %5284 = vst [vmem:[#allocation9_spill] sm:$0xff] %v3553_v28  ;;  %v3634_v51 = vld [vmem:[%s5170_s2] sm:$0xff]  ;;  %v2643_v53 = vld [vmem:[%s5167_s6 + $0xf0] sm:$0xf0]  ;;  %428 = vmatpush.bf16.msra.mxu3 %v3672_v63  ;;  %v3687_v7 = vor.u32 %v3163_v0, %v2635_v1  ;;  %v3159_v8 = vld [vmem:[%s5167_s6 + $0xac] sm:$0xf] }
   0xe   :  { %5286 = vst [vmem:[#allocation11_spill] sm:$0xff] %v3565_v30  ;;  %v3166_v52 = vld [vmem:[%s5167_s6 + $0xe4] sm:$0xf]  ;;  %v2627_v56 = vld [vmem:[%s5167_s6 + $0xd0] sm:$0xf0] }
   0xf   :  { %5288 = vst [vmem:[#allocation13_spill] sm:$0xff] %v3577_v32  ;;  %v3162_v54 = vld [vmem:[%s5167_s6 + $0xc4] sm:$0xf]  ;;  %v3647_v55 = vor.u32 %v3166_v52, %v2643_v53  ;;  %v2611_v59 = vld [vmem:[%s5167_s6 + $0xb0] sm:$0xf0] }
  0x10   :  { %392 = vmatpush.bf16.msra.mxu0 %v3492_v12  ;;  %5289 = vst [vmem:[#allocation14_spill] sm:$0xff] %v3583_v36  ;;  %573 = vmatpush.bf16.msra.mxu1 %v3601_v42  ;;  %v3654_v57 = vor.u32 %v3162_v54, %v2627_v56  ;;  %v3158_v58 = vld [vmem:[%s5167_s6 + $0xa4] sm:$0xf]  ;;  %v2595_v5 = vld [vmem:[%s5167_s6 + $0x90] sm:$0xf0] }
  0x11   :  { %5291 = vst [vmem:[#allocation16_spill] sm:$0xff] %v3607_v43  ;;  %402 = vmatpush.bf16.msra.mxu2 %v3647_v55  ;;  %v3670_v62 = vor.u32 %v3158_v58, %v2611_v59  ;;  %v3154_v2 = vld [vmem:[%s5167_s6 + $0x84] sm:$0xf]  ;;  %v2619_v10 = vld [vmem:[%s5167_s6 + $0xb8] sm:$0xf0]  ;;  %429 = vmatpush.bf16.msra.mxu3 %v3687_v7 }
  0x12   :  { %5292 = vst [vmem:[#allocation17_spill] sm:$0xff] %v3613_v44  ;;  %v3697_v11 = vor.u32 %v3154_v2, %v2595_v5  ;;  %v3150_v13 = vld [vmem:[%s5167_s6 + $0x64] sm:$0xf]  ;;  %v2579_v14 = vld [vmem:[%s5167_s6 + $0x70] sm:$0xf0]  ;;  %v3706_v16 = vor.u32 %v3159_v8, %v2619_v10 }
  0x13   :  { %5293 = vst [vmem:[#allocation18_spill] sm:$0xff] %v3622_v49  ;;  %v3155_v17 = vld [vmem:[%s5167_s6 + $0x8c] sm:$0xf]  ;;  %v2603_v19 = vld [vmem:[%s5167_s6 + $0x98] sm:$0xf0]  ;;  %v3716_v20 = vor.u32 %v3150_v13, %v2579_v14 }
  0x14   :  { %393 = vmatpush.bf16.msra.mxu0 %v3501_v15  ;;  %574 = vmatpush.bf16.msra.mxu1 %v3607_v43  ;;  %5294 = vst [vmem:[#allocation19_spill] sm:$0xff] %v3628_v50  ;;  %v3146_v22 = vld [vmem:[%s5167_s6 + $0x44] sm:$0xf]  ;;  %v2563_v23 = vld [vmem:[%s5167_s6 + $0x50] sm:$0xf0] }
  0x15   :  { %5295 = vst [vmem:[#allocation20_spill] sm:$0xff] %v3634_v51  ;;  %403 = vmatpush.bf16.msra.mxu2 %v3654_v57  ;;  %430 = vmatpush.bf16.msra.mxu3 %v3706_v16  ;;  %v2571_v52 = vld [vmem:[%s5167_s6 + $0x58] sm:$0xf0]  ;;  %v3138_v54 = vld [vmem:[%s5167_s6 + $0x4] sm:$0xf] }
  0x16   :  { %v2531_v56 = vld [vmem:[%s5167_s6 + $0x10] sm:$0xf0]  ;;  %v2649_v58 = vld [vmem:[%s5167_s6 + $0xe8] sm:$0xf]  ;;  %v3169_v59 = vld [vmem:[%s5167_s6 + $0xf4] sm:$0xf0] }
  0x17   :  { %v3143_v61 = vld [vmem:[%s5167_s6 + $0x2c] sm:$0xf]  ;;  %v2555_v0 = vld [vmem:[%s5167_s6 + $0x38] sm:$0xf0]  ;;  %v3779_v2 = vor.u32 %v3138_v54, %v2531_v56  ;;  %v3782_v8 = vor.u32 %v3169_v59, %v2649_v58  ;;  %v2633_v10 = vld [vmem:[%s5167_s6 + $0xc8] sm:$0xf] }
  0x18   :  { %394 = vmatpush.bf16.msra.mxu0 %v3510_v18  ;;  %575 = vmatpush.bf16.msra.mxu1 %v3613_v44  ;;  %v3165_v13 = vld [vmem:[%s5167_s6 + $0xd4] sm:$0xf0]  ;;  %v3791_v14 = vor.u32 %v3143_v61, %v2555_v0  ;;  %v3190_v58 = vld [vmem:[%s5171_s8 + $0xa0] sm:$0xf0]  ;;  %v3188_v59 = vld [vmem:[%s5171_s8 + $0x94] sm:$0xf] }
  0x19   :  { %404 = vmatpush.bf16.msra.mxu2 %v3670_v62  ;;  %v2801_v54 = vld [vmem:[%s5171_s8 + $0x98] sm:$0xf]  ;;  %v2795_v61 = vld [vmem:[%s5171_s8 + $0x9c] sm:$0xf0] }
  0x1a   :  { %5297 = vst [vmem:[#allocation22_spill] sm:$0xff] %v3791_v14  ;;  %v3843_v0 = vor.u32 %v3190_v58, %v2801_v54  ;;  %v3184_v58 = vld [vmem:[%s5171_s8 + $0x70] sm:$0xf0] }
  0x1c   :  { %395 = vmatpush.bf16.msra.mxu0 %v3519_v21  ;;  %576 = vmatpush.bf16.msra.mxu1 %v3622_v49 }
  0x1d   :  { %405 = vmatpush.bf16.msra.mxu2 %v3697_v11 }
  0x20   :  { %396 = vmatpush.bf16.msra.mxu0 %v3528_v24  ;;  %577 = vmatpush.bf16.msra.mxu1 %v3628_v50 }
  0x21   :  { %406 = vmatpush.bf16.msra.mxu2 %v3716_v20 }
  0x23   :  { %397 = vmatmul.bf16.vlgmr.msra.gmra.mxu0 %v5181_v3 }
  0x24   :  { %500 = vmatpush.bf16.msrb.mxu0 %v3533_v25  ;;  %578 = vmatpush.bf16.msra.mxu1 %v3634_v51 }
  0x28   :  { %501 = vmatpush.bf16.msrb.mxu0 %v3540_v26  ;;  %806 = vmatpush.bf16.msrb.mxu1 %v3467_v4 }
  0x2c   :  { %502 = vmatpush.bf16.msrb.mxu0 %v3547_v27  ;;  %807 = vmatpush.bf16.msrb.mxu1 %v3474_v6 }
  0x30   :  { %503 = vmatpush.bf16.msrb.mxu0 %v3553_v28  ;;  %808 = vmatpush.bf16.msrb.mxu1 %v3483_v9 }
  0x34   :  { %504 = vmatpush.bf16.msrb.mxu0 %v3559_v29  ;;  %809 = vmatpush.bf16.msrb.mxu1 %v3492_v12 }
  0x38   :  { %505 = vmatpush.bf16.msrb.mxu0 %v3565_v30  ;;  %810 = vmatpush.bf16.msrb.mxu1 %v3501_v15 }
  0x3c   :  { %506 = vmatpush.bf16.msrb.mxu0 %v3571_v31  ;;  %811 = vmatpush.bf16.msrb.mxu1 %v3510_v18  ;;  %v3172_v18 = vld [vmem:[%s5171_s8 + $0x10] sm:$0xf0] }
  0x40   :  { %507 = vmatpush.bf16.msrb.mxu0 %v3577_v32  ;;  %812 = vmatpush.bf16.msrb.mxu1 %v3519_v21  ;;  %v3189_v21 = vld [vmem:[%s5171_s8 + $0x98] sm:$0xf0] }
  0x44   :  { %813 = vmatpush.bf16.msrb.mxu1 %v3528_v24 }
  0xa0   :  { %v398_v33 = vpop.f32.mrf.mxu0 }
  0xa1   :  { %v451_v34 = vpack.c.bf16 %v398_v33, %v398_v33  ;;  %v3725_v33 = vor.u32 %v3155_v17, %v2603_v19  ;;  %v3139_v17 = vld [vmem:[%s5167_s6 + $0xc] sm:$0xf] }
  0xa3   :  { %508 = vmatmul.bf16.vlgmr.msrb.gmra.mxu0 %v451_v34  ;;  %v3151_v34 = vld [vmem:[%s5167_s6 + $0x6c] sm:$0xf]  ;;  %431 = vmatpush.bf16.msra.mxu3 %v3725_v33 }
  0xa8   :  { %v400_v35 = vpop.f32.mrf.mxu0 }
  0xa9   :  { %v2587_v35 = vld [vmem:[%s5167_s6 + $0x78] sm:$0xf0] }
 0x120   :  { %v509_v37 = vpop.f32.mrf.mxu0 }
 0x121   :  { %v510_v38 = vadd.f32 %v509_v37, %v3583_v36  ;;  %v3735_v37 = vor.u32 %v3146_v22, %v2563_v23  ;;  %v2813_v22 = vld [vmem:[%s5171_s8 + $0xb0] sm:$0xf]  ;;  %v3193_v23 = vld [vmem:[%s5171_s8 + $0xb8] sm:$0xf0]  ;;  %v2735_v36 = vld [vmem:[%s5171_s8 + $0x24] sm:$0xf0] }
 0x123   :  { %513 = vmax.xlane.f32.xlu0 %v510_v38  ;;  %407 = vmatpush.bf16.msra.mxu2 %v3735_v37 }
 0x128   :  { %v511_v39 = vpop.f32.mrf.mxu0 }
 0x129   :  { %v3142_v39 = vld [vmem:[%s5167_s6 + $0x24] sm:$0xf] }
 0x196   :  { %v514_v45 = vpop.xlane.xlu0 %513 }
 0x197   :  { %v515_v46 = vsub.f32 %v510_v38, %v514_v45  ;;  %v2547_v45 = vld [vmem:[%s5167_s6 + $0x30] sm:$0xf0] }
 0x198   :  { %v3754_v53 = vor.u32 %v3142_v39, %v2547_v45  ;;  %v3815_v39 = vor.u32 %v3165_v13, %v2633_v10  ;;  %v2617_v45 = vld [vmem:[%s5167_s6 + $0xa8] sm:$0xf]  ;;  %v3157_v10 = vld [vmem:[%s5167_s6 + $0x94] sm:$0xf0]  ;;  %v2789_v13 = vld [vmem:[%s5171_s8 + $0x80] sm:$0xf] }
 0x199   :  { %v516_v47 = vmul.f32 1.442695, %v515_v46  ;;  %v3744_v46 = vor.u32 %v3151_v34, %v2587_v35  ;;  %v3191_v34 = vld [vmem:[%s5171_s8 + $0xac] sm:$0xf]  ;;  %v2807_v35 = vld [vmem:[%s5171_s8 + $0xb4] sm:$0xf0] }
 0x19a   :  { %408 = vmatpush.bf16.msra.mxu2 %v3754_v53  ;;  %v3831_v56 = vor.u32 %v3191_v34, %v2807_v35  ;;  %v2585_v35 = vld [vmem:[%s5167_s6 + $0x68] sm:$0xf] }
 0x19b   :  { %3238 = vpow2.f32 %v516_v47  ;;  %v3147_v47 = vld [vmem:[%s5167_s6 + $0x4c] sm:$0xf]  ;;  %432 = vmatpush.bf16.msra.mxu3 %v3744_v46 }
 0x19c   :  { %v3769_v60 = vor.u32 %v3147_v47, %v2571_v52  ;;  %v3161_v47 = vld [vmem:[%s5167_s6 + $0xb4] sm:$0xf0]  ;;  %5299 = vst [vmem:[#allocation24_spill] sm:$0xff] %v3831_v56 }
 0x19e   :  { %5296 = vst [vmem:[#allocation21_spill] sm:$0xff] %v3769_v60  ;;  %409 = vmatpush.bf16.msra.mxu2 %v3779_v2 }
 0x19f   :  { %433 = vmatpush.bf16.msra.mxu3 %v3769_v60 }
 0x1a1   :  { %v3616_v48 = vpop.eup %3238  ;;  %410 = vmatmul.bf16.vlgmr.msra.gmra.mxu2 %v5181_v3 }
 0x1a2   :  { %518 = vadd.xlane.f32.xlu0 %v3616_v48  ;;  %415 = vmatpush.bf16.msrb.mxu2 %v3782_v8 }
 0x1a3   :  { %434 = vmatpush.bf16.msra.mxu3 %v3791_v14 }
 0x1a6   :  { %416 = vmatpush.bf16.msrb.mxu2 %v3815_v39 }
 0x215   :  { %v519_v38 = vpop.xlane.xlu0 %518 }
 0x216   :  { %3240 = vrcp.f32 %v519_v38  ;;  %v3812_v38 = vor.u32 %v3193_v23, %v2813_v22  ;;  %v2783_v22 = vld [vmem:[%s5171_s8 + $0x84] sm:$0xf0] }
 0x218   :  { %742 = vmatpush.bf16.msra.mxu0 %v3812_v38 }
 0x21c   :  { %v3241_v1 = vpop.eup %3240  ;;  %743 = vmatpush.bf16.msra.mxu0 %v3843_v0 }
 0x21d   :  { %v521_v5 = vmul.f32 %v3241_v1, %v3616_v48  ;;  %v2539_v48 = vld [vmem:[%s5167_s6 + $0x18] sm:$0xf0]  ;;  %v3846_v1 = vor.u32 %v3161_v47, %v2617_v45  ;;  %v3153_v45 = vld [vmem:[%s5167_s6 + $0x74] sm:$0xf0]  ;;  %v2777_v47 = vld [vmem:[%s5171_s8 + $0x68] sm:$0xf] }
 0x21e   :  { %v3824_v52 = vor.u32 %v3139_v17, %v2539_v48  ;;  %v3860_v17 = vor.u32 %v3188_v59, %v2795_v61  ;;  %v3185_v48 = vld [vmem:[%s5171_s8 + $0x7c] sm:$0xf]  ;;  %v3182_v59 = vld [vmem:[%s5171_s8 + $0x64] sm:$0xf]  ;;  %v2771_v61 = vld [vmem:[%s5171_s8 + $0x6c] sm:$0xf0] }
 0x21f   :  { %v522_v19 = vpack.c.bf16 %v521_v5, %v521_v5  ;;  %v2601_v5 = vld [vmem:[%s5167_s6 + $0x88] sm:$0xf]  ;;  %417 = vmatpush.bf16.msrb.mxu2 %v3846_v1  ;;  %v3889_v54 = vor.u32 %v3185_v48, %v2783_v22  ;;  %v2765_v48 = vld [vmem:[%s5171_s8 + $0x50] sm:$0xf]  ;;  %v3917_v22 = vor.u32 %v3182_v59, %v2771_v61 }
 0x220   :  { %5298 = vst [vmem:[#allocation23_spill] sm:$0xff] %v3824_v52  ;;  %435 = vmatpush.bf16.msra.mxu3 %v3824_v52  ;;  %v3875_v34 = vor.u32 %v3157_v10, %v2601_v5  ;;  %v3901_v5 = vor.u32 %v3184_v58, %v2777_v47  ;;  %v3904_v10 = vor.u32 %v3153_v45, %v2585_v35  ;;  %v3181_v35 = vld [vmem:[%s5171_s8 + $0x58] sm:$0xf0]  ;;  %v3179_v45 = vld [vmem:[%s5171_s8 + $0x4c] sm:$0xf] }
 0x221   :  { %579 = vmatmul.bf16.vlgmr.msra.gmra.mxu1 %v522_v19  ;;  %5300 = vst [vmem:[#allocation25_spill] sm:$0xff] %v3860_v17  ;;  %v3187_v19 = vld [vmem:[%s5171_s8 + $0x88] sm:$0xf0]  ;;  %v2759_v47 = vld [vmem:[%s5171_s8 + $0x54] sm:$0xf0]  ;;  %v3929_v58 = vor.u32 %v3181_v35, %v2765_v48 }
 0x222   :  { %862 = vmatpush.bf16.msra.mxu1 %v3533_v25  ;;  %v3872_v23 = vor.u32 %v3187_v19, %v2789_v13  ;;  %5301 = vst [vmem:[#allocation26_spill] sm:$0xff] %v3889_v54  ;;  %v2569_v13 = vld [vmem:[%s5167_s6 + $0x48] sm:$0xf]  ;;  %v3149_v19 = vld [vmem:[%s5167_s6 + $0x54] sm:$0xf0]  ;;  %v3945_v48 = vor.u32 %v3179_v45, %v2759_v47 }
 0x223   :  { %436 = vmatmul.bf16.vlgmr.msra.gmra.mxu3 %v5181_v3  ;;  %418 = vmatpush.bf16.msrb.mxu2 %v3875_v34  ;;  %5302 = vst [vmem:[#allocation27_spill] sm:$0xff] %v3917_v22  ;;  %v3932_v59 = vor.u32 %v3149_v19, %v2569_v13  ;;  %v2553_v61 = vld [vmem:[%s5167_s6 + $0x28] sm:$0xf]  ;;  %v3145_v3 = vld [vmem:[%s5167_s6 + $0x34] sm:$0xf0] }
 0x224   :  { %729 = vmatpush.bf16.msrb.mxu3 %v3831_v56  ;;  %744 = vmatpush.bf16.msra.mxu0 %v3872_v23  ;;  %5303 = vst [vmem:[#allocation28_spill] sm:$0xff] %v3945_v48  ;;  %v3178_v13 = vld [vmem:[%s5171_s8 + $0x40] sm:$0xf0]  ;;  %v3176_v19 = vld [vmem:[%s5171_s8 + $0x34] sm:$0xf]  ;;  %v3960_v45 = vor.u32 %v3145_v3, %v2553_v61 }
 0x225   :  { %v2747_v35 = vld [vmem:[%s5171_s8 + $0x3c] sm:$0xf0]  ;;  %v2537_v47 = vld [vmem:[%s5167_s6 + $0x8] sm:$0xf]  ;;  %v3192_v3 = vld [vmem:[%s5171_s8 + $0xb0] sm:$0xf0] }
 0x226   :  { %863 = vmatpush.bf16.msra.mxu1 %v3540_v26  ;;  %v2741_v26 = vld [vmem:[%s5171_s8 + $0x20] sm:$0xf]  ;;  %v3979_v61 = vor.u32 %v3176_v19, %v2747_v35  ;;  %v3173_v25 = vld [vmem:[%s5171_s8 + $0x1c] sm:$0xf] }
 0x227   :  { %419 = vmatpush.bf16.msrb.mxu2 %v3904_v10 }
 0x228   :  { %730 = vmatpush.bf16.msrb.mxu3 %v3860_v17  ;;  %745 = vmatpush.bf16.msra.mxu0 %v3901_v5  ;;  %5305 = vst [vmem:[#allocation30_spill] sm:$0xff] %v3979_v61 }
 0x22a   :  { %864 = vmatpush.bf16.msra.mxu1 %v3547_v27 }
 0x22b   :  { %420 = vmatpush.bf16.msrb.mxu2 %v3932_v59 }
 0x22c   :  { %731 = vmatpush.bf16.msrb.mxu3 %v3889_v54  ;;  %746 = vmatpush.bf16.msra.mxu0 %v3929_v58 }
 0x22e   :  { %865 = vmatpush.bf16.msra.mxu1 %v3553_v28  ;;  %v2753_v28 = vld [vmem:[%s5171_s8 + $0x38] sm:$0xf] }
 0x22f   :  { %v3957_v27 = vor.u32 %v3178_v13, %v2753_v28  ;;  %v2805_v28 = vld [vmem:[%s5171_s8 + $0xa8] sm:$0xf]  ;;  %v3175_v13 = vld [vmem:[%s5171_s8 + $0x28] sm:$0xf0]  ;;  %421 = vmatpush.bf16.msrb.mxu2 %v3960_v45 }
 0x230   :  { %732 = vmatpush.bf16.msrb.mxu3 %v3917_v22  ;;  %v3991_v24 = vor.u32 %v3175_v13, %v2741_v26  ;;  %v3996_v35 = vor.u32 %v3192_v3, %v2805_v28  ;;  %v4006_v26 = vor.u32 %v3173_v25, %v2735_v36  ;;  %v3186_v28 = vld [vmem:[%s5171_s8 + $0x80] sm:$0xf0]  ;;  %v5310_v25 = vmov 0   ;;  %v2757_v13 = vld [vmem:[%s5171_s8 + $0x48] sm:$0xf] }
 0x231   :  { %5304 = vst [vmem:[#allocation29_spill] sm:$0xff] %v3957_v27  ;;  %747 = vmatpush.bf16.msra.mxu0 %v3957_v27 }
 0x232   :  { %866 = vmatpush.bf16.msra.mxu1 %v3559_v29  ;;  %v3141_v29 = vld [vmem:[%s5167_s6 + $0x14] sm:$0xf0]  ;;  %5306 = vst [vmem:[#allocation31_spill] sm:$0xff] %v3991_v24 }
 0x233   :  { %v3994_v19 = vor.u32 %v3141_v29, %v2537_v47  ;;  %5307 = vst [vmem:[#allocation32_spill] sm:$0xff] %v3996_v35  ;;  %v2781_v47 = vld [vmem:[%s5171_s8 + $0x78] sm:$0xf] }
 0x234   :  { %733 = vmatpush.bf16.msrb.mxu3 %v3945_v48  ;;  %5308 = vst [vmem:[#allocation33_spill] sm:$0xff] %v4006_v26  ;;  %v4023_v36 = vor.u32 %v3186_v28, %v2781_v47  ;;  %v3180_v47 = vld [vmem:[%s5171_s8 + $0x50] sm:$0xf0] }
 0x235   :  { %748 = vmatpush.bf16.msra.mxu0 %v3991_v24  ;;  %422 = vmatpush.bf16.msrb.mxu2 %v3994_v19  ;;  %v4041_v28 = vor.u32 %v3180_v47, %v2757_v13  ;;  %v3174_v13 = vld [vmem:[%s5171_s8 + $0x20] sm:$0xf0] }
 0x236   :  { %867 = vmatpush.bf16.msra.mxu1 %v3565_v30  ;;  %v2793_v30 = vld [vmem:[%s5171_s8 + $0x90] sm:$0xf]  ;;  %5311 = vst [vmem:[#allocation35_spill] sm:$0xff] %v4023_v36 }
 0x237   :  { %v4011_v29 = vor.u32 %v3189_v21, %v2793_v30  ;;  %v2769_v21 = vld [vmem:[%s5171_s8 + $0x60] sm:$0xf]  ;;  %v3183_v30 = vld [vmem:[%s5171_s8 + $0x68] sm:$0xf0]  ;;  %5313 = vst [vmem:[#allocation37_spill] sm:$0xff] %v4041_v28 }
 0x238   :  { %734 = vmatpush.bf16.msrb.mxu3 %v3979_v61  ;;  %423 = vmatmul.bf16.vlgmr.msrb.gmra.mxu2 %v5310_v25  ;;  %v4032_v3 = vor.u32 %v3183_v30, %v2769_v21  ;;  %v2745_v25 = vld [vmem:[%s5171_s8 + $0x30] sm:$0xf]  ;;  %v3177_v21 = vld [vmem:[%s5171_s8 + $0x38] sm:$0xf0] }
 0x239   :  { %716 = vmatpush.bf16.msra.mxu2 %v3996_v35  ;;  %5309 = vst [vmem:[#allocation34_spill] sm:$0xff] %v4011_v29  ;;  %v4050_v30 = vor.u32 %v3177_v21, %v2745_v25  ;;  %v3171_v25 = vld [vmem:[%s5171_s8 + $0x8] sm:$0xf0]  ;;  %v3170_v21 = vld [vmem:[%s5171_s8 + $0x4] sm:$0xf] }
 0x23a   :  { %868 = vmatpush.bf16.msra.mxu1 %v3571_v31  ;;  %5312 = vst [vmem:[#allocation36_spill] sm:$0xff] %v4032_v3  ;;  %v2721_v31 = vld [vmem:[%s5171_s8] sm:$0xf] }
 0x23b   :  { %5314 = vst [vmem:[#allocation38_spill] sm:$0xff] %v4050_v30  ;;  %v4071_v24 = vor.u32 %v3171_v25, %v2721_v31 }
 0x23c   :  { %735 = vmatpush.bf16.msrb.mxu3 %v4006_v26 }
 0x23d   :  { %717 = vmatpush.bf16.msra.mxu2 %v4011_v29  ;;  %5316 = vst [vmem:[#allocation40_spill] sm:$0xff] %v4071_v24 }
 0x23e   :  { %869 = vmatpush.bf16.msra.mxu1 %v3577_v32  ;;  %v2733_v32 = vld [vmem:[%s5171_s8 + $0x18] sm:$0xf] }
 0x23f   :  { %v4059_v47 = vor.u32 %v3174_v13, %v2733_v32  ;;  %v2723_v32 = vld [vmem:[%s5171_s8 + $0xc] sm:$0xf0]  ;;  %v2729_v13 = vld [vmem:[%s5171_s8 + $0x8] sm:$0xf] }
 0x240   :  { %v4082_v27 = vor.u32 %v3170_v21, %v2723_v32  ;;  %v4084_v15 = vor.u32 %v3172_v18, %v2729_v13  ;;  %v411_v21 = vpop.f32.mrf.mxu2 }
 0x241   :  { %718 = vmatpush.bf16.msra.mxu2 %v4023_v36  ;;  %5315 = vst [vmem:[#allocation39_spill] sm:$0xff] %v4059_v47 }
 0x242   :  { %5317 = vst [vmem:[#allocation41_spill] sm:$0xff] %v4082_v27  ;;  %736 = vmatpush.bf16.msrb.mxu3 %v4082_v27  ;;  %749 = vmatpush.bf16.msra.mxu0 %v4084_v15 }
 0x245   :  { %719 = vmatpush.bf16.msra.mxu2 %v4032_v3 }
 0x246   :  { %832 = vmatpush.bf16.msra.mxu3 %v3782_v8  ;;  %845 = vmatpush.bf16.msrb.mxu0 %v3672_v63 }
 0x248   :  { %v413_v13 = vpop.f32.mrf.mxu2 }
 0x249   :  { %720 = vmatpush.bf16.msra.mxu2 %v4041_v28  ;;  %v147_v13 = vld [vmem:[%s5172_s7] sm:$0x7] }
 0x24a   :  { %833 = vmatpush.bf16.msra.mxu3 %v3815_v39  ;;  %846 = vmatpush.bf16.msrb.mxu0 %v3687_v7 }
 0x24d   :  { %721 = vmatpush.bf16.msra.mxu2 %v4050_v30 }
 0x24e   :  { %834 = vmatpush.bf16.msra.mxu3 %v3846_v1  ;;  %847 = vmatpush.bf16.msrb.mxu0 %v3706_v16 }
 0x251   :  { %722 = vmatpush.bf16.msra.mxu2 %v4059_v47 }
 0x252   :  { %835 = vmatpush.bf16.msra.mxu3 %v3875_v34  ;;  %848 = vmatpush.bf16.msrb.mxu0 %v3725_v33 }
 0x255   :  { %723 = vmatpush.bf16.msra.mxu2 %v4071_v24 }
 0x256   :  { %836 = vmatpush.bf16.msra.mxu3 %v3904_v10  ;;  %849 = vmatpush.bf16.msrb.mxu0 %v3744_v46 }
 0x259   :  { %819 = vmatpush.bf16.msrb.mxu2 %v3647_v55 }
 0x25a   :  { %837 = vmatpush.bf16.msra.mxu3 %v3932_v59  ;;  %850 = vmatpush.bf16.msrb.mxu0 %v3769_v60 }
 0x25d   :  { %820 = vmatpush.bf16.msrb.mxu2 %v3654_v57 }
 0x25e   :  { %838 = vmatpush.bf16.msra.mxu3 %v3960_v45  ;;  %851 = vmatpush.bf16.msrb.mxu0 %v3791_v14 }
 0x261   :  { %821 = vmatpush.bf16.msrb.mxu2 %v3670_v62 }
 0x262   :  { %839 = vmatpush.bf16.msra.mxu3 %v3994_v19  ;;  %852 = vmatpush.bf16.msrb.mxu0 %v3824_v52 }
 0x265   :  { %822 = vmatpush.bf16.msrb.mxu2 %v3697_v11 }
 0x269   :  { %823 = vmatpush.bf16.msrb.mxu2 %v3716_v20 }
 0x26d   :  { %824 = vmatpush.bf16.msrb.mxu2 %v3735_v37 }
 0x271   :  { %825 = vmatpush.bf16.msrb.mxu2 %v3754_v53 }
 0x275   :  { %826 = vmatpush.bf16.msrb.mxu2 %v3779_v2 }
 0x29e   :  { %v580_v18 = vpop.f32.mrf.mxu1 }
 0x29f   :  { %v587_v31 = vpack.c.bf16 %v580_v18, %v580_v18 }
 0x2a1   :  { %724 = vmatmul.bf16.vlgmr.msra.gmra.mxu2 %v587_v31  ;;  %737 = vmatmul.bf16.vlgmr.msrb.gmra.mxu3 %v587_v31 }
 0x2a2   :  { %750 = vmatmul.bf16.vlgmr.msra.gmra.mxu0 %v587_v31  ;;  %885 = vmatpush.bf16.msra.mxu2 %v3589_v40 }
 0x2a3   :  { %903 = vmatpush.bf16.msrb.mxu3 %v3996_v35  ;;  %916 = vmatpush.bf16.msra.mxu0 %v3831_v56 }
 0x2a6   :  { %v582_v25 = vpop.f32.mrf.mxu1  ;;  %886 = vmatpush.bf16.msra.mxu2 %v3595_v41  ;;  %v4122_v32 = vpop.f32.mrf.mxu3 }
 0x2a7   :  { %904 = vmatpush.bf16.msrb.mxu3 %v4011_v29  ;;  %917 = vmatpush.bf16.msra.mxu0 %v3860_v17 }
 0x2aa   :  { %887 = vmatpush.bf16.msra.mxu2 %v3601_v42 }
 0x2ab   :  { %905 = vmatpush.bf16.msrb.mxu3 %v4023_v36  ;;  %918 = vmatpush.bf16.msra.mxu0 %v3889_v54 }
 0x2ae   :  { %888 = vmatpush.bf16.msra.mxu2 %v3607_v43  ;;  %v439_v18 = vpop.f32.mrf.mxu3 }
 0x2af   :  { %906 = vmatpush.bf16.msrb.mxu3 %v4032_v3  ;;  %919 = vmatpush.bf16.msra.mxu0 %v3917_v22 }
 0x2b2   :  { %889 = vmatpush.bf16.msra.mxu2 %v3613_v44 }
 0x2b3   :  { %907 = vmatpush.bf16.msrb.mxu3 %v4041_v28  ;;  %920 = vmatpush.bf16.msra.mxu0 %v3945_v48 }
 0x2b6   :  { %890 = vmatpush.bf16.msra.mxu2 %v3622_v49 }
 0x2b7   :  { %908 = vmatpush.bf16.msrb.mxu3 %v4050_v30  ;;  %921 = vmatpush.bf16.msra.mxu0 %v3979_v61  ;;  %v4142_v61 = vperm.slane %v147_v13, 0 }
 0x2b9   :  { %5318 = vst [vmem:[#allocation42_spill] sm:$0xff] %v4142_v61 }
 0x2ba   :  { %891 = vmatpush.bf16.msra.mxu2 %v3628_v50  ;;  %v4144_v50 = vperm.slane %v147_v13, 1 }
 0x2bb   :  { %909 = vmatpush.bf16.msrb.mxu3 %v4059_v47  ;;  %922 = vmatpush.bf16.msra.mxu0 %v4006_v26  ;;  %v424_v31 = vpop.f32.mrf.mxu2  ;;  %v584_v26 = vld [vmem:[%s5173_s0] sm:$0xff] }
 0x2bc   :  { %5319 = vst [vmem:[#allocation43_spill] sm:$0xff] %v4144_v50  ;;  %v449_v47 = vadd.f32 %v4144_v50, %v424_v31 }
 0x2be   :  { %892 = vmatpush.bf16.msra.mxu2 %v3634_v51 }
 0x2bf   :  { %910 = vmatpush.bf16.msrb.mxu3 %v4071_v24  ;;  %923 = vmatpush.bf16.msra.mxu0 %v4082_v27  ;;  %v585_v24 = vld [vmem:[%s5173_s0 + $0x8] sm:$0xff] }
 0x2c3   :  { %v426_v25 = vpop.f32.mrf.mxu2 }
 0x2c4   :  { %v448_v25 = vadd.f32 %v4142_v61, %v411_v21 }
 0x31f   :  { %v751_v18 = vpop.f32.mrf.mxu0 }
 0x324   :  { %v725_v27 = vpop.f32.mrf.mxu2  ;;  %v738_v51 = vpop.f32.mrf.mxu3 }
 0x325   :  { %v755_v30 = vadd.f32 %v725_v27, %v584_v26  ;;  %v756_v49 = vadd.f32 %v738_v51, %v585_v24 }
 0x327   :  { %v758_v48 = vadd.f32 %v755_v30, %v448_v25  ;;  %v778_v28 = vadd.f32 %v756_v49, %v449_v47  ;;  %v753_v44 = vpop.f32.mrf.mxu0 }
 0x328   :  { %v4154_v44 = vperm.slane %v147_v13, 2 }
 0x329   :  { %v2815_v22 = vmul.f32 -1.442695, %v758_v48  ;;  %v2816_v3 = vmul.f32 -1.442695, %v778_v28 }
 0x32b   :  { %3242 = vpow2.f32 %v2815_v22 }
 0x32c   :  { %3244 = vpow2.f32 %v2816_v3  ;;  %v727_v43 = vpop.f32.mrf.mxu2  ;;  %v740_v54 = vpop.f32.mrf.mxu3 }
 0x331   :  { %v3243_v36 = vpop.eup %3242 }
 0x332   :  { %v3245_v42 = vpop.eup %3244  ;;  %v762_v17 = vadd.f32 1.0, %v3243_v36  ;;  %v450_v36 = vadd.f32 %v4154_v44, %v4122_v32 }
 0x333   :  { %v782_v29 = vadd.f32 1.0, %v3245_v42  ;;  %v586_v42 = vld [vmem:[%s5173_s0 + $0x10] sm:$0xff] }
 0x334   :  { %3246 = vrcp.f32 %v762_v17  ;;  %v774_v51 = vand.u32 2147483648, %v762_v17  ;;  %v772_v22 = vand.u32 2147483647, %v762_v17  ;;  %vm768_vm1 = vweird.f32 %v762_v17 }
 0x335   :  { %3248 = vrcp.f32 %v782_v29  ;;  %v757_v47 = vadd.f32 %v751_v18, %v586_v42  ;;  %v794_v25 = vand.u32 2147483648, %v782_v29  ;;  %vm788_vm5 = vweird.f32 %v782_v29  ;;  %v5325_v42 = vld [vmem:[#allocation4_spill] sm:$0xff] }
 0x336   :  { %v775_v26 = vor.u32 1.1754944e-38, %v774_v51  ;;  %vm773_vm3 = vcmp.eq.f32.partialorder %v772_v22, 8.507059e+37 }
 0x33a   :  { %v3247_v21 = vpop.eup %3246 }
 0x33b   :  { %v3249_v61 = vpop.eup %3248  ;;  %v764_v31 = vmul.f32 %v3247_v21, %v762_v17  ;;  %vm769_vm0 = vweird.f32 %v3247_v21 }
 0x33c   :  { %v784_v27 = vmul.f32 %v3249_v61, %v782_v29  ;;  %vm770_vm2 = vmor %vm768_vm1, %vm769_vm0  ;;  %vm789_vm4 = vweird.f32 %v3249_v61 }
 0x33d   :  { %v765_v24 = vsub.f32 1.0, %v764_v31  ;;  %v792_v31 = vand.u32 2147483647, %v782_v29  ;;  %vm790_vm6 = vmor %vm788_vm5, %vm789_vm4  ;;  %v5322_v29 = vld [vmem:[#allocation29_spill] sm:$0xff] }
 0x33e   :  { %v785_v49 = vsub.f32 1.0, %v784_v27 }
 0x33f   :  { %v766_v48 = vmul.f32 %v3247_v21, %v765_v24  ;;  %v795_v24 = vor.u32 1.1754944e-38, %v794_v25  ;;  %vm793_vm7 = vcmp.eq.f32.partialorder %v792_v31, 8.507059e+37 }
 0x340   :  { %v786_v43 = vmul.f32 %v3249_v61, %v785_v49 }
 0x341   :  { %v767_v54 = vadd.f32 %v3247_v21, %v766_v48 }
 0x342   :  { %v787_v30 = vadd.f32 %v3249_v61, %v786_v43  ;;  %v5323_v43 = vld [vmem:[#allocation3_spill] sm:$0xff] }
 0x343   :  { %v771_v3 = vsel %vm770_vm2, %v3247_v21, %v767_v54  ;;  %v5324_v54 = vld [vmem:[#allocation31_spill] sm:$0xff] }
 0x344   :  { %v776_v28 = vsel %vm773_vm3, %v775_v26, %v771_v3  ;;  %v791_v27 = vsel %vm790_vm6, %v3249_v61, %v787_v30  ;;  %v5321_v61 = vld [vmem:[#allocation2_spill] sm:$0xff]  ;;  %v5326_v26 = vld [vmem:[#allocation5_spill] sm:$0xff] }
 0x345   :  { %v798_v13 = vmul.f32 %v776_v28, %v450_v36  ;;  %v796_v51 = vsel %vm793_vm7, %v795_v24, %v791_v27  ;;  %v5327_v24 = vld [vmem:[#allocation14_spill] sm:$0xff] }
 0x346   :  { %v801_v49 = vsub.f32 1.0, %v796_v51  ;;  %v803_v21 = vmul.f32 0.0, %v796_v51 }
 0x347   :  { %v799_v17 = vadd.f32 %v798_v13, %v757_v47 }
 0x349   :  { %3250 = vtanh.f32 %v799_v17 }
 0x34f   :  { %v3251_v48 = vpop.eup %3250 }
 0x350   :  { %v802_v32 = vmul.f32 %v3251_v48, %v801_v49 }
 0x352   :  { %v4161_v22 = vadd.f32 %v803_v21, %v802_v32 }
 0x354   :  { %5320 = vst [vmem:[#allocation44_spill] sm:$0xff] %v4161_v22  ;;  %v805_v18 = vpack.c.bf16 %v4161_v22, %v4161_v22 }
 0x356   :  { %814 = vmatmul.bf16.vlgmr.msrb.gmra.mxu1 %v805_v18  ;;  %827 = vmatmul.bf16.vlgmr.msrb.gmra.mxu2 %v805_v18 }
 0x357   :  { %840 = vmatmul.bf16.vlgmr.msra.gmra.mxu3 %v805_v18  ;;  %853 = vmatmul.bf16.vlgmr.msrb.gmra.mxu0 %v805_v18 }
 0x358   :  { %929 = vmatpush.bf16.msrb.mxu1 %v3812_v38  ;;  %993 = vmatpush.bf16.msrb.mxu2 %v3467_v4 }
 0x359   :  { %1006 = vmatpush.bf16.msra.mxu3 %v3647_v55  ;;  %1019 = vmatpush.bf16.msrb.mxu0 %v3782_v8 }
 0x35c   :  { %930 = vmatpush.bf16.msrb.mxu1 %v3843_v0  ;;  %994 = vmatpush.bf16.msrb.mxu2 %v3474_v6 }
 0x35d   :  { %1007 = vmatpush.bf16.msra.mxu3 %v3654_v57  ;;  %1020 = vmatpush.bf16.msrb.mxu0 %v3815_v39 }
 0x360   :  { %931 = vmatpush.bf16.msrb.mxu1 %v3872_v23  ;;  %995 = vmatpush.bf16.msrb.mxu2 %v3483_v9 }
 0x361   :  { %1008 = vmatpush.bf16.msra.mxu3 %v3670_v62  ;;  %1021 = vmatpush.bf16.msrb.mxu0 %v3846_v1 }
 0x364   :  { %932 = vmatpush.bf16.msrb.mxu1 %v3901_v5  ;;  %996 = vmatpush.bf16.msrb.mxu2 %v3492_v12 }
 0x365   :  { %1009 = vmatpush.bf16.msra.mxu3 %v3697_v11  ;;  %1022 = vmatpush.bf16.msrb.mxu0 %v3875_v34 }
 0x368   :  { %933 = vmatpush.bf16.msrb.mxu1 %v3929_v58  ;;  %997 = vmatpush.bf16.msrb.mxu2 %v5321_v61 }
 0x369   :  { %1010 = vmatpush.bf16.msra.mxu3 %v3716_v20  ;;  %1023 = vmatpush.bf16.msrb.mxu0 %v3904_v10 }
 0x36c   :  { %934 = vmatpush.bf16.msrb.mxu1 %v5322_v29  ;;  %998 = vmatpush.bf16.msrb.mxu2 %v5323_v43 }
 0x36d   :  { %1011 = vmatpush.bf16.msra.mxu3 %v3735_v37  ;;  %1024 = vmatpush.bf16.msrb.mxu0 %v3932_v59 }
 0x370   :  { %935 = vmatpush.bf16.msrb.mxu1 %v5324_v54  ;;  %999 = vmatpush.bf16.msrb.mxu2 %v5325_v42 }
 0x371   :  { %1012 = vmatpush.bf16.msra.mxu3 %v3754_v53  ;;  %1025 = vmatpush.bf16.msrb.mxu0 %v3960_v45 }
 0x374   :  { %936 = vmatpush.bf16.msrb.mxu1 %v4084_v15  ;;  %1000 = vmatpush.bf16.msrb.mxu2 %v5326_v26 }
 0x375   :  { %1013 = vmatpush.bf16.msra.mxu3 %v3779_v2  ;;  %1026 = vmatpush.bf16.msrb.mxu0 %v3994_v19 }
 0x3d3   :  { %v815_v36 = vpop.f32.mrf.mxu1 }
 0x3d4   :  { %v861_v3 = vpack.c.bf16 %v815_v36, %v815_v36  ;;  %v4197_v28 = vpop.f32.mrf.mxu0 }
 0x3d6   :  { %870 = vmatmul.bf16.vlgmr.msra.gmra.mxu1 %v861_v3 }
 0x3d7   :  { %1032 = vmatpush.bf16.msra.mxu1 %v3672_v63 }
 0x3d9   :  { %v4200_v30 = vpop.f32.mrf.mxu2 }
 0x3da   :  { %v4202_v47 = vpop.f32.mrf.mxu3 }
 0x3db   :  { %v817_v13 = vpop.f32.mrf.mxu1  ;;  %1033 = vmatpush.bf16.msra.mxu1 %v3687_v7 }
 0x3dc   :  { %v856_v25 = vpop.f32.mrf.mxu0 }
 0x3df   :  { %1034 = vmatpush.bf16.msra.mxu1 %v3706_v16 }
 0x3e1   :  { %v830_v31 = vpop.f32.mrf.mxu2 }
 0x3e2   :  { %v843_v17 = vpop.f32.mrf.mxu3  ;;  %v5328_v31 = vld [vmem:[#allocation6_spill] sm:$0xff] }
 0x3e3   :  { %1035 = vmatpush.bf16.msra.mxu1 %v3725_v33  ;;  %v5329_v17 = vld [vmem:[#allocation7_spill] sm:$0xff] }
 0x3e7   :  { %1036 = vmatpush.bf16.msra.mxu1 %v3744_v46 }
 0x3eb   :  { %1037 = vmatpush.bf16.msra.mxu1 %v3769_v60 }
 0x3ef   :  { %1038 = vmatpush.bf16.msra.mxu1 %v3791_v14 }
 0x3f3   :  { %1039 = vmatpush.bf16.msra.mxu1 %v3824_v52  ;;  %v5330_v52 = vld [vmem:[#allocation8_spill] sm:$0xff] }
 0x453   :  { %v871_v27 = vpop.f32.mrf.mxu1 }
 0x454   :  { %v872_v51 = vadd.f32 %v871_v27, %v5327_v24  ;;  %v5331_v27 = vld [vmem:[#allocation9_spill] sm:$0xff]  ;;  %v5332_v24 = vld [vmem:[#allocation10_spill] sm:$0xff] }
 0x456   :  { %875 = vmax.xlane.f32.xlu1 %v872_v51 }
 0x45b   :  { %v873_v49 = vpop.f32.mrf.mxu1 }
 0x45c   :  { %v5334_v49 = vld [vmem:[#allocation12_spill] sm:$0xff] }
 0x4c9   :  { %v876_v48 = vpop.xlane.xlu1 %875 }
 0x4ca   :  { %v877_v32 = vsub.f32 %v872_v51, %v876_v48  ;;  %v5333_v51 = vld [vmem:[#allocation11_spill] sm:$0xff]  ;;  %v5335_v48 = vld [vmem:[#allocation13_spill] sm:$0xff] }
 0x4cc   :  { %v878_v21 = vmul.f32 1.442695, %v877_v32 }
 0x4ce   :  { %3252 = vpow2.f32 %v878_v21 }
 0x4d4   :  { %v3253_v18 = vpop.eup %3252 }
 0x4d5   :  { %880 = vadd.xlane.f32.xlu1 %v3253_v18 }
 0x548   :  { %v881_v36 = vpop.xlane.xlu1 %880 }
 0x549   :  { %3254 = vrcp.f32 %v881_v36  ;;  %v5337_v36 = vld [vmem:[#allocation25_spill] sm:$0xff] }
 0x54f   :  { %v3255_v3 = vpop.eup %3254 }
 0x550   :  { %v883_v13 = vmul.f32 %v3255_v3, %v3253_v18  ;;  %v5336_v18 = vld [vmem:[#allocation34_spill] sm:$0xff]  ;;  %v5338_v3 = vld [vmem:[#allocation15_spill] sm:$0xff] }
 0x552   :  { %v884_v25 = vpack.c.bf16 %v883_v13, %v883_v13  ;;  %v5339_v13 = vld [vmem:[#allocation35_spill] sm:$0xff] }
 0x554   :  { %893 = vmatmul.bf16.vlgmr.msra.gmra.mxu2 %v884_v25  ;;  %v5340_v25 = vld [vmem:[#allocation26_spill] sm:$0xff] }
 0x555   :  { %1049 = vmatpush.bf16.msra.mxu2 %v5328_v31  ;;  %v5341_v31 = vld [vmem:[#allocation16_spill] sm:$0xff] }
 0x559   :  { %1050 = vmatpush.bf16.msra.mxu2 %v5329_v17  ;;  %v5343_v17 = vld [vmem:[#allocation27_spill] sm:$0xff] }
 0x55d   :  { %1051 = vmatpush.bf16.msra.mxu2 %v5330_v52 }
 0x561   :  { %1052 = vmatpush.bf16.msra.mxu2 %v5331_v27  ;;  %v5344_v27 = vld [vmem:[#allocation17_spill] sm:$0xff] }
 0x565   :  { %1053 = vmatpush.bf16.msra.mxu2 %v5332_v24  ;;  %v5345_v24 = vld [vmem:[#allocation37_spill] sm:$0xff] }
 0x569   :  { %1054 = vmatpush.bf16.msra.mxu2 %v5333_v51  ;;  %v5347_v51 = vld [vmem:[#allocation18_spill] sm:$0xff] }
 0x56d   :  { %1055 = vmatpush.bf16.msra.mxu2 %v5334_v49  ;;  %v5348_v49 = vld [vmem:[#allocation38_spill] sm:$0xff] }
 0x571   :  { %1056 = vmatpush.bf16.msra.mxu2 %v5335_v48  ;;  %v5349_v48 = vld [vmem:[#allocation30_spill] sm:$0xff] }
 0x5d7   :  { %v894_v32 = vpop.f32.mrf.mxu2 }
 0x5d8   :  { %v902_v21 = vpack.c.bf16 %v894_v32, %v894_v32  ;;  %v5350_v32 = vld [vmem:[#allocation19_spill] sm:$0xff] }
 0x5da   :  { %911 = vmatmul.bf16.vlgmr.msrb.gmra.mxu3 %v902_v21  ;;  %924 = vmatmul.bf16.vlgmr.msra.gmra.mxu0 %v902_v21 }
 0x5db   :  { %937 = vmatmul.bf16.vlgmr.msrb.gmra.mxu1 %v902_v21  ;;  %1072 = vmatpush.bf16.msrb.mxu3 %v3589_v40  ;;  %v5342_v40 = vld [vmem:[#allocation36_spill] sm:$0xff]  ;;  %v5351_v21 = vld [vmem:[#allocation39_spill] sm:$0xff] }
 0x5dc   :  { %1090 = vmatpush.bf16.msra.mxu0 %v3996_v35  ;;  %1103 = vmatpush.bf16.msrb.mxu1 %v3831_v56 }
 0x5df   :  { %v896_v52 = vpop.f32.mrf.mxu2  ;;  %1073 = vmatpush.bf16.msrb.mxu3 %v3595_v41  ;;  %v5346_v41 = vld [vmem:[#allocation28_spill] sm:$0xff] }
 0x5e0   :  { %1091 = vmatpush.bf16.msra.mxu0 %v5336_v18  ;;  %1104 = vmatpush.bf16.msrb.mxu1 %v5337_v36  ;;  %v5352_v52 = vld [vmem:[#allocation33_spill] sm:$0xff] }
 0x5e3   :  { %1074 = vmatpush.bf16.msrb.mxu3 %v5338_v3  ;;  %v5353_v3 = vld [vmem:[#allocation20_spill] sm:$0xff] }
 0x5e4   :  { %1092 = vmatpush.bf16.msra.mxu0 %v5339_v13  ;;  %1105 = vmatpush.bf16.msrb.mxu1 %v5340_v25 }
 0x5e7   :  { %1075 = vmatpush.bf16.msrb.mxu3 %v5341_v31  ;;  %v5354_v31 = vld [vmem:[#allocation40_spill] sm:$0xff] }
 0x5e8   :  { %1093 = vmatpush.bf16.msra.mxu0 %v5342_v40  ;;  %1106 = vmatpush.bf16.msrb.mxu1 %v5343_v17 }
 0x5eb   :  { %1076 = vmatpush.bf16.msrb.mxu3 %v5344_v27  ;;  %v5355_v27 = vld [vmem:[#allocation41_spill] sm:$0xff] }
 0x5ec   :  { %1094 = vmatpush.bf16.msra.mxu0 %v5345_v24  ;;  %1107 = vmatpush.bf16.msrb.mxu1 %v5346_v41 }
 0x5ef   :  { %1077 = vmatpush.bf16.msrb.mxu3 %v5347_v51  ;;  %v2818_v51 = vld [vmem:[%s5173_s0 + $0x20] sm:$0xff] }
 0x5f0   :  { %1095 = vmatpush.bf16.msra.mxu0 %v5348_v49  ;;  %1108 = vmatpush.bf16.msrb.mxu1 %v5349_v48  ;;  %v859_v48 = vadd.f32 %v4202_v47, %v4144_v50 }
 0x5f3   :  { %1078 = vmatpush.bf16.msrb.mxu3 %v5350_v32 }
 0x5f4   :  { %1096 = vmatpush.bf16.msra.mxu0 %v5351_v21  ;;  %1109 = vmatpush.bf16.msrb.mxu1 %v5352_v52  ;;  %v2817_v52 = vld [vmem:[%s5173_s0 + $0x18] sm:$0xff] }
 0x5f7   :  { %1079 = vmatpush.bf16.msrb.mxu3 %v5353_v3 }
 0x5f8   :  { %1097 = vmatpush.bf16.msra.mxu0 %v5354_v31  ;;  %1110 = vmatpush.bf16.msrb.mxu1 %v5355_v27  ;;  %v5356_v31 = vld [vmem:[#allocation42_spill] sm:$0xff] }
 0x5f9   :  { %v858_v27 = vadd.f32 %v4200_v30, %v5356_v31 }
 0x657   :  { %v925_v41 = vpop.f32.mrf.mxu0 }
 0x658   :  { %v943_v49 = vadd.f32 %v2818_v51, %v925_v41  ;;  %v938_v32 = vpop.f32.mrf.mxu1 }
 0x65a   :  { %v965_v24 = vadd.f32 %v943_v49, %v859_v48 }
 0x65c   :  { %v2821_v3 = vmul.f32 -1.442695, %v965_v24 }
 0x65d   :  { %v912_v21 = vpop.f32.mrf.mxu3 }
 0x65e   :  { %3256 = vpow2.f32 %v2821_v3  ;;  %v942_v17 = vadd.f32 %v2817_v52, %v912_v21 }
 0x65f   :  { %v927_v40 = vpop.f32.mrf.mxu0 }
 0x660   :  { %v945_v25 = vadd.f32 %v942_v17, %v858_v27  ;;  %v940_v13 = vpop.f32.mrf.mxu1  ;;  %v860_v17 = vadd.f32 %v4197_v28, %v4154_v44 }
 0x662   :  { %v2820_v36 = vmul.f32 -1.442695, %v945_v25 }
 0x664   :  { %v3257_v18 = vpop.eup %3256  ;;  %3258 = vpow2.f32 %v2820_v36 }
 0x665   :  { %v969_v47 = vadd.f32 1.0, %v3257_v18  ;;  %v914_v41 = vpop.f32.mrf.mxu3  ;;  %v2819_v18 = vld [vmem:[%s5173_s0 + $0x28] sm:$0xff] }
 0x667   :  { %3260 = vrcp.f32 %v969_v47  ;;  %v981_v41 = vand.u32 2147483648, %v969_v47  ;;  %vm975_vm13 = vweird.f32 %v969_v47 }
 0x66a   :  { %v3259_v49 = vpop.eup %3258 }
 0x66b   :  { %v949_v48 = vadd.f32 1.0, %v3259_v49  ;;  %v944_v49 = vadd.f32 %v2819_v18, %v938_v32 }
 0x66d   :  { %3262 = vrcp.f32 %v949_v48  ;;  %v3261_v51 = vpop.eup %3260  ;;  %v961_v3 = vand.u32 2147483648, %v949_v48  ;;  %v959_v40 = vand.u32 2147483647, %v949_v48  ;;  %vm955_vm9 = vweird.f32 %v949_v48 }
 0x66e   :  { %v971_v24 = vmul.f32 %v3261_v51, %v969_v47  ;;  %vm976_vm12 = vweird.f32 %v3261_v51 }
 0x66f   :  { %v962_v36 = vor.u32 1.1754944e-38, %v961_v3  ;;  %vm960_vm11 = vcmp.eq.f32.partialorder %v959_v40, 8.507059e+37  ;;  %vm977_vm14 = vmor %vm975_vm13, %vm976_vm12 }
 0x670   :  { %v972_v35 = vsub.f32 1.0, %v971_v24 }
 0x672   :  { %v973_v13 = vmul.f32 %v3261_v51, %v972_v35  ;;  %v979_v35 = vand.u32 2147483647, %v969_v47 }
 0x673   :  { %v3263_v50 = vpop.eup %3262 }
 0x674   :  { %v951_v56 = vmul.f32 %v3263_v50, %v949_v48  ;;  %vm956_vm8 = vweird.f32 %v3263_v50  ;;  %v974_v27 = vadd.f32 %v3261_v51, %v973_v13  ;;  %vm980_vm15 = vcmp.eq.f32.partialorder %v979_v35, 8.507059e+37 }
 0x675   :  { %vm957_vm10 = vmor %vm955_vm9, %vm956_vm8 }
 0x676   :  { %v952_v30 = vsub.f32 1.0, %v951_v56 }
 0x678   :  { %v953_v21 = vmul.f32 %v3263_v50, %v952_v30  ;;  %v978_v30 = vsel %vm977_vm14, %v3261_v51, %v974_v27 }
 0x67a   :  { %v954_v25 = vadd.f32 %v3263_v50, %v953_v21  ;;  %v982_v21 = vor.u32 1.1754944e-38, %v981_v41  ;;  %v4313_v41 = vld [vmem:[%s5169_s4] sm:$0xff] }
 0x67b   :  { %5359 = vst [vmem:[#allocation2_spill] sm:$0xff] %v4313_v41 }
 0x67c   :  { %v958_v52 = vsel %vm957_vm10, %v3263_v50, %v954_v25  ;;  %v983_v3 = vsel %vm980_vm15, %v982_v21, %v978_v30 }
 0x67d   :  { %v963_v56 = vsel %vm960_vm11, %v962_v36, %v958_v52  ;;  %v988_v31 = vsub.f32 1.0, %v983_v3  ;;  %v990_v50 = vmul.f32 %v983_v3, %v4161_v22  ;;  %v5357_v52 = vld [vmem:[#allocation22_spill] sm:$0xff] }
 0x67e   :  { %v985_v24 = vmul.f32 %v963_v56, %v860_v17  ;;  %v5358_v56 = vld [vmem:[#allocation23_spill] sm:$0xff]  ;;  %v4391_v22 = vld [vmem:[%s5170_s2 + $0x20] sm:$0xff] }
 0x67f   :  { %5377 = vst [vmem:[#allocation11_spill] sm:$0xff] %v4391_v22 }
 0x680   :  { %v986_v48 = vadd.f32 %v985_v24, %v944_v49 }
 0x682   :  { %3264 = vtanh.f32 %v986_v48 }
 0x688   :  { %v3265_v14 = vpop.eup %3264 }
 0x689   :  { %v989_v28 = vmul.f32 %v3265_v14, %v988_v31 }
 0x68b   :  { %v4260_v40 = vadd.f32 %v990_v50, %v989_v28 }
 0x68d   :  { %v992_v32 = vpack.c.bf16 %v4260_v40, %v4260_v40 }
 0x68f   :  { %1001 = vmatmul.bf16.vlgmr.msrb.gmra.mxu2 %v992_v32  ;;  %1014 = vmatmul.bf16.vlgmr.msra.gmra.mxu3 %v992_v32 }
 0x690   :  { %1027 = vmatmul.bf16.vlgmr.msrb.gmra.mxu0 %v992_v32  ;;  %1040 = vmatmul.bf16.vlgmr.msra.gmra.mxu1 %v992_v32 }
 0x691   :  { %1116 = vmatpush.bf16.msrb.mxu2 %v3812_v38  ;;  %1180 = vmatpush.bf16.msra.mxu3 %v3467_v4 }
 0x692   :  { %1193 = vmatpush.bf16.msrb.mxu0 %v3647_v55  ;;  %1206 = vmatpush.bf16.msra.mxu1 %v3782_v8 }
 0x695   :  { %1117 = vmatpush.bf16.msrb.mxu2 %v3843_v0  ;;  %1181 = vmatpush.bf16.msra.mxu3 %v3474_v6 }
 0x696   :  { %1194 = vmatpush.bf16.msrb.mxu0 %v3654_v57  ;;  %1207 = vmatpush.bf16.msra.mxu1 %v3815_v39 }
 0x699   :  { %1118 = vmatpush.bf16.msrb.mxu2 %v3872_v23  ;;  %1182 = vmatpush.bf16.msra.mxu3 %v3483_v9 }
 0x69a   :  { %1195 = vmatpush.bf16.msrb.mxu0 %v3670_v62  ;;  %1208 = vmatpush.bf16.msra.mxu1 %v3846_v1 }
 0x69d   :  { %1119 = vmatpush.bf16.msrb.mxu2 %v3901_v5  ;;  %1183 = vmatpush.bf16.msra.mxu3 %v3492_v12 }
 0x69e   :  { %1196 = vmatpush.bf16.msrb.mxu0 %v3697_v11  ;;  %1209 = vmatpush.bf16.msra.mxu1 %v3875_v34 }
 0x6a1   :  { %1120 = vmatpush.bf16.msrb.mxu2 %v3929_v58  ;;  %1184 = vmatpush.bf16.msra.mxu3 %v5321_v61 }
 0x6a2   :  { %1197 = vmatpush.bf16.msrb.mxu0 %v3716_v20  ;;  %1210 = vmatpush.bf16.msra.mxu1 %v3904_v10 }
 0x6a5   :  { %1121 = vmatpush.bf16.msrb.mxu2 %v5322_v29  ;;  %1185 = vmatpush.bf16.msra.mxu3 %v5323_v43 }
 0x6a6   :  { %1198 = vmatpush.bf16.msrb.mxu0 %v3735_v37  ;;  %1211 = vmatpush.bf16.msra.mxu1 %v3932_v59 }
 0x6a9   :  { %1122 = vmatpush.bf16.msrb.mxu2 %v5324_v54  ;;  %1186 = vmatpush.bf16.msra.mxu3 %v5325_v42 }
 0x6aa   :  { %1199 = vmatpush.bf16.msrb.mxu0 %v3754_v53  ;;  %1212 = vmatpush.bf16.msra.mxu1 %v3960_v45 }
 0x6ad   :  { %1123 = vmatpush.bf16.msrb.mxu2 %v4084_v15  ;;  %1187 = vmatpush.bf16.msra.mxu3 %v5326_v26 }
 0x6ae   :  { %1200 = vmatpush.bf16.msrb.mxu0 %v3779_v2  ;;  %1213 = vmatpush.bf16.msra.mxu1 %v3994_v19 }
 0x70d   :  { %v4296_v14 = vpop.f32.mrf.mxu0  ;;  %v4298_v31 = vpop.f32.mrf.mxu1 }
 0x712   :  { %v1002_v47 = vpop.f32.mrf.mxu2  ;;  %v4300_v51 = vpop.f32.mrf.mxu3 }
 0x713   :  { %v1048_v13 = vpack.c.bf16 %v1002_v47, %v1002_v47  ;;  %v4319_v47 = vld [vmem:[%s5168_s1 + $0x38] sm:$0xff] }
 0x714   :  { %5360 = vst [vmem:[#allocation29_spill] sm:$0xff] %v4319_v47 }
 0x715   :  { %v1030_v25 = vpop.f32.mrf.mxu0  ;;  %v1043_v18 = vpop.f32.mrf.mxu1  ;;  %1057 = vmatmul.bf16.vlgmr.msra.gmra.mxu2 %v1048_v13  ;;  %v4325_v13 = vld [vmem:[%s5168_s1 + $0x30] sm:$0xff] }
 0x716   :  { %1219 = vmatpush.bf16.msra.mxu2 %v3672_v63  ;;  %5361 = vst [vmem:[#allocation3_spill] sm:$0xff] %v4325_v13  ;;  %v4331_v25 = vld [vmem:[%s5168_s1 + $0x28] sm:$0xff]  ;;  %v4337_v18 = vld [vmem:[%s5168_s1 + $0x20] sm:$0xff] }
 0x717   :  { %5362 = vst [vmem:[#allocation31_spill] sm:$0xff] %v4331_v25 }
 0x718   :  { %5363 = vst [vmem:[#allocation4_spill] sm:$0xff] %v4337_v18 }
 0x71a   :  { %v1004_v36 = vpop.f32.mrf.mxu2  ;;  %v1017_v17 = vpop.f32.mrf.mxu3  ;;  %1220 = vmatpush.bf16.msra.mxu2 %v3687_v7 }
 0x71b   :  { %v4343_v36 = vld [vmem:[%s5168_s1 + $0x18] sm:$0xff]  ;;  %v4349_v17 = vld [vmem:[%s5168_s1 + $0x10] sm:$0xff] }
 0x71c   :  { %5364 = vst [vmem:[#allocation5_spill] sm:$0xff] %v4343_v36 }
 0x71d   :  { %5365 = vst [vmem:[#allocation14_spill] sm:$0xff] %v4349_v17 }
 0x71e   :  { %1221 = vmatpush.bf16.msra.mxu2 %v3706_v16 }
 0x722   :  { %1222 = vmatpush.bf16.msra.mxu2 %v3725_v33 }
 0x726   :  { %1223 = vmatpush.bf16.msra.mxu2 %v3744_v46 }
 0x72a   :  { %1224 = vmatpush.bf16.msra.mxu2 %v3769_v60 }
 0x72e   :  { %1225 = vmatpush.bf16.msra.mxu2 %v5357_v52 }
 0x732   :  { %1226 = vmatpush.bf16.msra.mxu2 %v5358_v56 }
 0x798   :  { %v1058_v27 = vpop.f32.mrf.mxu2 }
 0x799   :  { %v1059_v49 = vadd.f32 %v4313_v41, %v1058_v27  ;;  %v4355_v27 = vld [vmem:[%s5168_s1 + $0x8] sm:$0xff] }
 0x79a   :  { %5366 = vst [vmem:[#allocation6_spill] sm:$0xff] %v4355_v27 }
 0x79b   :  { %1062 = vmax.xlane.f32.xlu2 %v1059_v49 }
 0x7a0   :  { %v1060_v24 = vpop.f32.mrf.mxu2 }
 0x80e   :  { %v1063_v35 = vpop.xlane.xlu2 %1062 }
 0x80f   :  { %v1064_v48 = vsub.f32 %v1059_v49, %v1063_v35  ;;  %v4361_v49 = vld [vmem:[%s5168_s1] sm:$0xff] }
 0x810   :  { %5367 = vst [vmem:[#allocation7_spill] sm:$0xff] %v4361_v49 }
 0x811   :  { %v1065_v30 = vmul.f32 1.442695, %v1064_v48  ;;  %v4367_v48 = vld [vmem:[%s5170_s2 + $0x38] sm:$0xff] }
 0x812   :  { %5368 = vst [vmem:[#allocation8_spill] sm:$0xff] %v4367_v48 }
 0x813   :  { %3266 = vpow2.f32 %v1065_v30  ;;  %v5369_v30 = vld [vmem:[#allocation32_spill] sm:$0xff] }
 0x819   :  { %v3267_v21 = vpop.eup %3266 }
 0x81a   :  { %1067 = vadd.xlane.f32.xlu2 %v3267_v21 }
 0x88d   :  { %v1068_v3 = vpop.xlane.xlu2 %1067 }
 0x88e   :  { %3268 = vrcp.f32 %v1068_v3 }
 0x894   :  { %v3269_v28 = vpop.eup %3268 }
 0x895   :  { %v1070_v50 = vmul.f32 %v3269_v28, %v3267_v21  ;;  %v5370_v21 = vld [vmem:[#allocation24_spill] sm:$0xff] }
 0x896   :  { %v4375_v28 = vld [vmem:[%s5170_s2 + $0x30] sm:$0xff] }
 0x897   :  { %v1071_v32 = vpack.c.bf16 %v1070_v50, %v1070_v50  ;;  %5371 = vst [vmem:[#allocation9_spill] sm:$0xff] %v4375_v28  ;;  %v5372_v50 = vld [vmem:[#allocation34_spill] sm:$0xff] }
 0x899   :  { %1080 = vmatmul.bf16.vlgmr.msrb.gmra.mxu3 %v1071_v32  ;;  %v5373_v32 = vld [vmem:[#allocation25_spill] sm:$0xff] }
 0x89a   :  { %1236 = vmatpush.bf16.msrb.mxu3 %v4319_v47 }
 0x89e   :  { %1237 = vmatpush.bf16.msrb.mxu3 %v4325_v13 }
 0x8a2   :  { %1238 = vmatpush.bf16.msrb.mxu3 %v4331_v25 }
 0x8a6   :  { %1239 = vmatpush.bf16.msrb.mxu3 %v4337_v18 }
 0x8aa   :  { %1240 = vmatpush.bf16.msrb.mxu3 %v4343_v36 }
 0x8ae   :  { %1241 = vmatpush.bf16.msrb.mxu3 %v4349_v17 }
 0x8b2   :  { %1242 = vmatpush.bf16.msrb.mxu3 %v4355_v27 }
 0x8b6   :  { %1243 = vmatpush.bf16.msrb.mxu3 %v4361_v49 }
 0x91c   :  { %v1081_v24 = vpop.f32.mrf.mxu3 }
 0x91d   :  { %v1089_v35 = vpack.c.bf16 %v1081_v24, %v1081_v24  ;;  %v4383_v24 = vld [vmem:[%s5170_s2 + $0x28] sm:$0xff] }
 0x91e   :  { %5374 = vst [vmem:[#allocation10_spill] sm:$0xff] %v4383_v24 }
 0x91f   :  { %1098 = vmatmul.bf16.vlgmr.msra.gmra.mxu0 %v1089_v35  ;;  %1111 = vmatmul.bf16.vlgmr.msrb.gmra.mxu1 %v1089_v35 }
 0x920   :  { %1124 = vmatmul.bf16.vlgmr.msrb.gmra.mxu2 %v1089_v35  ;;  %1259 = vmatpush.bf16.msra.mxu0 %v4367_v48  ;;  %v5375_v35 = vld [vmem:[#allocation35_spill] sm:$0xff]  ;;  %v5393_v48 = vld [vmem:[#allocation42_spill] sm:$0xff] }
 0x921   :  { %1277 = vmatpush.bf16.msrb.mxu1 %v5369_v30  ;;  %1290 = vmatpush.bf16.msrb.mxu2 %v5370_v21  ;;  %v5392_v21 = vld [vmem:[#allocation43_spill] sm:$0xff] }
 0x922   :  { %v1046_v30 = vadd.f32 %v4296_v14, %v5392_v21 }
 0x924   :  { %v1083_v3 = vpop.f32.mrf.mxu3  ;;  %1260 = vmatpush.bf16.msra.mxu0 %v4375_v28  ;;  %v4399_v28 = vld [vmem:[%s5170_s2 + $0x18] sm:$0xff] }
 0x925   :  { %1278 = vmatpush.bf16.msrb.mxu1 %v5372_v50  ;;  %1291 = vmatpush.bf16.msrb.mxu2 %v5373_v32  ;;  %v5376_v3 = vld [vmem:[#allocation26_spill] sm:$0xff]  ;;  %v5378_v50 = vld [vmem:[#allocation36_spill] sm:$0xff]  ;;  %v5379_v32 = vld [vmem:[#allocation27_spill] sm:$0xff]  ;;  %5380 = vst [vmem:[#allocation12_spill] sm:$0xff] %v4399_v28 }
 0x928   :  { %1261 = vmatpush.bf16.msra.mxu0 %v4383_v24  ;;  %v4407_v24 = vld [vmem:[%s5170_s2 + $0x10] sm:$0xff] }
 0x929   :  { %1279 = vmatpush.bf16.msrb.mxu1 %v5375_v35  ;;  %1292 = vmatpush.bf16.msrb.mxu2 %v5376_v3  ;;  %v5381_v35 = vld [vmem:[#allocation37_spill] sm:$0xff]  ;;  %v5382_v3 = vld [vmem:[#allocation28_spill] sm:$0xff]  ;;  %5383 = vst [vmem:[#allocation13_spill] sm:$0xff] %v4407_v24 }
 0x92c   :  { %1262 = vmatpush.bf16.msra.mxu0 %v4391_v22  ;;  %v4415_v22 = vld [vmem:[%s5170_s2 + $0x8] sm:$0xff] }
 0x92d   :  { %1280 = vmatpush.bf16.msrb.mxu1 %v5378_v50  ;;  %1293 = vmatpush.bf16.msrb.mxu2 %v5379_v32  ;;  %v5384_v50 = vld [vmem:[#allocation38_spill] sm:$0xff]  ;;  %5386 = vst [vmem:[#allocation15_spill] sm:$0xff] %v4415_v22 }
 0x92e   :  { %v5385_v32 = vld [vmem:[#allocation30_spill] sm:$0xff] }
 0x930   :  { %1263 = vmatpush.bf16.msra.mxu0 %v4399_v28  ;;  %v4423_v28 = vld [vmem:[%s5170_s2] sm:$0xff] }
 0x931   :  { %1281 = vmatpush.bf16.msrb.mxu1 %v5381_v35  ;;  %1294 = vmatpush.bf16.msrb.mxu2 %v5382_v3  ;;  %v5387_v35 = vld [vmem:[#allocation39_spill] sm:$0xff]  ;;  %v5388_v3 = vld [vmem:[#allocation33_spill] sm:$0xff]  ;;  %5389 = vst [vmem:[#allocation16_spill] sm:$0xff] %v4423_v28 }
 0x934   :  { %1264 = vmatpush.bf16.msra.mxu0 %v4407_v24  ;;  %v2822_v24 = vld [vmem:[%s5173_s0 + $0x30] sm:$0xff] }
 0x935   :  { %1282 = vmatpush.bf16.msrb.mxu1 %v5384_v50  ;;  %1295 = vmatpush.bf16.msrb.mxu2 %v5385_v32  ;;  %v5390_v50 = vld [vmem:[#allocation40_spill] sm:$0xff]  ;;  %v5391_v32 = vld [vmem:[#allocation41_spill] sm:$0xff] }
 0x938   :  { %1265 = vmatpush.bf16.msra.mxu0 %v4415_v22 }
 0x939   :  { %1283 = vmatpush.bf16.msrb.mxu1 %v5387_v35  ;;  %1296 = vmatpush.bf16.msrb.mxu2 %v5388_v3  ;;  %v2823_v35 = vld [vmem:[%s5173_s0 + $0x38] sm:$0xff] }
 0x93c   :  { %1266 = vmatpush.bf16.msra.mxu0 %v4423_v28  ;;  %v1045_v28 = vadd.f32 %v4300_v51, %v5393_v48 }
 0x93d   :  { %1284 = vmatpush.bf16.msrb.mxu1 %v5390_v50  ;;  %1297 = vmatpush.bf16.msrb.mxu2 %v5391_v32 }
 0x99c   :  { %v1099_v3 = vpop.f32.mrf.mxu0  ;;  %v1112_v22 = vpop.f32.mrf.mxu1 }
 0x99d   :  { %v1129_v49 = vadd.f32 %v2822_v24, %v1099_v3  ;;  %v1130_v50 = vadd.f32 %v2823_v35, %v1112_v22 }
 0x99f   :  { %v1132_v27 = vadd.f32 %v1129_v49, %v1045_v28  ;;  %v1152_v32 = vadd.f32 %v1130_v50, %v1046_v30 }
 0x9a1   :  { %v2825_v17 = vmul.f32 -1.442695, %v1132_v27  ;;  %v2826_v36 = vmul.f32 -1.442695, %v1152_v32 }
 0x9a3   :  { %3270 = vpow2.f32 %v2825_v17  ;;  %v1125_v18 = vpop.f32.mrf.mxu2 }
 0x9a4   :  { %3272 = vpow2.f32 %v2826_v36  ;;  %v1101_v25 = vpop.f32.mrf.mxu0  ;;  %v1114_v13 = vpop.f32.mrf.mxu1 }
 0x9a9   :  { %v3271_v47 = vpop.eup %3270 }
 0x9aa   :  { %v3273_v41 = vpop.eup %3272  ;;  %v1136_v56 = vadd.f32 1.0, %v3271_v47  ;;  %v1047_v47 = vadd.f32 %v4298_v31, %v4154_v44 }
 0x9ab   :  { %v1156_v52 = vadd.f32 1.0, %v3273_v41  ;;  %v1127_v60 = vpop.f32.mrf.mxu2  ;;  %v2824_v41 = vld [vmem:[%s5173_s0 + $0x40] sm:$0xff] }
 0x9ac   :  { %3274 = vrcp.f32 %v1136_v56  ;;  %v1148_v27 = vand.u32 2147483648, %v1136_v56  ;;  %v1146_v17 = vand.u32 2147483647, %v1136_v56  ;;  %vm1142_vm1 = vweird.f32 %v1136_v56 }
 0x9ad   :  { %3276 = vrcp.f32 %v1156_v52  ;;  %v1168_v35 = vand.u32 2147483648, %v1156_v52  ;;  %v1131_v3 = vadd.f32 %v2824_v41, %v1125_v18  ;;  %vm1162_vm5 = vweird.f32 %v1156_v52  ;;  %v5406_v41 = vld [vmem:[#allocation8_spill] sm:$0xff] }
 0x9ae   :  { %v1149_v60 = vor.u32 1.1754944e-38, %v1148_v27  ;;  %vm1147_vm3 = vcmp.eq.f32.partialorder %v1146_v17, 8.507059e+37 }
 0x9b2   :  { %v3275_v14 = vpop.eup %3274 }
 0x9b3   :  { %v3277_v51 = vpop.eup %3276  ;;  %v1138_v24 = vmul.f32 %v3275_v14, %v1136_v56  ;;  %vm1143_vm0 = vweird.f32 %v3275_v14 }
 0x9b4   :  { %v1158_v22 = vmul.f32 %v3277_v51, %v1156_v52  ;;  %vm1144_vm2 = vmor %vm1142_vm1, %vm1143_vm0  ;;  %vm1163_vm4 = vweird.f32 %v3277_v51 }
 0x9b5   :  { %v1139_v49 = vsub.f32 1.0, %v1138_v24  ;;  %vm1164_vm6 = vmor %vm1162_vm5, %vm1163_vm4 }
 0x9b6   :  { %v1159_v30 = vsub.f32 1.0, %v1158_v22  ;;  %v1166_v22 = vand.u32 2147483647, %v1156_v52  ;;  %v5403_v52 = vld [vmem:[#allocation14_spill] sm:$0xff] }
 0x9b7   :  { %v1140_v28 = vmul.f32 %v3275_v14, %v1139_v49 }
 0x9b8   :  { %v1160_v36 = vmul.f32 %v3277_v51, %v1159_v30  ;;  %v1169_v30 = vor.u32 1.1754944e-38, %v1168_v35  ;;  %vm1167_vm7 = vcmp.eq.f32.partialorder %v1166_v22, 8.507059e+37  ;;  %v5411_v35 = vld [vmem:[#allocation25_spill] sm:$0xff]  ;;  %v5414_v22 = vld [vmem:[#allocation26_spill] sm:$0xff] }
 0x9b9   :  { %v1141_v25 = vadd.f32 %v3275_v14, %v1140_v28 }
 0x9ba   :  { %v1161_v32 = vadd.f32 %v3277_v51, %v1160_v36 }
 0x9bb   :  { %v1145_v13 = vsel %vm1144_vm2, %v3275_v14, %v1141_v25 }
 0x9bc   :  { %v1150_v50 = vsel %vm1147_vm3, %v1149_v60, %v1145_v13  ;;  %v1165_v49 = vsel %vm1164_vm6, %v3277_v51, %v1161_v32  ;;  %v5405_v51 = vld [vmem:[#allocation7_spill] sm:$0xff]  ;;  %v5407_v60 = vld [vmem:[#allocation32_spill] sm:$0xff]  ;;  %v5410_v32 = vld [vmem:[#allocation34_spill] sm:$0xff] }
 0x9bd   :  { %v1172_v24 = vmul.f32 %v1150_v50, %v1047_v47  ;;  %v1170_v27 = vsel %vm1167_vm7, %v1169_v30, %v1165_v49  ;;  %v5408_v47 = vld [vmem:[#allocation24_spill] sm:$0xff]  ;;  %v5409_v50 = vld [vmem:[#allocation9_spill] sm:$0xff]  ;;  %v5417_v30 = vld [vmem:[#allocation27_spill] sm:$0xff] }
 0x9be   :  { %v1175_v28 = vsub.f32 1.0, %v1170_v27  ;;  %v1177_v14 = vmul.f32 %v1170_v27, %v4260_v40  ;;  %v5416_v49 = vld [vmem:[#allocation36_spill] sm:$0xff] }
 0x9bf   :  { %v1173_v56 = vadd.f32 %v1172_v24, %v1131_v3  ;;  %v5412_v3 = vld [vmem:[#allocation10_spill] sm:$0xff]  ;;  %v5413_v24 = vld [vmem:[#allocation35_spill] sm:$0xff]  ;;  %v5418_v27 = vld [vmem:[#allocation12_spill] sm:$0xff] }
 0x9c1   :  { %3278 = vtanh.f32 %v1173_v56  ;;  %v5415_v56 = vld [vmem:[#allocation11_spill] sm:$0xff] }
 0x9c7   :  { %v3279_v21 = vpop.eup %3278 }
 0x9c8   :  { %v1176_v31 = vmul.f32 %v3279_v21, %v1175_v28  ;;  %v5404_v21 = vld [vmem:[#allocation6_spill] sm:$0xff]  ;;  %v5419_v28 = vld [vmem:[#allocation37_spill] sm:$0xff] }
 0x9ca   :  { %v4444_v17 = vadd.f32 %v1177_v14, %v1176_v31  ;;  %v5420_v31 = vld [vmem:[#allocation28_spill] sm:$0xff]  ;;  %v5421_v14 = vld [vmem:[#allocation13_spill] sm:$0xff] }
 0x9cc   :  { %v1179_v18 = vpack.c.bf16 %v4444_v17, %v4444_v17 }
 0x9ce   :  { %1188 = vmatmul.bf16.vlgmr.msra.gmra.mxu3 %v1179_v18  ;;  %1201 = vmatmul.bf16.vlgmr.msrb.gmra.mxu0 %v1179_v18 }
 0x9cf   :  { %1214 = vmatmul.bf16.vlgmr.msra.gmra.mxu1 %v1179_v18  ;;  %1227 = vmatmul.bf16.vlgmr.msra.gmra.mxu2 %v1179_v18  ;;  %v5422_v18 = vld [vmem:[#allocation38_spill] sm:$0xff] }
 0x9d0   :  { %1303 = vmatpush.bf16.msra.mxu3 %v3812_v38  ;;  %1367 = vmatpush.bf16.msrb.mxu0 %v3467_v4 }
 0x9d1   :  { %1380 = vmatpush.bf16.msra.mxu1 %v3647_v55  ;;  %1393 = vmatpush.bf16.msra.mxu2 %v3782_v8 }
 0x9d4   :  { %1304 = vmatpush.bf16.msra.mxu3 %v3843_v0  ;;  %1368 = vmatpush.bf16.msrb.mxu0 %v3474_v6 }
 0x9d5   :  { %1381 = vmatpush.bf16.msra.mxu1 %v3654_v57  ;;  %1394 = vmatpush.bf16.msra.mxu2 %v3815_v39  ;;  %v5397_v39 = vld [vmem:[#allocation2_spill] sm:$0xff] }
 0x9d8   :  { %1305 = vmatpush.bf16.msra.mxu3 %v3872_v23  ;;  %1369 = vmatpush.bf16.msrb.mxu0 %v3483_v9 }
 0x9d9   :  { %1382 = vmatpush.bf16.msra.mxu1 %v3670_v62  ;;  %1395 = vmatpush.bf16.msra.mxu2 %v3846_v1 }
 0x9dc   :  { %1306 = vmatpush.bf16.msra.mxu3 %v3901_v5  ;;  %1370 = vmatpush.bf16.msrb.mxu0 %v3492_v12 }
 0x9dd   :  { %1383 = vmatpush.bf16.msra.mxu1 %v3697_v11  ;;  %1396 = vmatpush.bf16.msra.mxu2 %v3875_v34 }
 0x9e0   :  { %1307 = vmatpush.bf16.msra.mxu3 %v3929_v58  ;;  %1371 = vmatpush.bf16.msrb.mxu0 %v5321_v61  ;;  %v5399_v61 = vld [vmem:[#allocation3_spill] sm:$0xff] }
 0x9e1   :  { %1384 = vmatpush.bf16.msra.mxu1 %v3716_v20  ;;  %1397 = vmatpush.bf16.msra.mxu2 %v3904_v10 }
 0x9e4   :  { %1308 = vmatpush.bf16.msra.mxu3 %v5322_v29  ;;  %1372 = vmatpush.bf16.msrb.mxu0 %v5323_v43  ;;  %v5400_v43 = vld [vmem:[#allocation31_spill] sm:$0xff] }
 0x9e5   :  { %1385 = vmatpush.bf16.msra.mxu1 %v3735_v37  ;;  %1398 = vmatpush.bf16.msra.mxu2 %v3932_v59  ;;  %v5394_v37 = vld [vmem:[#allocation21_spill] sm:$0xff] }
 0x9e8   :  { %1309 = vmatpush.bf16.msra.mxu3 %v5324_v54  ;;  %1373 = vmatpush.bf16.msrb.mxu0 %v5325_v42  ;;  %v5401_v42 = vld [vmem:[#allocation4_spill] sm:$0xff] }
 0x9e9   :  { %1386 = vmatpush.bf16.msra.mxu1 %v3754_v53  ;;  %1399 = vmatpush.bf16.msra.mxu2 %v3960_v45  ;;  %v5395_v53 = vld [vmem:[#allocation22_spill] sm:$0xff] }
 0x9ec   :  { %1310 = vmatpush.bf16.msra.mxu3 %v4084_v15  ;;  %1374 = vmatpush.bf16.msrb.mxu0 %v5326_v26  ;;  %v5402_v26 = vld [vmem:[#allocation5_spill] sm:$0xff] }
 0x9ed   :  { %1387 = vmatpush.bf16.msra.mxu1 %v3779_v2  ;;  %1400 = vmatpush.bf16.msra.mxu2 %v3994_v19  ;;  %v5396_v2 = vld [vmem:[#allocation23_spill] sm:$0xff]  ;;  %v5398_v19 = vld [vmem:[#allocation29_spill] sm:$0xff] }
 0xa4b   :  { %v4480_v4 = vpop.f32.mrf.mxu0 }
 0xa4c   :  { %v4482_v6 = vpop.f32.mrf.mxu1 }
 0xa51   :  { %v1189_v9 = vpop.f32.mrf.mxu3 }
 0xa52   :  { %v1235_v12 = vpack.c.bf16 %v1189_v9, %v1189_v9  ;;  %v4484_v55 = vpop.f32.mrf.mxu2  ;;  %v5423_v9 = vld [vmem:[#allocation30_spill] sm:$0xff] }
 0xa53   :  { %v1204_v57 = vpop.f32.mrf.mxu0 }
 0xa54   :  { %v1217_v62 = vpop.f32.mrf.mxu1  ;;  %1244 = vmatmul.bf16.vlgmr.msrb.gmra.mxu3 %v1235_v12  ;;  %v5424_v12 = vld [vmem:[#allocation15_spill] sm:$0xff] }
 0xa55   :  { %1406 = vmatpush.bf16.msrb.mxu3 %v3672_v63  ;;  %v5425_v57 = vld [vmem:[#allocation39_spill] sm:$0xff]  ;;  %v5426_v62 = vld [vmem:[#allocation33_spill] sm:$0xff] }
 0xa59   :  { %v1191_v11 = vpop.f32.mrf.mxu3  ;;  %1407 = vmatpush.bf16.msrb.mxu3 %v3687_v7 }
 0xa5a   :  { %v1230_v20 = vpop.f32.mrf.mxu2  ;;  %v5427_v11 = vld [vmem:[#allocation16_spill] sm:$0xff] }
 0xa5b   :  { %v5428_v20 = vld [vmem:[#allocation40_spill] sm:$0xff] }
 0xa5d   :  { %1408 = vmatpush.bf16.msrb.mxu3 %v3706_v16 }
 0xa61   :  { %1409 = vmatpush.bf16.msrb.mxu3 %v3725_v33 }
 0xa65   :  { %1410 = vmatpush.bf16.msrb.mxu3 %v3744_v46 }
 0xa69   :  { %1411 = vmatpush.bf16.msrb.mxu3 %v5394_v37  ;;  %v5429_v37 = vld [vmem:[#allocation41_spill] sm:$0xff] }
 0xa6d   :  { %1412 = vmatpush.bf16.msrb.mxu3 %v5395_v53  ;;  %v2827_v53 = vld [vmem:[%s5173_s0 + $0x48] sm:$0xff] }
 0xa71   :  { %1413 = vmatpush.bf16.msrb.mxu3 %v5396_v2 }
 0xad7   :  { %v1245_v8 = vpop.f32.mrf.mxu3 }
 0xad8   :  { %v1246_v1 = vadd.f32 %v5397_v39, %v1245_v8  ;;  %v1232_v8 = vadd.f32 %v4480_v4, %v5393_v48 }
 0xada   :  { %1249 = vmax.xlane.f32.xlu0 %v1246_v1 }
 0xadf   :  { %v1247_v63 = vpop.f32.mrf.mxu3 }
 0xb4d   :  { %v1250_v34 = vpop.xlane.xlu0 %1249 }
 0xb4e   :  { %v1251_v7 = vsub.f32 %v1246_v1, %v1250_v34  ;;  %v2828_v34 = vld [vmem:[%s5173_s0 + $0x50] sm:$0xff] }
 0xb50   :  { %v1252_v10 = vmul.f32 1.442695, %v1251_v7 }
 0xb52   :  { %3280 = vpow2.f32 %v1252_v10 }
 0xb58   :  { %v3281_v16 = vpop.eup %3280 }
 0xb59   :  { %1254 = vadd.xlane.f32.xlu1 %v3281_v16 }
 0xbcc   :  { %v1255_v33 = vpop.xlane.xlu1 %1254 }
 0xbcd   :  { %3282 = vrcp.f32 %v1255_v33 }
 0xbd3   :  { %v3283_v46 = vpop.eup %3282 }
 0xbd4   :  { %v1257_v59 = vmul.f32 %v3283_v46, %v3281_v16  ;;  %v5430_v16 = vld [vmem:[#allocation43_spill] sm:$0xff] }
 0xbd5   :  { %v1233_v33 = vadd.f32 %v4482_v6, %v5430_v16 }
 0xbd6   :  { %v1258_v45 = vpack.c.bf16 %v1257_v59, %v1257_v59 }
 0xbd8   :  { %1267 = vmatmul.bf16.vlgmr.msra.gmra.mxu0 %v1258_v45 }
 0xbd9   :  { %1423 = vmatpush.bf16.msra.mxu0 %v5398_v19 }
 0xbdd   :  { %1424 = vmatpush.bf16.msra.mxu0 %v5399_v61 }
 0xbe1   :  { %1425 = vmatpush.bf16.msra.mxu0 %v5400_v43 }
 0xbe5   :  { %1426 = vmatpush.bf16.msra.mxu0 %v5401_v42 }
 0xbe9   :  { %1427 = vmatpush.bf16.msra.mxu0 %v5402_v26 }
 0xbed   :  { %1428 = vmatpush.bf16.msra.mxu0 %v5403_v52 }
 0xbf1   :  { %1429 = vmatpush.bf16.msra.mxu0 %v5404_v21 }
 0xbf5   :  { %1430 = vmatpush.bf16.msra.mxu0 %v5405_v51 }
 0xc55   :  { %v1268_v36 = vpop.f32.mrf.mxu0 }
 0xc56   :  { %v1276_v25 = vpack.c.bf16 %v1268_v36, %v1268_v36 }
 0xc58   :  { %1285 = vmatmul.bf16.vlgmr.msrb.gmra.mxu1 %v1276_v25  ;;  %1298 = vmatmul.bf16.vlgmr.msrb.gmra.mxu2 %v1276_v25 }
 0xc59   :  { %1311 = vmatmul.bf16.vlgmr.msra.gmra.mxu3 %v1276_v25  ;;  %1446 = vmatpush.bf16.msrb.mxu1 %v5406_v41 }
 0xc5a   :  { %1464 = vmatpush.bf16.msrb.mxu2 %v5407_v60  ;;  %1477 = vmatpush.bf16.msra.mxu3 %v5408_v47 }
 0xc5d   :  { %v1270_v13 = vpop.f32.mrf.mxu0  ;;  %1447 = vmatpush.bf16.msrb.mxu1 %v5409_v50 }
 0xc5e   :  { %1465 = vmatpush.bf16.msrb.mxu2 %v5410_v32  ;;  %1478 = vmatpush.bf16.msra.mxu3 %v5411_v35 }
 0xc61   :  { %1448 = vmatpush.bf16.msrb.mxu1 %v5412_v3 }
 0xc62   :  { %1466 = vmatpush.bf16.msrb.mxu2 %v5413_v24  ;;  %1479 = vmatpush.bf16.msra.mxu3 %v5414_v22 }
 0xc65   :  { %1449 = vmatpush.bf16.msrb.mxu1 %v5415_v56 }
 0xc66   :  { %1467 = vmatpush.bf16.msrb.mxu2 %v5416_v49  ;;  %1480 = vmatpush.bf16.msra.mxu3 %v5417_v30  ;;  %v2829_v30 = vld [vmem:[%s5173_s0 + $0x58] sm:$0xff] }
 0xc69   :  { %1450 = vmatpush.bf16.msrb.mxu1 %v5418_v27 }
 0xc6a   :  { %1468 = vmatpush.bf16.msrb.mxu2 %v5419_v28  ;;  %1481 = vmatpush.bf16.msra.mxu3 %v5420_v31  ;;  %v1234_v31 = vadd.f32 %v4484_v55, %v4154_v44 }
 0xc6d   :  { %1451 = vmatpush.bf16.msrb.mxu1 %v5421_v14 }
 0xc6e   :  { %1469 = vmatpush.bf16.msrb.mxu2 %v5422_v18  ;;  %1482 = vmatpush.bf16.msra.mxu3 %v5423_v9 }
 0xc71   :  { %1452 = vmatpush.bf16.msrb.mxu1 %v5424_v12 }
 0xc72   :  { %1470 = vmatpush.bf16.msrb.mxu2 %v5425_v57  ;;  %1483 = vmatpush.bf16.msra.mxu3 %v5426_v62 }
 0xc75   :  { %1453 = vmatpush.bf16.msrb.mxu1 %v5427_v11 }
 0xc76   :  { %1471 = vmatpush.bf16.msrb.mxu2 %v5428_v20  ;;  %1484 = vmatpush.bf16.msra.mxu3 %v5429_v37 }
 0xcd5   :  { %v1286_v2 = vpop.f32.mrf.mxu1 }
 0xcd6   :  { %v1316_v1 = vadd.f32 %v2827_v53, %v1286_v2 }
 0xcd8   :  { %v1319_v63 = vadd.f32 %v1316_v1, %v1232_v8 }
 0xcda   :  { %v2830_v7 = vmul.f32 -1.442695, %v1319_v63 }
 0xcdb   :  { %v1299_v10 = vpop.f32.mrf.mxu2 }
 0xcdc   :  { %3284 = vpow2.f32 %v2830_v7  ;;  %v1317_v46 = vadd.f32 %v2828_v34, %v1299_v10  ;;  %v1312_v59 = vpop.f32.mrf.mxu3 }
 0xcdd   :  { %v1288_v45 = vpop.f32.mrf.mxu1  ;;  %v1318_v9 = vadd.f32 %v2829_v30, %v1312_v59  ;;  %v3200_v59 = vld [vmem:[%s5174_s9 + $0x30] sm:$0xff] }
 0xcde   :  { %v1339_v36 = vadd.f32 %v1317_v46, %v1233_v33  ;;  %v3198_v45 = vld [vmem:[%s5174_s9 + $0x20] sm:$0xff] }
 0xce0   :  { %v2831_v25 = vmul.f32 -1.442695, %v1339_v36  ;;  %v3197_v36 = vld [vmem:[%s5174_s9 + $0x18] sm:$0xff] }
 0xce2   :  { %v3285_v41 = vpop.eup %3284  ;;  %3286 = vpow2.f32 %v2831_v25  ;;  %v3196_v25 = vld [vmem:[%s5174_s9 + $0x10] sm:$0xff] }
 0xce3   :  { %v1323_v4 = vadd.f32 1.0, %v3285_v41  ;;  %v1301_v60 = vpop.f32.mrf.mxu2  ;;  %v3195_v41 = vld [vmem:[%s5174_s9 + $0x8] sm:$0xff] }
 0xce4   :  { %v1314_v47 = vpop.f32.mrf.mxu3 }
 0xce5   :  { %3288 = vrcp.f32 %v1323_v4  ;;  %v1335_v24 = vand.u32 2147483648, %v1323_v4  ;;  %v1333_v22 = vand.u32 2147483647, %v1323_v4  ;;  %vm1329_vm9 = vweird.f32 %v1323_v4 }
 0xce7   :  { %v1336_v28 = vor.u32 1.1754944e-38, %v1335_v24  ;;  %vm1334_vm11 = vcmp.eq.f32.partialorder %v1333_v22, 8.507059e+37 }
 0xce8   :  { %v3287_v13 = vpop.eup %3286 }
 0xce9   :  { %v1343_v50 = vadd.f32 1.0, %v3287_v13 }
 0xceb   :  { %v3289_v32 = vpop.eup %3288  ;;  %3290 = vrcp.f32 %v1343_v50  ;;  %v1355_v62 = vand.u32 2147483648, %v1343_v50  ;;  %v1353_v20 = vand.u32 2147483647, %v1343_v50  ;;  %vm1349_vm13 = vweird.f32 %v1343_v50 }
 0xcec   :  { %v1325_v35 = vmul.f32 %v3289_v32, %v1323_v4  ;;  %vm1330_vm8 = vweird.f32 %v3289_v32  ;;  %v3194_v4 = vld [vmem:[%s5174_s9] sm:$0xff] }
 0xced   :  { %vm1331_vm10 = vmor %vm1329_vm9, %vm1330_vm8  ;;  %v1356_v8 = vor.u32 1.1754944e-38, %v1355_v62  ;;  %vm1354_vm15 = vcmp.eq.f32.partialorder %v1353_v20, 8.507059e+37 }
 0xcee   :  { %v1326_v3 = vsub.f32 1.0, %v1325_v35 }
 0xcf0   :  { %v1327_v6 = vmul.f32 %v3289_v32, %v1326_v3 }
 0xcf1   :  { %v3291_v56 = vpop.eup %3290 }
 0xcf2   :  { %v1345_v49 = vmul.f32 %v3291_v56, %v1343_v50  ;;  %v1328_v27 = vadd.f32 %v3289_v32, %v1327_v6  ;;  %vm1350_vm12 = vweird.f32 %v3291_v56 }
 0xcf3   :  { %vm1351_vm14 = vmor %vm1349_vm13, %vm1350_vm12 }
 0xcf4   :  { %v1346_v14 = vsub.f32 1.0, %v1345_v49  ;;  %v1332_v18 = vsel %vm1331_vm10, %v3289_v32, %v1328_v27  ;;  %v5431_v32 = vld [vmem:[#allocation44_spill] sm:$0xff] }
 0xcf5   :  { %v1337_v12 = vsel %vm1334_vm11, %v1336_v28, %v1332_v18  ;;  %v4596_v35 = vpack.c.bf16 %v4260_v40, %v5431_v32 }
 0xcf6   :  { %v1347_v57 = vmul.f32 %v3291_v56, %v1346_v14  ;;  %v1359_v11 = vmul.f32 %v1337_v12, %v1234_v31  ;;  %v2833_v14 = vld [vmem:[%s5173_s0 + $0x68] sm:$0xff] }
 0xcf8   :  { %v1348_v37 = vadd.f32 %v3291_v56, %v1347_v57  ;;  %v1360_v53 = vadd.f32 %v1359_v11, %v1318_v9 }
 0xcfa   :  { %v1352_v2 = vsel %vm1351_vm14, %v3291_v56, %v1348_v37  ;;  %3292 = vtanh.f32 %v1360_v53 }
 0xcfb   :  { %v1357_v1 = vsel %vm1354_vm15, %v1356_v8, %v1352_v2 }
 0xcfc   :  { %v1362_v55 = vsub.f32 1.0, %v1357_v1  ;;  %v1364_v7 = vmul.f32 %v1357_v1, %v4444_v17 }
 0xd00   :  { %v3293_v63 = vpop.eup %3292 }
 0xd01   :  { %v1363_v34 = vmul.f32 %v3293_v63, %v1362_v55 }
 0xd03   :  { %v4543_v10 = vadd.f32 %v1364_v7, %v1363_v34 }
 0xd05   :  { %v1366_v33 = vpack.c.bf16 %v4543_v10, %v4543_v10  ;;  %v4601_v3 = vpack.c.bf16 %v4543_v10, %v4444_v17  ;;  %v2832_v17 = vld [vmem:[%s5173_s0 + $0x60] sm:$0xff] }
 0xd07   :  { %1375 = vmatmul.bf16.vlgmr.msrb.gmra.mxu0 %v1366_v33  ;;  %1388 = vmatmul.bf16.vlgmr.msra.gmra.mxu1 %v1366_v33 }
 0xd08   :  { %1401 = vmatmul.bf16.vlgmr.msra.gmra.mxu2 %v1366_v33  ;;  %1414 = vmatmul.bf16.vlgmr.msrb.gmra.mxu3 %v1366_v33 }
 0xd09   :  { %1490 = vmatpush.bf16.msrb.mxu0 %v3812_v38  ;;  %1630 = vmatpush.bf16.msra.mxu2 %v5398_v19 }
 0xd0d   :  { %1491 = vmatpush.bf16.msrb.mxu0 %v3843_v0  ;;  %1631 = vmatpush.bf16.msra.mxu2 %v5399_v61 }
 0xd11   :  { %1492 = vmatpush.bf16.msrb.mxu0 %v3872_v23  ;;  %1632 = vmatpush.bf16.msra.mxu2 %v5400_v43 }
 0xd15   :  { %1493 = vmatpush.bf16.msrb.mxu0 %v3901_v5  ;;  %1633 = vmatpush.bf16.msra.mxu2 %v5401_v42 }
 0xd19   :  { %1494 = vmatpush.bf16.msrb.mxu0 %v3929_v58  ;;  %1634 = vmatpush.bf16.msra.mxu2 %v5402_v26  ;;  %v3201_v26 = vld [vmem:[%s5174_s9 + $0x38] sm:$0xff] }
 0xd1a   :  { %1604 = vmatpush.bf16.msra.mxu1 %v3201_v26 }
 0xd1d   :  { %1495 = vmatpush.bf16.msrb.mxu0 %v5322_v29  ;;  %1635 = vmatpush.bf16.msra.mxu2 %v5403_v52 }
 0xd1e   :  { %1605 = vmatpush.bf16.msra.mxu1 %v3200_v59 }
 0xd21   :  { %1496 = vmatpush.bf16.msrb.mxu0 %v5324_v54  ;;  %1636 = vmatpush.bf16.msra.mxu2 %v5404_v21 }
 0xd25   :  { %1497 = vmatpush.bf16.msrb.mxu0 %v4084_v15  ;;  %1637 = vmatpush.bf16.msra.mxu2 %v5405_v51 }
 0xd84   :  { %v1376_v38 = vpop.f32.mrf.mxu0  ;;  %v4563_v0 = vpop.f32.mrf.mxu1 }
 0xd85   :  { %v1422_v23 = vpack.c.bf16 %v1376_v38, %v1376_v38  ;;  %v1419_v12 = vadd.f32 %v4563_v0, %v5393_v48 }
 0xd87   :  { %1431 = vmatmul.bf16.vlgmr.msra.gmra.mxu0 %v1422_v23 }
 0xd8b   :  { %v4565_v5 = vpop.f32.mrf.mxu2  ;;  %v4567_v58 = vpop.f32.mrf.mxu3 }
 0xd8c   :  { %v1378_v29 = vpop.f32.mrf.mxu0  ;;  %v1391_v19 = vpop.f32.mrf.mxu1  ;;  %v1420_v57 = vadd.f32 %v4565_v5, %v5430_v16  ;;  %v110_v16 = vld [vmem:[%s5175_s5] sm:$0xff] }
 0xd93   :  { %v1404_v61 = vpop.f32.mrf.mxu2  ;;  %v1417_v43 = vpop.f32.mrf.mxu3 }
 0xe04   :  { %v1432_v54 = vpop.f32.mrf.mxu0 }
 0xe05   :  { %v1433_v42 = vadd.f32 %v5397_v39, %v1432_v54  ;;  %v3199_v39 = vld [vmem:[%s5174_s9 + $0x28] sm:$0xff] }
 0xe06   :  { %1606 = vmatpush.bf16.msra.mxu1 %v3199_v39 }
 0xe07   :  { %1436 = vmax.xlane.f32.xlu2 %v1433_v42 }
 0xe0a   :  { %1607 = vmatpush.bf16.msra.mxu1 %v3198_v45 }
 0xe0c   :  { %v1434_v15 = vpop.f32.mrf.mxu0 }
 0xe0e   :  { %1608 = vmatpush.bf16.msra.mxu1 %v3197_v36 }
 0xe12   :  { %1609 = vmatpush.bf16.msra.mxu1 %v3196_v25 }
 0xe16   :  { %1610 = vmatpush.bf16.msra.mxu1 %v3195_v41 }
 0xe1a   :  { %1611 = vmatpush.bf16.msra.mxu1 %v3194_v4 }
 0xe7a   :  { %v1437_v52 = vpop.xlane.xlu2 %1436 }
 0xe7b   :  { %v1438_v21 = vsub.f32 %v1433_v42, %v1437_v52  ;;  %v2834_v52 = vld [vmem:[%s5173_s0 + $0x70] sm:$0xff] }
 0xe7d   :  { %v1439_v51 = vmul.f32 1.442695, %v1438_v21 }
 0xe7f   :  { %3294 = vpow2.f32 %v1439_v51  ;;  %v111_v51 = vld [vmem:[%s5175_s5 + $0x8] sm:$0xff] }
 0xe85   :  { %v3295_v46 = vpop.eup %3294 }
 0xe86   :  { %1441 = vadd.xlane.f32.xlu0 %v3295_v46 }
 0xef9   :  { %v1442_v60 = vpop.xlane.xlu0 %1441 }
 0xefa   :  { %3296 = vrcp.f32 %v1442_v60 }
 0xf00   :  { %v3297_v47 = vpop.eup %3296 }
 0xf01   :  { %v1444_v13 = vmul.f32 %v3297_v47, %v3295_v46  ;;  %v1421_v46 = vadd.f32 %v4567_v58, %v4154_v44  ;;  %v112_v44 = vld [vmem:[%s5175_s5 + $0x10] sm:$0xff] }
 0xf03   :  { %v1445_v50 = vpack.c.bf16 %v1444_v13, %v1444_v13 }
 0xf05   :  { %1454 = vmatmul.bf16.vlgmr.msrb.gmra.mxu1 %v1445_v50 }
 0xf15   :  { %1612 = vmatmul.bf16.vlgmr.msra.gmra.mxu1 %v4596_v35 }
 0xf25   :  { %1617 = vmatmul.bf16.gmra.mxu1 %v4601_v3 }
 0xf82   :  { %v1455_v24 = vpop.f32.mrf.mxu1 }
 0xf83   :  { %v1463_v6 = vpack.c.bf16 %v1455_v24, %v1455_v24 }
 0xf85   :  { %1472 = vmatmul.bf16.vlgmr.msrb.gmra.mxu2 %v1463_v6  ;;  %1485 = vmatmul.bf16.vlgmr.msra.gmra.mxu3 %v1463_v6 }
 0xf86   :  { %1498 = vmatmul.bf16.vlgmr.msrb.gmra.mxu0 %v1463_v6 }
 0xf8a   :  { %v1457_v22 = vpop.f32.mrf.mxu1 }
 0xf92   :  { %v1613_v56 = vpop.f32.mrf.mxu1 }
 0xf9a   :  { %v1615_v49 = vpop.f32.mrf.mxu1 }
 0xf9b   :  { %v1627_v30 = vpack.c.bf16 %v1615_v49, %v1613_v56 }
 0xf9d   :  { %1638 = vmatmul.bf16.vlgmr.msra.gmra.mxu2 %v1627_v30 }
 0xfa2   :  { %v1618_v40 = vpop.f32.mrf.mxu1 }
 0xfaa   :  { %v1620_v27 = vpop.f32.mrf.mxu1 }
 0xfab   :  { %v1628_v28 = vpack.c.bf16 %v1620_v27, %v1618_v40  ;;  %v113_v40 = vld [vmem:[%s5175_s5 + $0x18] sm:$0xff] }
 0xfad   :  { %1643 = vmatmul.bf16.gmra.mxu2 %v1628_v28 }
0x1003   :  { %v1499_v31 = vpop.f32.mrf.mxu0 }
0x1004   :  { %v1505_v25 = vadd.f32 %v2834_v52, %v1499_v31  ;;  %v2931_v52 = vld [vmem:[%s5176_s3 + $0x78] sm:$0xf] }
0x1008   :  { %v1473_v18 = vpop.f32.mrf.mxu2  ;;  %v1486_v9 = vpop.f32.mrf.mxu3 }
0x1009   :  { %v1503_v62 = vadd.f32 %v2832_v17, %v1473_v18  ;;  %v1504_v11 = vadd.f32 %v2833_v14, %v1486_v9 }
0x100b   :  { %v1506_v20 = vadd.f32 %v1503_v62, %v1419_v12  ;;  %v1526_v37 = vadd.f32 %v1504_v11, %v1420_v57  ;;  %v1501_v53 = vpop.f32.mrf.mxu0  ;;  %v3136_v62 = vld [vmem:[%s5176_s3 + $0xb0] sm:$0xf0]  ;;  %v3135_v11 = vld [vmem:[%s5176_s3 + $0xac] sm:$0xf] }
0x100c   :  { %v2963_v53 = vld [vmem:[%s5176_s3 + $0xb0] sm:$0xf] }
0x100d   :  { %v2835_v2 = vmul.f32 -1.442695, %v1506_v20  ;;  %v2836_v8 = vmul.f32 -1.442695, %v1526_v37  ;;  %v2957_v37 = vld [vmem:[%s5176_s3 + $0xb4] sm:$0xf0] }
0x100f   :  { %3298 = vpow2.f32 %v2835_v2  ;;  %v3137_v2 = vld [vmem:[%s5176_s3 + $0xb8] sm:$0xf0] }
0x1010   :  { %3300 = vpow2.f32 %v2836_v8  ;;  %v1475_v1 = vpop.f32.mrf.mxu2  ;;  %v1488_v55 = vpop.f32.mrf.mxu3 }
0x1011   :  { %v2960_v55 = vor.u32 %v3135_v11, %v2957_v37  ;;  %v2883_v37 = vld [vmem:[%s5176_s3 + $0x18] sm:$0xf] }
0x1013   :  { %1917 = vmatpush.bf16.msra.mxu0 %v2960_v55  ;;  %v2885_v55 = vld [vmem:[%s5176_s3 + $0x24] sm:$0xf0] }
0x1015   :  { %v3299_v63 = vpop.eup %3298 }
0x1016   :  { %v3301_v34 = vpop.eup %3300  ;;  %v1510_v7 = vadd.f32 1.0, %v3299_v63  ;;  %v2964_v63 = vor.u32 %v3137_v2, %v2963_v53  ;;  %v3118_v53 = vld [vmem:[%s5176_s3 + $0x20] sm:$0xf0]  ;;  %v3117_v2 = vld [vmem:[%s5176_s3 + $0x1c] sm:$0xf] }
0x1017   :  { %v1530_v33 = vadd.f32 1.0, %v3301_v34 }
0x1018   :  { %3302 = vrcp.f32 %v1510_v7  ;;  %v1522_v61 = vand.u32 2147483648, %v1510_v7  ;;  %v1520_v42 = vand.u32 2147483647, %v1510_v7  ;;  %vm1516_vm1 = vweird.f32 %v1510_v7  ;;  %1940 = vmatpush.bf16.msrb.mxu1 %v2964_v63  ;;  %v2891_v63 = vld [vmem:[%s5176_s3 + $0x20] sm:$0xf] }
0x1019   :  { %3304 = vrcp.f32 %v1530_v33  ;;  %v1542_v4 = vand.u32 2147483648, %v1530_v33  ;;  %vm1536_vm5 = vweird.f32 %v1530_v33  ;;  %v1540_v47 = vand.u32 2147483647, %v1530_v33 }
0x101a   :  { %v1523_v21 = vor.u32 1.1754944e-38, %v1522_v61  ;;  %vm1521_vm3 = vcmp.eq.f32.partialorder %v1520_v42, 8.507059e+37  ;;  %v3134_v42 = vld [vmem:[%s5176_s3 + $0xa0] sm:$0xf0] }
0x101b   :  { %v1543_v32 = vor.u32 1.1754944e-38, %v1542_v4  ;;  %vm1541_vm7 = vcmp.eq.f32.partialorder %v1540_v47, 8.507059e+37  ;;  %v3127_v4 = vld [vmem:[%s5176_s3 + $0x68] sm:$0xf0] }
0x101e   :  { %v3303_v48 = vpop.eup %3302 }
0x101f   :  { %v3305_v38 = vpop.eup %3304  ;;  %v1512_v0 = vmul.f32 %v3303_v48, %v1510_v7  ;;  %vm1517_vm0 = vweird.f32 %v3303_v48 }
0x1020   :  { %v1532_v23 = vmul.f32 %v3305_v38, %v1530_v33  ;;  %v1639_v5 = vpop.f32.mrf.mxu2  ;;  %vm1518_vm2 = vmor %vm1516_vm1, %vm1517_vm0  ;;  %vm1537_vm4 = vweird.f32 %v3305_v38 }
0x1021   :  { %v1513_v29 = vsub.f32 1.0, %v1512_v0  ;;  %v1640_v19 = vadd.f32 %v1639_v5, %v110_v16  ;;  %vm1538_vm6 = vmor %vm1536_vm5, %vm1537_vm4  ;;  %v2943_v5 = vld [vmem:[%s5176_s3 + $0x90] sm:$0xf] }
0x1022   :  { %v1533_v43 = vsub.f32 1.0, %v1532_v23 }
0x1023   :  { %v1514_v54 = vmul.f32 %v3303_v48, %v1513_v29  ;;  %1653 = vmax.xlane.f32.xlu1 %v1640_v19  ;;  %v3133_v29 = vld [vmem:[%s5176_s3 + $0x98] sm:$0xf0] }
0x1024   :  { %v1534_v15 = vmul.f32 %v3305_v38, %v1533_v43  ;;  %v2944_v61 = vor.u32 %v3133_v29, %v2943_v5  ;;  %v2945_v43 = vld [vmem:[%s5176_s3 + $0x9c] sm:$0xf0]  ;;  %v3114_v5 = vld [vmem:[%s5176_s3 + $0x4] sm:$0xf] }
0x1025   :  { %v1515_v26 = vadd.f32 %v3303_v48, %v1514_v54  ;;  %v2951_v54 = vld [vmem:[%s5176_s3 + $0x98] sm:$0xf] }
0x1026   :  { %v1535_v36 = vadd.f32 %v3305_v38, %v1534_v15 }
0x1027   :  { %v1519_v59 = vsel %vm1518_vm2, %v3303_v48, %v1515_v26  ;;  %v2952_v26 = vor.u32 %v3134_v42, %v2951_v54 }
0x1028   :  { %v1641_v39 = vpop.f32.mrf.mxu2  ;;  %v1524_v45 = vsel %vm1521_vm3, %v1523_v21, %v1519_v59  ;;  %v1539_v50 = vsel %vm1538_vm6, %v3305_v38, %v1535_v36  ;;  %v3130_v21 = vld [vmem:[%s5176_s3 + $0x80] sm:$0xf0]  ;;  %v2933_v59 = vld [vmem:[%s5176_s3 + $0x84] sm:$0xf0] }
0x1029   :  { %v1642_v41 = vadd.f32 %v1641_v39, %v111_v51  ;;  %v1546_v60 = vmul.f32 %v1524_v45, %v1421_v46  ;;  %v1544_v58 = vsel %vm1541_vm7, %v1543_v32, %v1539_v50  ;;  %1941 = vmatpush.bf16.msrb.mxu1 %v2952_v26  ;;  %v3129_v51 = vld [vmem:[%s5176_s3 + $0x7c] sm:$0xf]  ;;  %v2932_v46 = vor.u32 %v3130_v21, %v2931_v52  ;;  %v2939_v39 = vld [vmem:[%s5176_s3 + $0x80] sm:$0xf]  ;;  %v3131_v45 = vld [vmem:[%s5176_s3 + $0x88] sm:$0xf0] }
0x102a   :  { %v1549_v22 = vsub.f32 1.0, %v1544_v58  ;;  %v1551_v30 = vmul.f32 %v1544_v58, %v4543_v10  ;;  %v2955_v10 = vld [vmem:[%s5176_s3 + $0xa8] sm:$0xf]  ;;  %v2936_v36 = vor.u32 %v3129_v51, %v2933_v59  ;;  %v3128_v32 = vld [vmem:[%s5176_s3 + $0x70] sm:$0xf0] }
0x102b   :  { %1655 = vmax.xlane.f32.xlu2 %v1642_v41  ;;  %v1547_v13 = vadd.f32 %v1546_v60, %v1505_v25  ;;  %v2956_v20 = vor.u32 %v3136_v62, %v2955_v10  ;;  %v2940_v25 = vor.u32 %v3131_v45, %v2939_v39  ;;  %v3126_v60 = vld [vmem:[%s5176_s3 + $0x64] sm:$0xf]  ;;  %v2927_v50 = vld [vmem:[%s5176_s3 + $0x68] sm:$0xf]  ;;  %v2903_v10 = vld [vmem:[%s5176_s3 + $0x38] sm:$0xf] }
0x102c   :  { %v2928_v58 = vor.u32 %v3128_v32, %v2927_v50  ;;  %v3122_v62 = vld [vmem:[%s5176_s3 + $0x40] sm:$0xf0] }
0x102d   :  { %3306 = vtanh.f32 %v1547_v13  ;;  %1894 = vmatpush.bf16.msrb.mxu3 %v2956_v20  ;;  %1942 = vmatpush.bf16.msrb.mxu1 %v2940_v25  ;;  %v2921_v13 = vld [vmem:[%s5176_s3 + $0x6c] sm:$0xf0]  ;;  %v2904_v20 = vor.u32 %v3122_v62, %v2903_v10  ;;  %v2999_v10 = vld [vmem:[%s5177_s11 + $0x40] sm:$0xf]  ;;  %v3227_v62 = vld [vmem:[%s5177_s11 + $0x44] sm:$0xf0] }
0x1030   :  { %v1644_v24 = vpop.f32.mrf.mxu2 }
0x1031   :  { %v4628_v6 = vadd.f32 %v1644_v24, %v112_v44  ;;  %1895 = vmatpush.bf16.msrb.mxu3 %v2944_v61  ;;  %v2924_v44 = vor.u32 %v3126_v60, %v2921_v13  ;;  %1943 = vmatpush.bf16.msrb.mxu1 %v2928_v58  ;;  %v2907_v24 = vld [vmem:[%s5176_s3 + $0x48] sm:$0xf]  ;;  %v3233_v60 = vld [vmem:[%s5177_s11 + $0x74] sm:$0xf0] }
0x1032   :  { %v2879_v61 = vld [vmem:[%s5176_s3 + $0x8] sm:$0xf] }
0x1033   :  { %v3307_v56 = vpop.eup %3306  ;;  %1657 = vmax.xlane.f32.xlu0 %v4628_v6  ;;  %v3231_v58 = vld [vmem:[%s5177_s11 + $0x64] sm:$0xf0] }
0x1034   :  { %v1550_v49 = vmul.f32 %v3307_v56, %v1549_v22  ;;  %v3124_v22 = vld [vmem:[%s5176_s3 + $0x50] sm:$0xf0]  ;;  %v3123_v56 = vld [vmem:[%s5176_s3 + $0x4c] sm:$0xf] }
0x1035   :  { %1896 = vmatpush.bf16.msrb.mxu3 %v2932_v46 }
0x1036   :  { %v1552_v27 = vadd.f32 %v1551_v30, %v1550_v49  ;;  %v2908_v49 = vor.u32 %v3124_v22, %v2907_v24  ;;  %v2909_v30 = vld [vmem:[%s5176_s3 + $0x54] sm:$0xf0] }
0x1038   :  { %v1646_v28 = vpop.f32.mrf.mxu2  ;;  %v4635_v31 = vpack.c.bf16 %v1552_v27, %v1552_v27  ;;  %v3125_v27 = vld [vmem:[%s5176_s3 + $0x58] sm:$0xf0] }
0x1039   :  { %v1647_v17 = vadd.f32 %v1646_v28, %v113_v40  ;;  %v2915_v40 = vld [vmem:[%s5176_s3 + $0x50] sm:$0xf]  ;;  %v2912_v28 = vor.u32 %v3123_v56, %v2909_v30 }
0x103a   :  { %1622 = vmatmul.bf16.gmra.mxu1 %v4635_v31 }
0x103b   :  { %1659 = vmax.xlane.f32.xlu1 %v1647_v17 }
0x1096   :  { %v1654_v14 = vpop.xlane.xlu1 %1653 }
0x1097   :  { %v1663_v18 = vsub.f32 %v1640_v19, %v1654_v14  ;;  %v3132_v19 = vld [vmem:[%s5176_s3 + $0x94] sm:$0xf]  ;;  %v2895_v14 = vld [vmem:[%s5176_s3 + $0x30] sm:$0xf] }
0x1098   :  { %v2948_v15 = vor.u32 %v3132_v19, %v2945_v43  ;;  %v2873_v19 = vld [vmem:[%s5176_s3 + $0xc] sm:$0xf0]  ;;  %v3116_v43 = vld [vmem:[%s5176_s3 + $0x10] sm:$0xf0] }
0x1099   :  { %v1668_v9 = vmul.f32 1.442695, %v1663_v18  ;;  %v3121_v18 = vld [vmem:[%s5176_s3 + $0x38] sm:$0xf0]  ;;  %v2876_v54 = vor.u32 %v3114_v5, %v2873_v19  ;;  %v2880_v42 = vor.u32 %v3116_v43, %v2879_v61  ;;  %v3219_v19 = vld [vmem:[%s5177_s11 + $0x4] sm:$0xf0] }
0x109a   :  { %1918 = vmatpush.bf16.msra.mxu0 %v2948_v15 }
0x109b   :  { %3308 = vpow2.f32 %v1668_v9  ;;  %v3120_v9 = vld [vmem:[%s5176_s3 + $0x34] sm:$0xf] }
0x109e   :  { %v1656_v12 = vpop.xlane.xlu2 %1655  ;;  %1919 = vmatpush.bf16.msra.mxu0 %v2936_v36 }
0x109f   :  { %v1664_v57 = vsub.f32 %v1642_v41, %v1656_v12  ;;  %v2919_v41 = vld [vmem:[%s5176_s3 + $0x60] sm:$0xf]  ;;  %v2896_v12 = vor.u32 %v3121_v18, %v2895_v14 }
0x10a0   :  { %v2920_v47 = vor.u32 %v3127_v4, %v2919_v41  ;;  %v3023_v4 = vld [vmem:[%s5177_s11 + $0x70] sm:$0xf] }
0x10a1   :  { %v4656_v8 = vpop.eup %3308  ;;  %v1670_v1 = vmul.f32 1.442695, %v1664_v57  ;;  %v2897_v57 = vld [vmem:[%s5176_s3 + $0x3c] sm:$0xf0] }
0x10a2   :  { %1678 = vadd.xlane.f32.xlu0 %v4656_v8  ;;  %1897 = vmatpush.bf16.msrb.mxu3 %v2920_v47  ;;  %v2900_v11 = vor.u32 %v3120_v9, %v2897_v57  ;;  %v3015_v47 = vld [vmem:[%s5177_s11 + $0x60] sm:$0xf] }
0x10a3   :  { %3310 = vpow2.f32 %v1670_v1  ;;  %1920 = vmatpush.bf16.msra.mxu0 %v2924_v44  ;;  %v2884_v1 = vor.u32 %v3118_v53, %v2883_v37  ;;  %v3024_v44 = vor.u32 %v3233_v60, %v3023_v4  ;;  %v3016_v30 = vor.u32 %v3231_v58, %v3015_v47 }
0x10a5   :  { %2046 = vmatpush.bf16.msrb.mxu2 %v3024_v44 }
0x10a6   :  { %1898 = vmatpush.bf16.msrb.mxu3 %v2908_v49 }
0x10a7   :  { %1921 = vmatpush.bf16.msra.mxu0 %v2912_v28 }
0x10a9   :  { %v4659_v34 = vpop.eup %3310  ;;  %2047 = vmatpush.bf16.msrb.mxu2 %v3016_v30 }
0x10aa   :  { %1680 = vadd.xlane.f32.xlu1 %v4659_v34  ;;  %1899 = vmatpush.bf16.msrb.mxu3 %v2896_v12 }
0x10ab   :  { %1922 = vmatpush.bf16.msra.mxu0 %v2900_v11 }
0x10ae   :  { %v1660_v7 = vpop.xlane.xlu1 %1659  ;;  %1900 = vmatpush.bf16.msrb.mxu3 %v2884_v1 }
0x10af   :  { %v1666_v33 = vsub.f32 %v1647_v17, %v1660_v7  ;;  %v2916_v17 = vor.u32 %v3125_v27, %v2915_v40  ;;  %v3119_v7 = vld [vmem:[%s5176_s3 + $0x28] sm:$0xf0]  ;;  %v3007_v40 = vld [vmem:[%s5177_s11 + $0x50] sm:$0xf]  ;;  %v3229_v27 = vld [vmem:[%s5177_s11 + $0x54] sm:$0xf0] }
0x10b0   :  { %v3008_v9 = vor.u32 %v3229_v27, %v3007_v40 }
0x10b1   :  { %v1674_v48 = vmul.f32 1.442695, %v1666_v33  ;;  %1944 = vmatpush.bf16.msrb.mxu1 %v2916_v17  ;;  %v2888_v33 = vor.u32 %v3117_v2, %v2885_v55 }
0x10b2   :  { %2048 = vmatpush.bf16.msrb.mxu2 %v3008_v9  ;;  %v3087_v9 = vld [vmem:[%s5178_s10 + $0x70] sm:$0xf] }
0x10b3   :  { %3312 = vpow2.f32 %v1674_v48  ;;  %v2892_v48 = vor.u32 %v3119_v7, %v2891_v63  ;;  %1923 = vmatpush.bf16.msra.mxu0 %v2888_v33  ;;  %v2991_v63 = vld [vmem:[%s5177_s11 + $0x30] sm:$0xf]  ;;  %v2983_v33 = vld [vmem:[%s5177_s11 + $0x20] sm:$0xf] }
0x10b5   :  { %1945 = vmatpush.bf16.msrb.mxu1 %v2904_v20  ;;  %v3000_v20 = vor.u32 %v3227_v62, %v2999_v10  ;;  %v3089_v10 = vld [vmem:[%s5178_s10 + $0x78] sm:$0xf0] }
0x10b7   :  { %v1623_v16 = vpop.f32.mrf.mxu1  ;;  %1924 = vmatpush.bf16.msra.mxu0 %v2876_v54  ;;  %2049 = vmatpush.bf16.msrb.mxu2 %v3000_v20  ;;  %v3230_v20 = vld [vmem:[%s5177_s11 + $0x64] sm:$0xf] }
0x10b8   :  { %v1629_v38 = vpack.c.bf16 %v1623_v16, %v1623_v16  ;;  %v4773_v16 = vpop.xlane.xlu0 %1657 }
0x10b9   :  { %v4662_v0 = vpop.eup %3312  ;;  %1946 = vmatpush.bf16.msrb.mxu1 %v2892_v48  ;;  %v3223_v48 = vld [vmem:[%s5177_s11 + $0x24] sm:$0xf0] }
0x10ba   :  { %1684 = vadd.xlane.f32.xlu0 %v4662_v0  ;;  %1648 = vmatmul.bf16.gmra.mxu2 %v1629_v38  ;;  %v2871_v38 = vld [vmem:[%s5176_s3] sm:$0xf] }
0x10bd   :  { %1947 = vmatpush.bf16.msrb.mxu1 %v2880_v42 }
0x10bf   :  { %v1625_v23 = vpop.f32.mrf.mxu1 }
0x10c0   :  { %v3115_v23 = vld [vmem:[%s5176_s3 + $0x8] sm:$0xf0] }
0x10c1   :  { %v2872_v29 = vor.u32 %v3115_v23, %v2871_v38  ;;  %v2975_v38 = vld [vmem:[%s5177_s11 + $0x10] sm:$0xf]  ;;  %v3221_v23 = vld [vmem:[%s5177_s11 + $0x14] sm:$0xf0] }
0x10c2   :  { %v2976_v5 = vor.u32 %v3221_v23, %v2975_v38  ;;  %v3212_v38 = vld [vmem:[%s5178_s10 + $0x54] sm:$0xf]  ;;  %v3073_v23 = vld [vmem:[%s5178_s10 + $0x58] sm:$0xf0] }
0x10c3   :  { %1901 = vmatpush.bf16.msrb.mxu3 %v2872_v29  ;;  %v2967_v29 = vld [vmem:[%s5177_s11] sm:$0xf] }
0x10c4   :  { %v2968_v61 = vor.u32 %v3219_v19, %v2967_v29  ;;  %v3076_v29 = vor.u32 %v3212_v38, %v3073_v23  ;;  %v3226_v19 = vld [vmem:[%s5177_s11 + $0x44] sm:$0xf] }
0x1115   :  { %v1679_v15 = vpop.xlane.xlu0 %1678 }
0x1116   :  { %3314 = vrcp.f32 %v1679_v15  ;;  %v1697_v36 = vand.u32 2147483647, %v1679_v15  ;;  %v1699_v25 = vand.u32 2147483648, %v1679_v15  ;;  %vm1693_vm9 = vweird.f32 %v1679_v15 }
0x1118   :  { %v1700_v56 = vor.u32 1.1754944e-38, %v1699_v25  ;;  %vm1698_vm13 = vcmp.eq.f32.partialorder %v1697_v36, 8.507059e+37 }
0x111c   :  { %v3315_v26 = vpop.eup %3314 }
0x111d   :  { %v1689_v52 = vmul.f32 %v3315_v26, %v1679_v15  ;;  %v1681_v21 = vpop.xlane.xlu1 %1680  ;;  %vm1694_vm8 = vweird.f32 %v3315_v26 }
0x111e   :  { %3316 = vrcp.f32 %v1681_v21  ;;  %vm4802_vm10 = vmor %vm1693_vm9, %vm1694_vm8  ;;  %v1714_v32 = vand.u32 2147483648, %v1681_v21  ;;  %v1712_v22 = vand.u32 2147483647, %v1681_v21  ;;  %vm1708_vm12 = vweird.f32 %v1681_v21 }
0x111f   :  { %v1690_v51 = vsub.f32 1.0, %v1689_v52 }
0x1120   :  { %v1715_v17 = vor.u32 1.1754944e-38, %v1714_v32  ;;  %vm1713_vm15 = vcmp.eq.f32.partialorder %v1712_v22, 8.507059e+37 }
0x1121   :  { %v1691_v46 = vmul.f32 %v3315_v26, %v1690_v51 }
0x1123   :  { %v1692_v45 = vadd.f32 %v3315_v26, %v1691_v46 }
0x1124   :  { %v3317_v59 = vpop.eup %3316 }
0x1125   :  { %v1704_v39 = vmul.f32 %v3317_v59, %v1681_v21  ;;  %vm1709_vm11 = vweird.f32 %v3317_v59  ;;  %v1696_v24 = vsel %vm4802_vm10, %v3315_v26, %v1692_v45 }
0x1126   :  { %vm1710_vm14 = vmor %vm1708_vm12, %vm1709_vm11  ;;  %v1701_v14 = vsel %vm1698_vm13, %v1700_v56, %v1696_v24 }
0x1127   :  { %v1705_v41 = vsub.f32 1.0, %v1704_v39  ;;  %v1702_v12 = vmul.f32 %v4656_v8, %v1701_v14  ;;  %v1665_v8 = vsub.f32 %v4628_v6, %v4773_v16  ;;  %v3225_v6 = vld [vmem:[%s5177_s11 + $0x34] sm:$0xf0]  ;;  %v2984_v16 = vor.u32 %v3223_v48, %v2983_v33  ;;  %v3232_v14 = vld [vmem:[%s5177_s11 + $0x74] sm:$0xf] }
0x1128   :  { %v2992_v7 = vor.u32 %v3225_v6, %v2991_v63  ;;  %v3228_v6 = vld [vmem:[%s5177_s11 + $0x54] sm:$0xf]  ;;  %v3071_v33 = vld [vmem:[%s5178_s10 + $0x50] sm:$0xf] }
0x1129   :  { %v1706_v50 = vmul.f32 %v3317_v59, %v1705_v41  ;;  %v1672_v37 = vmul.f32 1.442695, %v1665_v8  ;;  %v3017_v8 = vld [vmem:[%s5177_s11 + $0x68] sm:$0xf0] }
0x112a   :  { %2050 = vmatpush.bf16.msrb.mxu2 %v2992_v7  ;;  %v3009_v7 = vld [vmem:[%s5177_s11 + $0x58] sm:$0xf0] }
0x112b   :  { %v1707_v49 = vadd.f32 %v3317_v59, %v1706_v50  ;;  %3318 = vpow2.f32 %v1672_v37  ;;  %v3020_v37 = vor.u32 %v3230_v20, %v3017_v8  ;;  %v3012_v48 = vor.u32 %v3228_v6, %v3009_v7  ;;  %v3203_v20 = vld [vmem:[%s5178_s10 + $0x4] sm:$0xf0]  ;;  %v3202_v8 = vld [vmem:[%s5178_s10 + $0x4] sm:$0xf] }
0x112d   :  { %v1711_v28 = vsel %vm1710_vm14, %v3317_v59, %v1707_v49  ;;  %v1685_v43 = vpop.xlane.xlu0 %1684 }
0x112e   :  { %v1716_v18 = vsel %vm1713_vm15, %v1715_v17, %v1711_v28  ;;  %2051 = vmatpush.bf16.msrb.mxu2 %v2984_v16  ;;  %3320 = vrcp.f32 %v1685_v43  ;;  %v1744_v60 = vand.u32 2147483648, %v1685_v43  ;;  %vm1738_vm1 = vweird.f32 %v1685_v43  ;;  %v3213_v16 = vld [vmem:[%s5178_s10 + $0x54] sm:$0xf0] }
0x112f   :  { %v1717_v57 = vmul.f32 %v4659_v34, %v1716_v18  ;;  %v114_v34 = vld [vmem:[%s5175_s5 + $0x20] sm:$0xff]  ;;  %v1742_v47 = vand.u32 2147483647, %v1685_v43  ;;  %v3025_v18 = vld [vmem:[%s5177_s11 + $0x78] sm:$0xf0] }
0x1130   :  { %v1745_v24 = vor.u32 1.1754944e-38, %v1744_v60 }
0x1131   :  { %v1763_v11 = vpack.c.bf16 %v1717_v57, %v1702_v12  ;;  %v3319_v55 = vpop.eup %3318  ;;  %vm1743_vm4 = vcmp.eq.f32.partialorder %v1742_v47, 8.507059e+37  ;;  %v3028_v12 = vor.u32 %v3232_v14, %v3025_v18  ;;  %v3216_v57 = vld [vmem:[%s5178_s10 + $0x74] sm:$0xf]  ;;  %v3041_v18 = vld [vmem:[%s5178_s10 + $0x18] sm:$0xf0] }
0x1132   :  { %2052 = vmatpush.bf16.msrb.mxu2 %v2976_v5  ;;  %v3072_v5 = vor.u32 %v3213_v16, %v3071_v33  ;;  %v3204_v14 = vld [vmem:[%s5178_s10 + $0x14] sm:$0xf] }
0x1133   :  { %1902 = vmatmul.bf16.vlgmr.msrb.gmra.mxu3 %v1763_v11  ;;  %1925 = vmatmul.bf16.vlgmr.msra.gmra.mxu0 %v1763_v11 }
0x1134   :  { %1948 = vmatmul.bf16.vlgmr.msrb.gmra.mxu1 %v1763_v11  ;;  %v3321_v42 = vpop.eup %3320  ;;  %v3092_v11 = vor.u32 %v3216_v57, %v3089_v10  ;;  %2069 = vmatpush.bf16.msra.mxu3 %v3028_v12  ;;  %v3044_v12 = vor.u32 %v3204_v14, %v3041_v18  ;;  %v3218_v57 = vld [vmem:[%s5177_s11 + $0x4] sm:$0xf]  ;;  %v2969_v10 = vld [vmem:[%s5177_s11 + $0x8] sm:$0xf0] }
0x1135   :  { %v1734_v52 = vmul.f32 %v3321_v42, %v1685_v43  ;;  %vm1739_vm0 = vweird.f32 %v3321_v42  ;;  %v3063_v43 = vld [vmem:[%s5178_s10 + $0x40] sm:$0xf] }
0x1136   :  { %2053 = vmatpush.bf16.msrb.mxu2 %v2968_v61  ;;  %vm1740_vm2 = vmor %vm1738_vm1, %vm1739_vm0  ;;  %2195 = vmatpush.bf16.msra.mxu1 %v3092_v11  ;;  %v3001_v61 = vld [vmem:[%s5177_s11 + $0x48] sm:$0xf0]  ;;  %v2972_v11 = vor.u32 %v3218_v57, %v2969_v10 }
0x1137   :  { %v1735_v51 = vsub.f32 1.0, %v1734_v52 }
0x1138   :  { %2070 = vmatpush.bf16.msra.mxu3 %v3020_v37  ;;  %v3033_v37 = vld [vmem:[%s5178_s10 + $0x8] sm:$0xf0] }
0x1139   :  { %v1736_v39 = vmul.f32 %v3321_v42, %v1735_v51  ;;  %v3224_v51 = vld [vmem:[%s5177_s11 + $0x34] sm:$0xf] }
0x113b   :  { %v1737_v41 = vadd.f32 %v3321_v42, %v1736_v39  ;;  %v3055_v39 = vld [vmem:[%s5178_s10 + $0x30] sm:$0xf] }
0x113c   :  { %2071 = vmatpush.bf16.msra.mxu3 %v3012_v48 }
0x113d   :  { %v1649_v53 = vpop.f32.mrf.mxu2  ;;  %v1741_v58 = vsel %vm1740_vm2, %v3321_v42, %v1737_v41  ;;  %v3211_v42 = vld [vmem:[%s5178_s10 + $0x44] sm:$0xf0]  ;;  %v3208_v41 = vld [vmem:[%s5178_s10 + $0x34] sm:$0xf] }
0x113e   :  { %v1650_v2 = vadd.f32 %v1649_v53, %v114_v34  ;;  %v1746_v49 = vsel %vm1743_vm4, %v1745_v24, %v1741_v58  ;;  %v3079_v34 = vld [vmem:[%s5178_s10 + $0x60] sm:$0xf]  ;;  %v3215_v53 = vld [vmem:[%s5178_s10 + $0x64] sm:$0xf0]  ;;  %v3064_v52 = vor.u32 %v3211_v42, %v3063_v43  ;;  %v3206_v24 = vld [vmem:[%s5178_s10 + $0x24] sm:$0xf] }
0x113f   :  { %v1747_v28 = vmul.f32 %v4662_v0, %v1746_v49  ;;  %v3217_v0 = vld [vmem:[%s5178_s10 + $0x74] sm:$0xf0]  ;;  %v3207_v58 = vld [vmem:[%s5178_s10 + $0x24] sm:$0xf0] }
0x1140   :  { %1661 = vmax.xlane.f32.xlu2 %v1650_v2  ;;  %v3088_v62 = vor.u32 %v3217_v0, %v3087_v9 }
0x1142   :  { %2172 = vmatpush.bf16.msrb.mxu0 %v3088_v62  ;;  %v3031_v62 = vld [vmem:[%s5178_s10] sm:$0xf] }
0x1145   :  { %v1651_v1 = vpop.f32.mrf.mxu2 }
0x1146   :  { %v3081_v1 = vld [vmem:[%s5178_s10 + $0x68] sm:$0xf0] }
0x1148   :  { %1682 = vadd.xlane.f32.xlu2 %v3319_v55 }
0x11b1   :  { %v5015_v43 = vpop.f32.mrf.mxu1 }
0x11b3   :  { %v1662_v54 = vpop.xlane.xlu2 %1661 }
0x11b4   :  { %v1667_v15 = vsub.f32 %v1650_v2, %v1662_v54  ;;  %v3214_v2 = vld [vmem:[%s5178_s10 + $0x64] sm:$0xf]  ;;  %v3004_v54 = vor.u32 %v3226_v19, %v3001_v61 }
0x11b5   :  { %v3084_v63 = vor.u32 %v3214_v2, %v3081_v1 }
0x11b6   :  { %v1676_v26 = vmul.f32 1.442695, %v1667_v15  ;;  %v1903_v21 = vpop.f32.mrf.mxu3  ;;  %v3210_v15 = vld [vmem:[%s5178_s10 + $0x44] sm:$0xf]  ;;  %2072 = vmatpush.bf16.msra.mxu3 %v3004_v54 }
0x11b7   :  { %2196 = vmatpush.bf16.msra.mxu1 %v3084_v63 }
0x11b8   :  { %3322 = vpow2.f32 %v1676_v26  ;;  %v3065_v26 = vld [vmem:[%s5178_s10 + $0x48] sm:$0xf0] }
0x11b9   :  { %v5019_v54 = vpop.f32.mrf.mxu1 }
0x11bb   :  { %v1683_v46 = vpop.xlane.xlu2 %1682  ;;  %2197 = vmatpush.bf16.msra.mxu1 %v3076_v29 }
0x11bc   :  { %3324 = vrcp.f32 %v1683_v46  ;;  %v1729_v50 = vand.u32 2147483648, %v1683_v46  ;;  %v1727_v44 = vand.u32 2147483647, %v1683_v46  ;;  %vm1723_vm5 = vweird.f32 %v1683_v46 }
0x11be   :  { %v4854_v59 = vpop.eup %3322  ;;  %v1905_v45 = vpop.f32.mrf.mxu3  ;;  %v1730_v56 = vor.u32 1.1754944e-38, %v1729_v50  ;;  %vm1728_vm7 = vcmp.eq.f32.partialorder %v1727_v44, 8.507059e+37  ;;  %v2985_v50 = vld [vmem:[%s5177_s11 + $0x28] sm:$0xf0] }
0x11bf   :  { %1686 = vadd.xlane.f32.xlu1 %v4854_v59  ;;  %v4857_v36 = vpack.c.bf16 %v1905_v45, %v1903_v21  ;;  %v3068_v21 = vor.u32 %v3210_v15, %v3065_v26 }
0x11c1   :  { %2054 = vmatmul.bf16.vlgmr.msrb.gmra.mxu2 %v4857_v36  ;;  %2198 = vmatpush.bf16.msra.mxu1 %v3068_v21 }
0x11c2   :  { %v3325_v25 = vpop.eup %3324 }
0x11c3   :  { %v1719_v4 = vmul.f32 %v3325_v25, %v1683_v46  ;;  %vm1724_vm3 = vweird.f32 %v3325_v25  ;;  %v2993_v46 = vld [vmem:[%s5177_s11 + $0x38] sm:$0xf0] }
0x11c4   :  { %vm1725_vm6 = vmor %vm1723_vm5, %vm1724_vm3  ;;  %v2996_v45 = vor.u32 %v3224_v51, %v2993_v46 }
0x11c5   :  { %v1720_v13 = vsub.f32 1.0, %v1719_v4  ;;  %v3057_v4 = vld [vmem:[%s5178_s10 + $0x38] sm:$0xf0] }
0x11c6   :  { %v3060_v47 = vor.u32 %v3208_v41, %v3057_v4  ;;  %2073 = vmatpush.bf16.msra.mxu3 %v2996_v45  ;;  %v228_v45 = vld [vmem:[%s5179_s12] sm:$0x3] }
0x11c7   :  { %v1721_v32 = vmul.f32 %v3325_v25, %v1720_v13  ;;  %v3222_v13 = vld [vmem:[%s5177_s11 + $0x24] sm:$0xf]  ;;  %v5036_v41 = vperm.slane %v228_v45, 0 }
0x11c8   :  { %2199 = vmatpush.bf16.msra.mxu1 %v3060_v47  ;;  %v2988_v44 = vor.u32 %v3222_v13, %v2985_v50 }
0x11c9   :  { %v1722_v22 = vadd.f32 %v3325_v25, %v1721_v32  ;;  %v3047_v32 = vld [vmem:[%s5178_s10 + $0x20] sm:$0xf] }
0x11ca   :  { %2074 = vmatpush.bf16.msra.mxu3 %v2988_v44 }
0x11cb   :  { %v1726_v30 = vsel %vm1725_vm6, %v3325_v25, %v1722_v22  ;;  %v3209_v25 = vld [vmem:[%s5178_s10 + $0x34] sm:$0xf0]  ;;  %v3049_v22 = vld [vmem:[%s5178_s10 + $0x28] sm:$0xf0] }
0x11cc   :  { %v1731_v40 = vsel %vm1728_vm7, %v1730_v56, %v1726_v30  ;;  %v3056_v60 = vor.u32 %v3209_v25, %v3055_v39  ;;  %v3048_v56 = vor.u32 %v3207_v58, %v3047_v32  ;;  %v3052_v49 = vor.u32 %v3206_v24, %v3049_v22  ;;  %v3220_v30 = vld [vmem:[%s5177_s11 + $0x14] sm:$0xf] }
0x11cd   :  { %v1732_v27 = vmul.f32 %v3319_v55, %v1731_v40  ;;  %v3080_v55 = vor.u32 %v3215_v53, %v3079_v34  ;;  %v2977_v40 = vld [vmem:[%s5177_s11 + $0x18] sm:$0xf0]  ;;  %v3032_v34 = vor.u32 %v3203_v20, %v3031_v62  ;;  %v3036_v53 = vor.u32 %v3202_v8, %v3033_v37 }
0x11ce   :  { %2200 = vmatpush.bf16.msra.mxu1 %v3052_v49 }
0x11cf   :  { %v1764_v17 = vpack.c.bf16 %v1747_v28, %v1732_v27  ;;  %2173 = vmatpush.bf16.msrb.mxu0 %v3080_v55  ;;  %v3039_v27 = vld [vmem:[%s5178_s10 + $0x10] sm:$0xf]  ;;  %v2980_v28 = vor.u32 %v3220_v30, %v2977_v40 }
0x11d1   :  { %1907 = vmatmul.bf16.gmra.mxu3 %v1764_v17  ;;  %1930 = vmatmul.bf16.gmra.mxu0 %v1764_v17 }
0x11d2   :  { %1953 = vmatmul.bf16.gmra.mxu1 %v1764_v17  ;;  %v3205_v17 = vld [vmem:[%s5178_s10 + $0x14] sm:$0xf0]  ;;  %2075 = vmatpush.bf16.msra.mxu3 %v2980_v28 }
0x11d3   :  { %2174 = vmatpush.bf16.msrb.mxu0 %v3072_v5  ;;  %v3040_v9 = vor.u32 %v3205_v17, %v3039_v27  ;;  %2201 = vmatpush.bf16.msra.mxu1 %v3044_v12 }
0x11d6   :  { %2076 = vmatpush.bf16.msra.mxu3 %v2972_v11 }
0x11d7   :  { %2175 = vmatpush.bf16.msrb.mxu0 %v3064_v52  ;;  %2202 = vmatpush.bf16.msra.mxu1 %v3036_v53 }
0x11db   :  { %2176 = vmatpush.bf16.msrb.mxu0 %v3056_v60 }
0x11df   :  { %2177 = vmatpush.bf16.msrb.mxu0 %v3048_v56  ;;  %v5042_v56 = vperm.slane %v228_v45, 1 }
0x11e3   :  { %2178 = vmatpush.bf16.msrb.mxu0 %v3040_v9 }
0x11e7   :  { %2179 = vmatpush.bf16.msrb.mxu0 %v3032_v34 }
0x1232   :  { %v1687_v0 = vpop.xlane.xlu1 %1686 }
0x1233   :  { %3326 = vrcp.f32 %v1687_v0  ;;  %v1759_v63 = vand.u32 2147483648, %v1687_v0  ;;  %v1757_v7 = vand.u32 2147483647, %v1687_v0  ;;  %vm1753_vm9 = vweird.f32 %v1687_v0 }
0x1235   :  { %v1760_v48 = vor.u32 1.1754944e-38, %v1759_v63  ;;  %vm1758_vm11 = vcmp.eq.f32.partialorder %v1757_v7, 8.507059e+37 }
0x1239   :  { %v3327_v2 = vpop.eup %3326 }
0x123a   :  { %v1749_v1 = vmul.f32 %v3327_v2, %v1687_v0  ;;  %vm1754_vm8 = vweird.f32 %v3327_v2 }
0x123b   :  { %vm1755_vm10 = vmor %vm1753_vm9, %vm1754_vm8 }
0x123c   :  { %v1750_v55 = vsub.f32 1.0, %v1749_v1 }
0x123e   :  { %v1751_v6 = vmul.f32 %v3327_v2, %v1750_v55 }
0x1240   :  { %v1752_v33 = vadd.f32 %v3327_v2, %v1751_v6 }
0x1242   :  { %v1756_v16 = vsel %vm1755_vm10, %v3327_v2, %v1752_v33 }
0x1243   :  { %v1761_v38 = vsel %vm1758_vm11, %v1760_v48, %v1756_v16 }
0x1244   :  { %v1762_v23 = vmul.f32 %v4854_v59, %v1761_v38  ;;  %v5013_v59 = vpop.f32.mrf.mxu0  ;;  %v2055_v39 = vpop.f32.mrf.mxu2 }
0x1246   :  { %v1765_v5 = vpack.c.bf16 %v1762_v23, %v1762_v23 }
0x1248   :  { %1912 = vmatmul.bf16.gmra.mxu3 %v1765_v5  ;;  %1935 = vmatmul.bf16.gmra.mxu0 %v1765_v5 }
0x1249   :  { %1958 = vmatmul.bf16.gmra.mxu1 %v1765_v5 }
0x124c   :  { %v2057_v50 = vpop.f32.mrf.mxu2 }
0x124f   :  { %v5023_v42 = vpop.f32.mrf.mxu1 }
0x1254   :  { %v1908_v29 = vpop.f32.mrf.mxu3 }
0x1257   :  { %v5027_v26 = vpop.f32.mrf.mxu1 }
0x1258   :  { %2077 = vmatmul.bf16.vlgmr.msra.gmra.mxu3 %v4857_v36  ;;  %2180 = vmatmul.bf16.vlgmr.msrb.gmra.mxu0 %v4596_v35  ;;  %v5017_v36 = vpop.f32.mrf.mxu0 }
0x1259   :  { %2203 = vmatmul.bf16.vlgmr.msra.gmra.mxu1 %v4596_v35 }
0x125c   :  { %v1910_v19 = vpop.f32.mrf.mxu3 }
0x125d   :  { %v1964_v61 = vpack.c.bf16 %v1910_v19, %v1908_v29 }
0x125f   :  { %2059 = vmatmul.bf16.gmra.mxu2 %v1964_v61 }
0x1260   :  { %v5021_v35 = vpop.f32.mrf.mxu0 }
0x1268   :  { %2082 = vmatmul.bf16.gmra.mxu3 %v1964_v61  ;;  %2185 = vmatmul.bf16.gmra.mxu0 %v4601_v3  ;;  %v5025_v15 = vpop.f32.mrf.mxu0 }
0x1269   :  { %2208 = vmatmul.bf16.gmra.mxu1 %v4601_v3 }
0x1278   :  { %2190 = vmatmul.bf16.gmra.mxu0 %v4635_v31 }
0x1279   :  { %2213 = vmatmul.bf16.gmra.mxu1 %v4635_v31 }
0x12c5   :  { %v5029_v3 = vpop.f32.mrf.mxu0 }
0x12c6   :  { %v5031_v52 = vpop.f32.mrf.mxu1 }
0x12cb   :  { %v1913_v31 = vpop.f32.mrf.mxu3 }
0x12cc   :  { %v1965_v21 = vpack.c.bf16 %v1913_v31, %v1913_v31 }
0x12cd   :  { %v1938_v51 = vpop.f32.mrf.mxu0 }
0x12ce   :  { %v1961_v46 = vpop.f32.mrf.mxu1  ;;  %2064 = vmatmul.bf16.gmra.mxu2 %v1965_v21  ;;  %2087 = vmatmul.bf16.gmra.mxu3 %v1965_v21 }
0x12d3   :  { %v1915_v25 = vpop.f32.mrf.mxu3 }
0x12d5   :  { %v2181_v4 = vpop.f32.mrf.mxu0 }
0x12d6   :  { %v2182_v60 = vadd.f32 %v2181_v4, %v2055_v39  ;;  %v2204_v47 = vpop.f32.mrf.mxu1 }
0x12d8   :  { %v5039_v13 = vadd.f32 %v5036_v41, %v2182_v60 }
0x12da   :  { %2233 = vmax.xlane.f32.xlu2 %v5039_v13 }
0x12db   :  { %v2078_v32 = vpop.f32.mrf.mxu3 }
0x12dc   :  { %v2205_v22 = vadd.f32 %v2204_v47, %v2078_v32 }
0x12dd   :  { %v2183_v44 = vpop.f32.mrf.mxu0 }
0x12de   :  { %v2184_v58 = vadd.f32 %v2183_v44, %v2057_v50  ;;  %v2206_v24 = vpop.f32.mrf.mxu1  ;;  %v2224_v27 = vadd.f32 %v5042_v56, %v2205_v22 }
0x12e0   :  { %v5045_v49 = vadd.f32 %v5036_v41, %v2184_v58  ;;  %v3093_v12 = vmul.f32 -1.442695, %v2224_v27 }
0x12e2   :  { %2235 = vmax.xlane.f32.xlu0 %v5045_v49  ;;  %v2060_v30 = vpop.f32.mrf.mxu2 }
0x12e3   :  { %v2080_v40 = vpop.f32.mrf.mxu3 }
0x12e4   :  { %v2207_v28 = vadd.f32 %v2206_v24, %v2080_v40 }
0x12e5   :  { %v2186_v17 = vpop.f32.mrf.mxu0 }
0x12e6   :  { %v2226_v14 = vadd.f32 %v5042_v56, %v2207_v28  ;;  %v2187_v18 = vadd.f32 %v2186_v17, %v2060_v30  ;;  %v2209_v9 = vpop.f32.mrf.mxu1 }
0x12e8   :  { %v3094_v0 = vmul.f32 -1.442695, %v2226_v14  ;;  %v5051_v57 = vadd.f32 %v5036_v41, %v2187_v18 }
0x12ea   :  { %3328 = vpow2.f32 %v3094_v0  ;;  %2237 = vmax.xlane.f32.xlu1 %v5051_v57  ;;  %v2062_v11 = vpop.f32.mrf.mxu2 }
0x12eb   :  { %v2083_v10 = vpop.f32.mrf.mxu3  ;;  %3330 = vpow2.f32 %v3093_v12 }
0x12ec   :  { %v2210_v62 = vadd.f32 %v2209_v9, %v2083_v10 }
0x12ed   :  { %v2188_v20 = vpop.f32.mrf.mxu0 }
0x12ee   :  { %v2228_v8 = vadd.f32 %v5042_v56, %v2210_v62  ;;  %v2189_v34 = vadd.f32 %v2188_v20, %v2062_v11  ;;  %v2211_v37 = vpop.f32.mrf.mxu1 }
0x12f0   :  { %v3329_v53 = vpop.eup %3328  ;;  %v3095_v2 = vmul.f32 -1.442695, %v2228_v8  ;;  %v5056_v1 = vadd.f32 %v5036_v41, %v2189_v34 }
0x12f1   :  { %v2359_v55 = vadd.f32 1.0, %v3329_v53  ;;  %v3331_v63 = vpop.eup %3330 }
0x12f2   :  { %3332 = vpow2.f32 %v3095_v2  ;;  %2239 = vmax.xlane.f32.xlu2 %v5056_v1  ;;  %v5059_v33 = vadd.f32 1.0, %v3331_v63 }
0x12f3   :  { %3334 = vrcp.f32 %v2359_v55  ;;  %v2085_v6 = vpop.f32.mrf.mxu3  ;;  %v2389_v51 = vand.u32 2147483648, %v2359_v55  ;;  %v2387_v45 = vand.u32 2147483647, %v2359_v55  ;;  %vm2383_vm13 = vweird.f32 %v2359_v55 }
0x12f4   :  { %v2212_v7 = vadd.f32 %v2211_v37, %v2085_v6  ;;  %3336 = vrcp.f32 %v5059_v33  ;;  %v2374_v63 = vand.u32 2147483648, %v5059_v33  ;;  %vm2368_vm9 = vweird.f32 %v5059_v33 }
0x12f5   :  { %v5061_v48 = vpop.f32.mrf.mxu0  ;;  %v2390_v32 = vor.u32 1.1754944e-38, %v2389_v51  ;;  %vm2388_vm15 = vcmp.eq.f32.partialorder %v2387_v45, 8.507059e+37 }
0x12f6   :  { %v2230_v16 = vadd.f32 %v5042_v56, %v2212_v7  ;;  %v5064_v38 = vpop.f32.mrf.mxu1  ;;  %v2372_v7 = vand.u32 2147483647, %v5059_v33 }
0x12f8   :  { %v3333_v23 = vpop.eup %3332  ;;  %v3096_v5 = vmul.f32 -1.442695, %v2230_v16  ;;  %vm2373_vm11 = vcmp.eq.f32.partialorder %v2372_v7, 8.507059e+37 }
0x12f9   :  { %v3335_v29 = vpop.eup %3334  ;;  %v2360_v19 = vadd.f32 1.0, %v3333_v23 }
0x12fa   :  { %3338 = vpow2.f32 %v3096_v5  ;;  %v2379_v61 = vmul.f32 %v3335_v29, %v2359_v55  ;;  %vm2384_vm12 = vweird.f32 %v3335_v29  ;;  %v3337_v25 = vpop.eup %3336  ;;  %v2375_v5 = vor.u32 1.1754944e-38, %v2374_v63 }
0x12fb   :  { %3340 = vrcp.f32 %v2360_v19  ;;  %vm2385_vm14 = vmor %vm2383_vm13, %vm2384_vm12  ;;  %v2364_v30 = vmul.f32 %v3337_v25, %v5059_v33  ;;  %v2404_v40 = vand.u32 2147483648, %v2360_v19  ;;  %v2402_v28 = vand.u32 2147483647, %v2360_v19 }
0x12fc   :  { %v2380_v31 = vsub.f32 1.0, %v2379_v61  ;;  %vm2398_vm1 = vweird.f32 %v2360_v19  ;;  %vm2369_vm6 = vweird.f32 %v3337_v25 }
0x12fd   :  { %v2193_v21 = vpop.f32.mrf.mxu0  ;;  %v2365_v14 = vsub.f32 1.0, %v2364_v30  ;;  %v2405_v9 = vor.u32 1.1754944e-38, %v2404_v40  ;;  %vm2403_vm3 = vcmp.eq.f32.partialorder %v2402_v28, 8.507059e+37  ;;  %vm2370_vm10 = vmor %vm2368_vm9, %vm2369_vm6 }
0x12fe   :  { %v2216_v46 = vpop.f32.mrf.mxu1  ;;  %v2381_v39 = vmul.f32 %v3335_v29, %v2380_v31 }
0x12ff   :  { %v2366_v20 = vmul.f32 %v3337_v25, %v2365_v14 }
0x1300   :  { %v3339_v4 = vpop.eup %3338  ;;  %v2382_v60 = vadd.f32 %v3335_v29, %v2381_v39 }
0x1301   :  { %v3341_v47 = vpop.eup %3340  ;;  %v2361_v50 = vadd.f32 1.0, %v3339_v4  ;;  %v2367_v2 = vadd.f32 %v3337_v25, %v2366_v20 }
0x1302   :  { %v2386_v44 = vsel %vm2385_vm14, %v3335_v29, %v2382_v60  ;;  %v2394_v58 = vmul.f32 %v3341_v47, %v2360_v19  ;;  %vm2399_vm0 = vweird.f32 %v3341_v47 }
0x1303   :  { %3342 = vrcp.f32 %v2361_v50  ;;  %v2391_v24 = vsel %vm2388_vm15, %v2390_v32, %v2386_v44  ;;  %vm2400_vm2 = vmor %vm2398_vm1, %vm2399_vm0  ;;  %v2419_v8 = vand.u32 2147483648, %v2361_v50  ;;  %v2417_v37 = vand.u32 2147483647, %v2361_v50 }
0x1304   :  { %2445 = vperm.xlu1 %3236, %v2391_v24   ;;  %v2395_v22 = vsub.f32 1.0, %v2394_v58  ;;  %v2469_v12 = vsub.f32 1.0, %v2391_v24  ;;  %vm2413_vm5 = vweird.f32 %v2361_v50  ;;  %v2371_v23 = vsel %vm2370_vm10, %v3337_v25, %v2367_v2 }
0x1305   :  { %v2420_v55 = vor.u32 1.1754944e-38, %v2419_v8  ;;  %vm2418_vm8 = vcmp.eq.f32.partialorder %v2417_v37, 8.507059e+37  ;;  %v2376_v29 = vsel %vm2373_vm11, %v2375_v5, %v2371_v23 }
0x1306   :  { %v2396_v27 = vmul.f32 %v3341_v47, %v2395_v22  ;;  %v2468_v19 = vsub.f32 1.0, %v2376_v29 }
0x1308   :  { %v2397_v17 = vadd.f32 %v3341_v47, %v2396_v27 }
0x1309   :  { %v3343_v18 = vpop.eup %3342 }
0x130a   :  { %v2401_v0 = vsel %vm2400_vm2, %v3341_v47, %v2397_v17  ;;  %v2409_v10 = vmul.f32 %v3343_v18, %v2361_v50  ;;  %vm2414_vm4 = vweird.f32 %v3343_v18 }
0x130b   :  { %v5068_v62 = vsel %vm2403_vm3, %v2405_v9, %v2401_v0  ;;  %vm2415_vm7 = vmor %vm2413_vm5, %vm2414_vm4 }
0x130c   :  { %2450 = vperm.xlu2 %3237, %v5068_v62   ;;  %2480 = vperm.xlu1 %3236, %v2469_v12   ;;  %v2410_v11 = vsub.f32 1.0, %v2409_v10 }
0x130e   :  { %v2411_v34 = vmul.f32 %v3343_v18, %v2410_v11 }
0x1310   :  { %v2412_v53 = vadd.f32 %v3343_v18, %v2411_v34 }
0x1312   :  { %v2416_v6 = vsel %vm2415_vm7, %v3343_v18, %v2412_v53 }
0x1313   :  { %v5074_v16 = vsel %vm2418_vm8, %v2420_v55, %v2416_v6  ;;  %v2470_v55 = vsub.f32 1.0, %v5068_v62 }
0x1314   :  { %2455 = vperm.xlu2 %3237, %v5074_v16  }
0x131c   :  { %2475 = vperm.xlu2 %3237, %v2468_v19  }
0x134d   :  { %v2234_v61 = vpop.xlane.xlu2 %2233 }
0x134e   :  { %v2243_v31 = vsub.f32 %v5039_v13, %v2234_v61 }
0x1350   :  { %v2248_v21 = vmul.f32 1.442695, %v2243_v31 }
0x1351   :  { %v2065_v51 = vpop.f32.mrf.mxu2  ;;  %v2088_v46 = vpop.f32.mrf.mxu3 }
0x1352   :  { %3344 = vpow2.f32 %v2248_v21  ;;  %v2192_v33 = vadd.f32 %v5061_v48, %v2065_v51  ;;  %v2215_v39 = vadd.f32 %v5064_v38, %v2088_v46 }
0x1354   :  { %v2231_v45 = vadd.f32 %v5036_v41, %v2192_v33  ;;  %v2232_v47 = vadd.f32 %v5042_v56, %v2215_v39 }
0x1355   :  { %v2236_v4 = vpop.xlane.xlu0 %2235 }
0x1356   :  { %v2244_v25 = vsub.f32 %v5045_v49, %v2236_v4  ;;  %2241 = vmax.xlane.f32.xlu0 %v2231_v45  ;;  %v3097_v44 = vmul.f32 -1.442695, %v2232_v47 }
0x1358   :  { %v5082_v60 = vpop.eup %3344  ;;  %v2250_v50 = vmul.f32 1.442695, %v2244_v25 }
0x1359   :  { %v2067_v13 = vpop.f32.mrf.mxu2  ;;  %v2090_v32 = vpop.f32.mrf.mxu3  ;;  %2258 = vadd.xlane.f32.xlu1 %v5082_v60 }
0x135a   :  { %3346 = vpow2.f32 %v2250_v50 }
0x135b   :  { %3348 = vpow2.f32 %v3097_v44 }
0x135d   :  { %v2238_v22 = vpop.xlane.xlu1 %2237 }
0x1360   :  { %v5086_v48 = vpop.eup %3346 }
0x1361   :  { %2260 = vadd.xlane.f32.xlu2 %v5086_v48  ;;  %v3349_v38 = vpop.eup %3348 }
0x1362   :  { %v2362_v24 = vadd.f32 1.0, %v3349_v38 }
0x1364   :  { %v2434_v11 = vand.u32 2147483648, %v2362_v24  ;;  %vm2428_vm13 = vweird.f32 %v2362_v24  ;;  %v2432_v20 = vand.u32 2147483647, %v2362_v24 }
0x1365   :  { %v2240_v41 = vpop.xlane.xlu2 %2239 }
0x1366   :  { %v2246_v49 = vsub.f32 %v5056_v1, %v2240_v41  ;;  %v2435_v34 = vor.u32 1.1754944e-38, %v2434_v11  ;;  %vm2433_vm15 = vcmp.eq.f32.partialorder %v2432_v20, 8.507059e+37 }
0x1368   :  { %v2254_v58 = vmul.f32 1.442695, %v2246_v49 }
0x136a   :  { %3350 = vpow2.f32 %v2254_v58  ;;  %2440 = vperm.xlu0 %3235, %v2376_v29  }
0x136b   :  { %3352 = vrcp.f32 %v2362_v24 }
0x136d   :  { %v5090_v56 = vpop.permute.xlu2 %2450 }
0x1370   :  { %v5092_v30 = vpop.eup %3350 }
0x1371   :  { %2264 = vadd.xlane.f32.xlu1 %v5092_v30  ;;  %v3353_v40 = vpop.eup %3352 }
0x1372   :  { %v2424_v17 = vmul.f32 %v3353_v40, %v2362_v24  ;;  %vm2429_vm12 = vweird.f32 %v3353_v40 }
0x1373   :  { %vm2430_vm14 = vmor %vm2428_vm13, %vm2429_vm12 }
0x1374   :  { %v2425_v14 = vsub.f32 1.0, %v2424_v17 }
0x1375   :  { %v5095_v27 = vpop.permute.xlu2 %2455 }
0x1376   :  { %v5097_v28 = vpop.permute.xlu1 %2445  ;;  %v2426_v12 = vmul.f32 %v3353_v40, %v2425_v14 }
0x1378   :  { %v2427_v10 = vadd.f32 %v3353_v40, %v2426_v12 }
0x137a   :  { %v2431_v8 = vsel %vm2430_vm14, %v3353_v40, %v2427_v10 }
0x137b   :  { %v2436_v37 = vsel %vm2433_vm15, %v2435_v34, %v2431_v8 }
0x137c   :  { %v2472_v53 = vsub.f32 1.0, %v2436_v37 }
0x137d   :  { %v2476_v1 = vpop.permute.xlu2 %2475 }
0x137e   :  { %v2508_v18 = vmul.f32 %v2476_v1, %v5015_v43  ;;  %v5100_v9 = vpop.permute.xlu1 %2480  ;;  %v2245_v43 = vsub.f32 %v5051_v57, %v2238_v22  ;;  %v2498_v50 = vmul.f32 %v2476_v1, %v5013_v59  ;;  %v2471_v1 = vsub.f32 1.0, %v5074_v16 }
0x137f   :  { %v2509_v0 = vmul.f32 %v5100_v9, %v5019_v54  ;;  %v2499_v40 = vmul.f32 %v5100_v9, %v5017_v36 }
0x1380   :  { %2514 = vst [vmem:[%s5180_s13 + $0x8] sm:$0xff] %v2508_v18  ;;  %v2252_v54 = vmul.f32 1.442695, %v2245_v43 }
0x1381   :  { %2516 = vst [vmem:[%s5180_s13 + $0x18] sm:$0xff] %v2509_v0 }
0x1382   :  { %3354 = vpow2.f32 %v2252_v54 }
0x1388   :  { %v5111_v2 = vpop.eup %3354 }
0x138a   :  { %2460 = vperm.xlu1 %3236, %v2436_v37  }
0x1392   :  { %2495 = vperm.xlu1 %3236, %v2472_v53  }
0x1394   :  { %2262 = vadd.xlane.f32.xlu0 %v5111_v2 }
0x13a8   :  { %2485 = vperm.xlu0 %3235, %v2470_v55  }
0x13c9   :  { %v2242_v63 = vpop.xlane.xlu0 %2241 }
0x13ca   :  { %v2247_v6 = vsub.f32 %v2231_v45, %v2242_v63 }
0x13cc   :  { %v2256_v57 = vmul.f32 1.442695, %v2247_v6  ;;  %v2259_v7 = vpop.xlane.xlu1 %2258 }
0x13cd   :  { %3356 = vrcp.f32 %v2259_v7  ;;  %v2279_v31 = vand.u32 2147483648, %v2259_v7  ;;  %v2277_v62 = vand.u32 2147483647, %v2259_v7  ;;  %vm2273_vm1 = vweird.f32 %v2259_v7 }
0x13ce   :  { %3358 = vpow2.f32 %v2256_v57 }
0x13cf   :  { %v2280_v33 = vor.u32 1.1754944e-38, %v2279_v31  ;;  %vm2278_vm3 = vcmp.eq.f32.partialorder %v2277_v62, 8.507059e+37 }
0x13d3   :  { %v3357_v23 = vpop.eup %3356 }
0x13d4   :  { %v5115_v5 = vpop.eup %3358  ;;  %v2269_v29 = vmul.f32 %v3357_v23, %v2259_v7  ;;  %v2261_v19 = vpop.xlane.xlu2 %2260  ;;  %vm2274_vm0 = vweird.f32 %v3357_v23 }
0x13d5   :  { %3360 = vrcp.f32 %v2261_v19  ;;  %2266 = vadd.xlane.f32.xlu2 %v5115_v5  ;;  %vm2275_vm2 = vmor %vm2273_vm1, %vm2274_vm0  ;;  %v2294_v13 = vand.u32 2147483648, %v2261_v19  ;;  %v2292_v41 = vand.u32 2147483647, %v2261_v19  ;;  %vm2288_vm5 = vweird.f32 %v2261_v19 }
0x13d6   :  { %v2270_v61 = vsub.f32 1.0, %v2269_v29 }
0x13d7   :  { %v2295_v24 = vor.u32 1.1754944e-38, %v2294_v13  ;;  %vm2293_vm7 = vcmp.eq.f32.partialorder %v2292_v41, 8.507059e+37 }
0x13d8   :  { %v2271_v21 = vmul.f32 %v3357_v23, %v2270_v61 }
0x13da   :  { %v2272_v51 = vadd.f32 %v3357_v23, %v2271_v21 }
0x13db   :  { %v3361_v46 = vpop.eup %3360 }
0x13dc   :  { %v2284_v39 = vmul.f32 %v3361_v46, %v2261_v19  ;;  %v2276_v45 = vsel %vm2275_vm2, %v3357_v23, %v2272_v51  ;;  %v2441_v32 = vpop.permute.xlu0 %2440  ;;  %vm2289_vm4 = vweird.f32 %v3361_v46 }
0x13dd   :  { %v2281_v4 = vsel %vm2278_vm3, %v2280_v33, %v2276_v45  ;;  %vm2290_vm6 = vmor %vm2288_vm5, %vm2289_vm4 }
0x13de   :  { %v2285_v25 = vsub.f32 1.0, %v2284_v39  ;;  %v2282_v47 = vmul.f32 %v5082_v60, %v2281_v4 }
0x13e0   :  { %v2286_v44 = vmul.f32 %v3361_v46, %v2285_v25  ;;  %v2463_v38 = vmul.f32 %v2441_v32, %v2282_v47 }
0x13e2   :  { %v2287_v49 = vadd.f32 %v3361_v46, %v2286_v44  ;;  %v2503_v58 = vadd.f32 %v2498_v50, %v2463_v38 }
0x13e4   :  { %v2291_v22 = vsel %vm2290_vm6, %v3361_v46, %v2287_v49  ;;  %2513 = vst [vmem:[%s5180_s13] sm:$0xff] %v2503_v58  ;;  %v2265_v18 = vpop.xlane.xlu1 %2264 }
0x13e5   :  { %v2296_v60 = vsel %vm2293_vm7, %v2295_v24, %v2291_v22  ;;  %vm2318_vm13 = vweird.f32 %v2265_v18 }
0x13e6   :  { %v2297_v59 = vmul.f32 %v5086_v48, %v2296_v60 }
0x13e8   :  { %v2464_v17 = vmul.f32 %v5097_v28, %v2297_v59 }
0x13ea   :  { %v2504_v14 = vadd.f32 %v2499_v40, %v2464_v17 }
0x13ec   :  { %2515 = vst [vmem:[%s5180_s13 + $0x10] sm:$0xff] %v2504_v14 }
0x13ed   :  { %2490 = vperm.xlu2 %3237, %v2471_v1  }
0x13fc   :  { %v5131_v12 = vpop.permute.xlu1 %2460 }
0x1404   :  { %v5133_v0 = vpop.permute.xlu1 %2495 }
0x1405   :  { %v2512_v48 = vmul.f32 %v5133_v0, %v5031_v52  ;;  %v2502_v44 = vmul.f32 %v5133_v0, %v5029_v3 }
0x1407   :  { %2522 = vst [vmem:[%s5180_s13 + $0x48] sm:$0xff] %v2512_v48  ;;  %v2263_v36 = vpop.xlane.xlu0 %2262 }
0x1408   :  { %3362 = vrcp.f32 %v2263_v36  ;;  %v2309_v10 = vand.u32 2147483648, %v2263_v36  ;;  %v2307_v20 = vand.u32 2147483647, %v2263_v36  ;;  %vm2303_vm9 = vweird.f32 %v2263_v36 }
0x1409   :  { %3364 = vrcp.f32 %v2265_v18 }
0x140a   :  { %v2310_v8 = vor.u32 1.1754944e-38, %v2309_v10  ;;  %vm2308_vm11 = vcmp.eq.f32.partialorder %v2307_v20, 8.507059e+37 }
0x140e   :  { %v3363_v16 = vpop.eup %3362 }
0x140f   :  { %v2299_v28 = vmul.f32 %v3363_v16, %v2263_v36  ;;  %vm2304_vm8 = vweird.f32 %v3363_v16  ;;  %v3365_v57 = vpop.eup %3364 }
0x1410   :  { %vm2305_vm10 = vmor %vm2303_vm9, %vm2304_vm8  ;;  %v2314_v7 = vmul.f32 %v3365_v57, %v2265_v18  ;;  %vm2319_vm12 = vweird.f32 %v3365_v57 }
0x1411   :  { %v2300_v9 = vsub.f32 1.0, %v2299_v28  ;;  %vm2320_vm14 = vmor %vm2318_vm13, %vm2319_vm12 }
0x1413   :  { %v2301_v11 = vmul.f32 %v3363_v16, %v2300_v9 }
0x1415   :  { %v2302_v43 = vadd.f32 %v3363_v16, %v2301_v11 }
0x1417   :  { %v2306_v34 = vsel %vm2305_vm10, %v3363_v16, %v2302_v43 }
0x1418   :  { %v2311_v52 = vsel %vm2308_vm11, %v2310_v8, %v2306_v34 }
0x1419   :  { %v2312_v54 = vmul.f32 %v5111_v2, %v2311_v52  ;;  %v2315_v2 = vsub.f32 1.0, %v2314_v7 }
0x141a   :  { %v2486_v37 = vpop.permute.xlu0 %2485 }
0x141b   :  { %v2465_v53 = vmul.f32 %v5090_v56, %v2312_v54  ;;  %v2500_v55 = vmul.f32 %v2486_v37, %v5021_v35  ;;  %v2510_v63 = vmul.f32 %v2486_v37, %v5023_v42  ;;  %v2316_v23 = vmul.f32 %v3365_v57, %v2315_v2 }
0x141c   :  { %v2324_v56 = vand.u32 2147483648, %v2265_v18  ;;  %v2322_v35 = vand.u32 2147483647, %v2265_v18 }
0x141d   :  { %v2505_v6 = vadd.f32 %v2500_v55, %v2465_v53  ;;  %2518 = vst [vmem:[%s5180_s13 + $0x28] sm:$0xff] %v2510_v63  ;;  %v2317_v29 = vadd.f32 %v3365_v57, %v2316_v23 }
0x141e   :  { %v2325_v19 = vor.u32 1.1754944e-38, %v2324_v56  ;;  %vm2323_vm15 = vcmp.eq.f32.partialorder %v2322_v35, 8.507059e+37 }
0x141f   :  { %2517 = vst [vmem:[%s5180_s13 + $0x20] sm:$0xff] %v2505_v6  ;;  %v2321_v42 = vsel %vm2320_vm14, %v3365_v57, %v2317_v29 }
0x1420   :  { %v2326_v31 = vsel %vm2323_vm15, %v2325_v19, %v2321_v42 }
0x1421   :  { %v2327_v21 = vmul.f32 %v5092_v30, %v2326_v31 }
0x1423   :  { %v2466_v33 = vmul.f32 %v5095_v27, %v2327_v21 }
0x1448   :  { %v2267_v61 = vpop.xlane.xlu2 %2266 }
0x1449   :  { %3366 = vrcp.f32 %v2267_v61  ;;  %v2339_v25 = vand.u32 2147483648, %v2267_v61  ;;  %v2337_v13 = vand.u32 2147483647, %v2267_v61  ;;  %vm2333_vm1 = vweird.f32 %v2267_v61 }
0x144b   :  { %vm2338_vm3 = vcmp.eq.f32.partialorder %v2337_v13, 8.507059e+37 }
0x144f   :  { %v3367_v62 = vpop.eup %3366 }
0x1450   :  { %v2329_v51 = vmul.f32 %v3367_v62, %v2267_v61  ;;  %v2491_v46 = vpop.permute.xlu2 %2490  ;;  %vm2334_vm0 = vweird.f32 %v3367_v62 }
0x1451   :  { %v2501_v39 = vmul.f32 %v2491_v46, %v5025_v15  ;;  %v2511_v45 = vmul.f32 %v2491_v46, %v5027_v26  ;;  %vm2335_vm2 = vmor %vm2333_vm1, %vm2334_vm0  ;;  %v2340_v15 = vor.u32 1.1754944e-38, %v2339_v25 }
0x1452   :  { %v2330_v4 = vsub.f32 1.0, %v2329_v51 }
0x1453   :  { %v2506_v47 = vadd.f32 %v2501_v39, %v2466_v33  ;;  %2520 = vst [vmem:[%s5180_s13 + $0x38] sm:$0xff] %v2511_v45 }
0x1454   :  { %v2331_v50 = vmul.f32 %v3367_v62, %v2330_v4 }
0x1455   :  { %2519 = vst [vmem:[%s5180_s13 + $0x30] sm:$0xff] %v2506_v47 }
0x1456   :  { %v2332_v30 = vadd.f32 %v3367_v62, %v2331_v50 }
0x1458   :  { %v2336_v27 = vsel %vm2335_vm2, %v3367_v62, %v2332_v30 }
0x1459   :  { %v2341_v26 = vsel %vm2338_vm3, %v2340_v15, %v2336_v27 }
0x145a   :  { %v2342_v32 = vmul.f32 %v5115_v5, %v2341_v26 }
0x145c   :  { %v2467_v41 = vmul.f32 %v5131_v12, %v2342_v32 }
0x145e   :  { %v2507_v38 = vadd.f32 %v2502_v44, %v2467_v41 }
0x1460   :  { %2521 = vst [vmem:[%s5180_s13 + $0x40] sm:$0xff] %v2507_v38 }

</bundles_post_ra>
